<compile_context>
chip_gen: v6e
topology: v6e:2x2x1
jax: 0.10.0
libtpu: 0.0.40
codegen_flags: <defaults>
</compile_context>

<pallas_src>
import functools
import math

import jax
import jax.numpy as jnp
import numpy as np
from jax.experimental import pallas as pl
from jax.experimental.pallas import tpu as pltpu

# ----------------------------- problem sizes ---------------------------------
N_NODES = 64          # real graph nodes (query / sublane axis — multiple of 8)
N_SRC = 128           # source / lane axis padded to one full 128-lane tile
IN_CH = 32            # in_channel (== out_channel so the gate fusion broadcasts)
OUT_CH = 32           # out_channel == per-head dim in TransformerConv
TRANS_HEADS = 2       # trans_heads
SEM_HEADS = 2         # semantic_head
SEM_HIDDEN = 96       # SemanticAttention hidden_size
SEM_HID_PAD = 128     # hidden padded to 128 so per-head column slices are lane-aligned
NUM_EDGE_TYPE = 2     # forward()'s early return means only relations {0, 1} are used
NUM_EDGES = 256
NEG_INF = -1e30

assert NUM_EDGE_TYPE == 2, "kernel mirrors the PyTorch early-return (exactly 2 relations)"


def _vmem():
    return pl.BlockSpec(memory_space=pltpu.MemorySpace.VMEM)


# ------------------------------ fused kernel ----------------------------------
def rgt_fused_kernel(x_ref, xt_ref, xp_ref, bias_ref, rmask_ref,
                     wq_ref, bq_ref, wkt_ref, bkt_ref, wv_ref, bv_ref,
                     ws_ref, bs_ref,
                     wgu_ref, wgx_ref, bg_ref,
                     w1_ref, b1_ref, w2_ref,
                     out_ref, *, heads, head_dim, num_rel, sem_heads, hid_pad):
    nq = x_ref.shape[0]                      # 64 real query nodes (sublanes)
    x = x_ref[...]                           # (64, 32) f32 (kept f32 for elementwise)
    xb = x.astype(jnp.bfloat16)              # bf16 copy for MXU operands
    xt = xt_ref[...]                         # (32, 128) bf16 — x^T, source-padded
    xp = xp_ref[...]                         # (128, 32) bf16 — x, source-padded

    scale = 1.0 / math.sqrt(head_dim)
    inv_heads = 1.0 / heads

    # Gate contribution from x: computed once, shared by both relations.
    gx = jnp.dot(xb, wgx_ref[...], preferred_element_type=jnp.float32) + bg_ref[...]

    zs = []
    for r in range(num_rel):                 # static unroll over relations
        bias = bias_ref[r].astype(jnp.float32)          # (64, 128) log-count / -1e30
        rmask = rmask_ref[r]                            # (64, 1) 1. if node has in-edges

        agg = jnp.zeros((nq, head_dim), jnp.float32)
        for h in range(heads):               # static unroll over heads
            q = jnp.dot(xb, wq_ref[r, h], preferred_element_type=jnp.float32) + bq_ref[r, h]
            kt = jnp.dot(wkt_ref[r, h], xt, preferred_element_type=jnp.float32) + bkt_ref[r, h]
            v = jnp.dot(xp, wv_ref[r, h], preferred_element_type=jnp.float32) + bv_ref[r, h]

            s = jnp.dot(q.astype(jnp.bfloat16), kt.astype(jnp.bfloat16),
                        preferred_element_type=jnp.float32) * scale + bias   # (64, 128)
            m = jnp.max(s, axis=-1, keepdims=True)
            e = jnp.exp(s - m)               # masked lanes: exp(-1e30 - m) underflows to 0
            z = jnp.sum(e, axis=-1, keepdims=True)      # >= 1 for rows with in-edges
            alpha = e * (pl.reciprocal(z, approx=True) * rmask)
            agg = agg + jnp.dot(alpha.astype(jnp.bfloat16), v.astype(jnp.bfloat16),
                                preferred_element_type=jnp.float32)

        skip = jnp.dot(xb, ws_ref[r], preferred_element_type=jnp.float32) + bs_ref[r]
        u = agg * inv_heads + skip           # concat=False -> head mean; root_weight skip

        g = jax.nn.sigmoid(jnp.dot(u.astype(jnp.bfloat16), wgu_ref[...],
                                   preferred_element_type=jnp.float32) + gx)
        zs.append(jnp.tanh(u) * g + x * (1.0 - g))

    # Semantic attention: per-head scalar score per relation, softmax over relations.
    inv_n = 1.0 / nq
    ps = []
    for r in range(num_rel):
        hh = jnp.tanh(jnp.dot(zs[r].astype(jnp.bfloat16), w1_ref[...],
                              preferred_element_type=jnp.float32) + b1_ref[...])
        ps.append(hh * w2_ref[...])          # (64, sem_heads * hid_pad); pads contribute 0

    c = [jnp.zeros((1, 1), jnp.float32) for _ in range(num_rel)]
    for h in range(sem_heads):               # static unroll over semantic heads
        sl = slice(h * hid_pad, (h + 1) * hid_pad)      # 128-aligned value slice
        s_r = [jnp.sum(ps[r][:, sl], keepdims=True) * inv_n for r in range(num_rel)]
        m = s_r[0]
        for r in range(1, num_rel):
            m = jnp.maximum(m, s_r[r])
        e_r = [jnp.exp(s_r[r] - m) for r in range(num_rel)]
        denom = e_r[0]
        for r in range(1, num_rel):
            denom = denom + e_r[r]
        inv_d = 1.0 / denom                  # exact 2-way softmax (essentially free)
        for r in range(num_rel):
            c[r] = c[r] + e_r[r] * inv_d

    inv_sh = 1.0 / sem_heads
    out = (c[0] * inv_sh) * zs[0]
    for r in range(1, num_rel):
        out = out + (c[r] * inv_sh) * zs[r]
    out_ref[...] = out


# ---------------------------- parameter packing -------------------------------
def pack_params(params):
    th, hd, d = TRANS_HEADS, OUT_CH, IN_CH
    wq = np.zeros((NUM_EDGE_TYPE, th, d, hd), np.float32)
    bq = np.zeros((NUM_EDGE_TYPE, th, 1, hd), np.float32)
    wkt = np.zeros((NUM_EDGE_TYPE, th, hd, d), np.float32)     # per-head Wk^T
    bkt = np.zeros((NUM_EDGE_TYPE, th, hd, 1), np.float32)     # per-head bk as a column
    wv = np.zeros((NUM_EDGE_TYPE, th, d, hd), np.float32)
    bv = np.zeros((NUM_EDGE_TYPE, th, 1, hd), np.float32)
    ws = np.zeros((NUM_EDGE_TYPE, d, OUT_CH), np.float32)
    bs = np.zeros((NUM_EDGE_TYPE, 1, OUT_CH), np.float32)
    for r, (wq_r, bq_r, wk_r, bk_r, wv_r, bv_r, ws_r, bs_r) in enumerate(params["trans"]):
        for h in range(th):
            sl = slice(h * hd, (h + 1) * hd)
            wq[r, h] = np.asarray(wq_r)[:, sl]
            bq[r, h] = np.asarray(bq_r)[:, sl]
            wkt[r, h] = np.asarray(wk_r)[:, sl].T
            bkt[r, h] = np.asarray(bk_r)[:, sl].T
            wv[r, h] = np.asarray(wv_r)[:, sl]
            bv[r, h] = np.asarray(bv_r)[:, sl]
        ws[r] = np.asarray(ws_r)
        bs[r] = np.asarray(bs_r)

    w1, b1, w2 = params["sem"]
    w1c = np.zeros((OUT_CH, SEM_HEADS * SEM_HID_PAD), np.float32)
    b1c = np.zeros((1, SEM_HEADS * SEM_HID_PAD), np.float32)
    w2c = np.zeros((1, SEM_HEADS * SEM_HID_PAD), np.float32)
    for h in range(SEM_HEADS):
        off = h * SEM_HID_PAD
        w1c[:, off:off + SEM_HIDDEN] = np.asarray(w1[h])
        b1c[:, off:off + SEM_HIDDEN] = np.asarray(b1[h])
        w2c[:, off:off + SEM_HIDDEN] = np.asarray(w2[h][:, 0])

    # MXU operands shipped bf16; biases (added to f32 dot results) stay f32.
    bf = jnp.bfloat16
    return dict(
        wq=jnp.asarray(wq, bf), bq=jnp.asarray(bq),
        wkt=jnp.asarray(wkt, bf), bkt=jnp.asarray(bkt),
        wv=jnp.asarray(wv, bf), bv=jnp.asarray(bv),
        ws=jnp.asarray(ws, bf), bs=jnp.asarray(bs),
        w1c=jnp.asarray(w1c, bf), b1c=jnp.asarray(b1c), w2c=jnp.asarray(w2c),
    )


# ------------------------------- full forward ---------------------------------
def rgt_layer_forward(features, adjacencies, params):
    n, d = features.shape
    assert n == N_NODES and d == IN_CH

    x = features.astype(jnp.float32)                                    # (64, 32)
    xt = jnp.zeros((IN_CH, N_SRC), jnp.bfloat16).at[:, :n].set(
        features.T.astype(jnp.bfloat16))                                # (32, 128)
    xp = jnp.zeros((N_SRC, IN_CH), jnp.bfloat16).at[:n, :].set(
        features.astype(jnp.bfloat16))                                  # (128, 32)

    adj = jnp.zeros((NUM_EDGE_TYPE, n, N_SRC), jnp.float32)
    for r in range(NUM_EDGE_TYPE):
        adj = adj.at[r, :, :n].set(adjacencies[r])
    # Additive bias folding both the edge mask and duplicate-edge counts.
    bias = jnp.where(adj > 0.0, jnp.log(jnp.maximum(adj, 1.0)), NEG_INF).astype(jnp.bfloat16)
    rmask = (jnp.sum(adj, axis=-1, keepdims=True) > 0.0).astype(jnp.float32)   # (2, 64, 1)

    p = pack_params(params)
    wgu, wgx, bg = params["gate"]
    wgu_b = jnp.asarray(wgu, jnp.bfloat16)
    wgx_b = jnp.asarray(wgx, jnp.bfloat16)
    bg_f = jnp.asarray(bg, jnp.float32)

    kern = functools.partial(rgt_fused_kernel, heads=TRANS_HEADS, head_dim=OUT_CH,
                             num_rel=NUM_EDGE_TYPE, sem_heads=SEM_HEADS,
                             hid_pad=SEM_HID_PAD)
    out = pl.pallas_call(
        kern,
        out_shape=jax.ShapeDtypeStruct((n, d), jnp.float32),
        in_specs=[_vmem()] * 19,
        out_specs=_vmem(),
    )(x, xt, xp, bias, rmask,
      p["wq"], p["bq"], p["wkt"], p["bkt"], p["wv"], p["bv"], p["ws"], p["bs"],
      wgu_b, wgx_b, bg_f, p["w1c"], p["b1c"], p["w2c"])
    return out


# ---------------------------- plain-JAX reference -----------------------------
def reference_forward(features, adjacencies, params):
    def relation(x, adj, tp):
        wq, bq, wk, bk, wv, bv, ws, bs = tp
        q, k, v = x @ wq + bq, x @ wk + bk, x @ wv + bv
        mask = adj > 0.0
        agg = jnp.zeros((x.shape[0], OUT_CH), jnp.float32)
        for h in range(TRANS_HEADS):
            sl = slice(h * OUT_CH, (h + 1) * OUT_CH)
            s = (q[:, sl] @ k[:, sl].T) / math.sqrt(OUT_CH)
            s = jnp.where(mask, s, -1e30)
            e = jnp.where(mask, adj * jnp.exp(s - s.max(-1, keepdims=True)), 0.0)
            alpha = e / jnp.maximum(e.sum(-1, keepdims=True), 1e-30)
            agg = agg + alpha @ v[:, sl]
        return agg / TRANS_HEADS + x @ ws + bs

    wgu, wgx, bg = params["gate"]
    zs = []
    for t in range(2):
        u = relation(features, adjacencies[t], params["trans"][t])
        g = jax.nn.sigmoid(u @ wgu + features @ wgx + bg)
        zs.append(jnp.tanh(u) * g + features * (1.0 - g))

    w1, b1, w2 = params["sem"]
    acc = jnp.zeros_like(zs[0])
    for h in range(SEM_HEADS):
        s = []
        for z in zs:
            s.append(jnp.mean(jnp.tanh(z @ w1[h] + b1[h]) @ w2[h]))
        s = jnp.stack(s)
        beta = jax.nn.softmax(s)
        acc = acc + beta[0] * zs[0] + beta[1] * zs[1]
    return acc / SEM_HEADS


# ------------------------------- setup helpers ---------------------------------
def init_params(key):
    def nrm(k, shape):
        return (0.1 * jax.random.normal(k, shape)).astype(jnp.float32)

    keys = iter(jax.random.split(key, 64))
    trans = []
    for _ in range(NUM_EDGE_TYPE):
        hc = TRANS_HEADS * OUT_CH
        trans.append((
            nrm(next(keys), (IN_CH, hc)), nrm(next(keys), (1, hc)),          # lin_query
            nrm(next(keys), (IN_CH, hc)), nrm(next(keys), (1, hc)),          # lin_key
            nrm(next(keys), (IN_CH, hc)), nrm(next(keys), (1, hc)),          # lin_value
            nrm(next(keys), (IN_CH, OUT_CH)), nrm(next(keys), (1, OUT_CH)),  # lin_skip
        ))
    gate = (
        nrm(next(keys), (OUT_CH, IN_CH)),   # weight rows acting on u (first in concat)
        nrm(next(keys), (IN_CH, IN_CH)),    # weight rows acting on features
        nrm(next(keys), (1, IN_CH)),
    )
    sem = (
        nrm(next(keys), (SEM_HEADS, OUT_CH, SEM_HIDDEN)),
        nrm(next(keys), (SEM_HEADS, 1, SEM_HIDDEN)),
        nrm(next(keys), (SEM_HEADS, SEM_HIDDEN, 1)),
    )
    return {"trans": trans, "gate": gate, "sem": sem}


def build_adjacency(edge_index, edge_type, rel, num_nodes):
    # PyG flow source_to_target: edge_index[0]=source j, edge_index[1]=target i.
    sel = (edge_type == rel).astype(jnp.float32)
    src, dst = edge_index[0], edge_index[1]
    adj = jnp.zeros((num_nodes, num_nodes), jnp.float32)
    return adj.at[dst, src].add(sel)


# ----------------------------------- main --------------------------------------
if __name__ == "__main__":
    root = jax.random.PRNGKey(0)
    k_feat, k_src, k_dst, k_typ, k_par = jax.random.split(root, 5)

    features = jax.random.normal(k_feat, (N_NODES, IN_CH), dtype=jnp.float32)
    edge_index = jnp.stack([
        jax.random.randint(k_src, (NUM_EDGES,), 0, N_NODES),
        jax.random.randint(k_dst, (NUM_EDGES,), 0, N_NODES),
    ])                                                            # (2, E)
    edge_type = jax.random.randint(k_typ, (NUM_EDGES,), 0, NUM_EDGE_TYPE)

    adjacencies = [build_adjacency(edge_index, edge_type, t, N_NODES)
                   for t in range(NUM_EDGE_TYPE)]
    params = init_params(k_par)

    out = rgt_layer_forward(features, adjacencies, params)
    out = jax.block_until_ready(out)

    ref = jax.block_until_ready(reference_forward(features, adjacencies, params))
    np.testing.assert_allclose(np.asarray(out), np.asarray(ref), rtol=2e-2, atol=2e-2)

    print("KERNEL_OK")
</pallas_src>

<mosaic_0001>
module attributes {stable_mosaic.version = 11 : i64} {
  func.func @rgt_fused_kernel(%arg0: memref<64x32xf32, #tpu.memory_space<vmem>>, %arg1: memref<32x128xbf16, #tpu.memory_space<vmem>>, %arg2: memref<128x32xbf16, #tpu.memory_space<vmem>>, %arg3: memref<2x64x128xbf16, #tpu.memory_space<vmem>>, %arg4: memref<2x64x1xf32, #tpu.memory_space<vmem>>, %arg5: memref<2x2x32x32xbf16, #tpu.memory_space<vmem>>, %arg6: memref<2x2x1x32xf32, #tpu.memory_space<vmem>>, %arg7: memref<2x2x32x32xbf16, #tpu.memory_space<vmem>>, %arg8: memref<2x2x32x1xf32, #tpu.memory_space<vmem>>, %arg9: memref<2x2x32x32xbf16, #tpu.memory_space<vmem>>, %arg10: memref<2x2x1x32xf32, #tpu.memory_space<vmem>>, %arg11: memref<2x32x32xbf16, #tpu.memory_space<vmem>>, %arg12: memref<2x1x32xf32, #tpu.memory_space<vmem>>, %arg13: memref<32x32xbf16, #tpu.memory_space<vmem>>, %arg14: memref<32x32xbf16, #tpu.memory_space<vmem>>, %arg15: memref<1x32xf32, #tpu.memory_space<vmem>>, %arg16: memref<32x256xbf16, #tpu.memory_space<vmem>>, %arg17: memref<1x256xf32, #tpu.memory_space<vmem>>, %arg18: memref<1x256xf32, #tpu.memory_space<vmem>>, %arg19: memref<64x32xf32, #tpu.memory_space<vmem>>) attributes {dimension_semantics = [], scalar_prefetch = 0 : i64, scratch_operands = 0 : i64, tpu.core_type = #tpu.core_type<tc>} {
    %c0 = arith.constant 0 : index
    %c0_0 = arith.constant 0 : index
    %0 = vector.load %arg0[%c0, %c0_0] : memref<64x32xf32, #tpu.memory_space<vmem>>, vector<64x32xf32>
    %1 = arith.truncf %0 : vector<64x32xf32> to vector<64x32xbf16>
    %c0_1 = arith.constant 0 : index
    %c0_2 = arith.constant 0 : index
    %2 = vector.load %arg1[%c0_1, %c0_2] : memref<32x128xbf16, #tpu.memory_space<vmem>>, vector<32x128xbf16>
    %c0_3 = arith.constant 0 : index
    %c0_4 = arith.constant 0 : index
    %3 = vector.load %arg2[%c0_3, %c0_4] : memref<128x32xbf16, #tpu.memory_space<vmem>>, vector<128x32xbf16>
    %c0_5 = arith.constant 0 : index
    %c0_6 = arith.constant 0 : index
    %4 = vector.load %arg14[%c0_5, %c0_6] : memref<32x32xbf16, #tpu.memory_space<vmem>>, vector<32x32xbf16>
    %cst = arith.constant dense<0.000000e+00> : vector<64x32xf32>
    %5 = tpu.matmul %1, %4, %cst {dimension_numbers = #tpu.dot_dimension_numbers<[1], [0], [0], [1], [0, 0, 1, 1], [], []>} : vector<64x32xbf16>, vector<32x32xbf16>, vector<64x32xf32> -> vector<64x32xf32>
    %c0_7 = arith.constant 0 : index
    %c0_8 = arith.constant 0 : index
    %6 = vector.load %arg15[%c0_7, %c0_8] : memref<1x32xf32, #tpu.memory_space<vmem>>, vector<1x32xf32>
    %7 = vector.broadcast %6 : vector<1x32xf32> to vector<64x32xf32>
    %8 = arith.addf %5, %7 : vector<64x32xf32>
    %c0_9 = arith.constant 0 : index
    %c0_10 = arith.constant 0 : index
    %c0_11 = arith.constant 0 : index
    %9 = vector.load %arg3[%c0_9, %c0_10, %c0_11] : memref<2x64x128xbf16, #tpu.memory_space<vmem>>, vector<1x64x128xbf16>
    %10 = vector.shape_cast %9 : vector<1x64x128xbf16> to vector<64x128xbf16>
    %11 = arith.extf %10 : vector<64x128xbf16> to vector<64x128xf32>
    %c0_12 = arith.constant 0 : index
    %c0_13 = arith.constant 0 : index
    %c0_14 = arith.constant 0 : index
    %12 = vector.load %arg4[%c0_12, %c0_13, %c0_14] : memref<2x64x1xf32, #tpu.memory_space<vmem>>, vector<1x64x1xf32>
    %13 = vector.shape_cast %12 : vector<1x64x1xf32> to vector<64x1xf32>
    %cst_15 = arith.constant 0.000000e+00 : f32
    %14 = vector.broadcast %cst_15 : f32 to vector<64x32xf32>
    %c0_16 = arith.constant 0 : index
    %c0_17 = arith.constant 0 : index
    %c0_18 = arith.constant 0 : index
    %c0_19 = arith.constant 0 : index
    %15 = vector.load %arg5[%c0_16, %c0_17, %c0_18, %c0_19] : memref<2x2x32x32xbf16, #tpu.memory_space<vmem>>, vector<1x1x32x32xbf16>
    %16 = vector.shape_cast %15 : vector<1x1x32x32xbf16> to vector<32x32xbf16>
    %cst_20 = arith.constant dense<0.000000e+00> : vector<64x32xf32>
    %17 = tpu.matmul %1, %16, %cst_20 {dimension_numbers = #tpu.dot_dimension_numbers<[1], [0], [0], [1], [0, 0, 1, 1], [], []>} : vector<64x32xbf16>, vector<32x32xbf16>, vector<64x32xf32> -> vector<64x32xf32>
    %c0_21 = arith.constant 0 : index
    %c0_22 = arith.constant 0 : index
    %c0_23 = arith.constant 0 : index
    %c0_24 = arith.constant 0 : index
    %18 = vector.load %arg6[%c0_21, %c0_22, %c0_23, %c0_24] : memref<2x2x1x32xf32, #tpu.memory_space<vmem>>, vector<1x1x1x32xf32>
    %19 = vector.shape_cast %18 : vector<1x1x1x32xf32> to vector<1x32xf32>
    %20 = vector.broadcast %19 : vector<1x32xf32> to vector<64x32xf32>
    %21 = arith.addf %17, %20 : vector<64x32xf32>
    %c0_25 = arith.constant 0 : index
    %c0_26 = arith.constant 0 : index
    %c0_27 = arith.constant 0 : index
    %c0_28 = arith.constant 0 : index
    %22 = vector.load %arg7[%c0_25, %c0_26, %c0_27, %c0_28] : memref<2x2x32x32xbf16, #tpu.memory_space<vmem>>, vector<1x1x32x32xbf16>
    %23 = vector.shape_cast %22 : vector<1x1x32x32xbf16> to vector<32x32xbf16>
    %cst_29 = arith.constant dense<0.000000e+00> : vector<32x128xf32>
    %24 = tpu.matmul %23, %2, %cst_29 {dimension_numbers = #tpu.dot_dimension_numbers<[1], [0], [0], [1], [0, 0, 1, 1], [], []>} : vector<32x32xbf16>, vector<32x128xbf16>, vector<32x128xf32> -> vector<32x128xf32>
    %c0_30 = arith.constant 0 : index
    %c0_31 = arith.constant 0 : index
    %c0_32 = arith.constant 0 : index
    %c0_33 = arith.constant 0 : index
    %25 = vector.load %arg8[%c0_30, %c0_31, %c0_32, %c0_33] : memref<2x2x32x1xf32, #tpu.memory_space<vmem>>, vector<1x1x32x1xf32>
    %26 = vector.shape_cast %25 : vector<1x1x32x1xf32> to vector<32x1xf32>
    %27 = vector.broadcast %26 : vector<32x1xf32> to vector<32x128xf32>
    %28 = arith.addf %24, %27 : vector<32x128xf32>
    %c0_34 = arith.constant 0 : index
    %c0_35 = arith.constant 0 : index
    %c0_36 = arith.constant 0 : index
    %c0_37 = arith.constant 0 : index
    %29 = vector.load %arg9[%c0_34, %c0_35, %c0_36, %c0_37] : memref<2x2x32x32xbf16, #tpu.memory_space<vmem>>, vector<1x1x32x32xbf16>
    %30 = vector.shape_cast %29 : vector<1x1x32x32xbf16> to vector<32x32xbf16>
    %cst_38 = arith.constant dense<0.000000e+00> : vector<128x32xf32>
    %31 = tpu.matmul %3, %30, %cst_38 {dimension_numbers = #tpu.dot_dimension_numbers<[1], [0], [0], [1], [0, 0, 1, 1], [], []>} : vector<128x32xbf16>, vector<32x32xbf16>, vector<128x32xf32> -> vector<128x32xf32>
    %c0_39 = arith.constant 0 : index
    %c0_40 = arith.constant 0 : index
    %c0_41 = arith.constant 0 : index
    %c0_42 = arith.constant 0 : index
    %32 = vector.load %arg10[%c0_39, %c0_40, %c0_41, %c0_42] : memref<2x2x1x32xf32, #tpu.memory_space<vmem>>, vector<1x1x1x32xf32>
    %33 = vector.shape_cast %32 : vector<1x1x1x32xf32> to vector<1x32xf32>
    %34 = vector.broadcast %33 : vector<1x32xf32> to vector<128x32xf32>
    %35 = arith.addf %31, %34 : vector<128x32xf32>
    %36 = arith.truncf %21 : vector<64x32xf32> to vector<64x32xbf16>
    %37 = arith.truncf %28 : vector<32x128xf32> to vector<32x128xbf16>
    %cst_43 = arith.constant dense<0.000000e+00> : vector<64x128xf32>
    %38 = tpu.matmul %36, %37, %cst_43 {dimension_numbers = #tpu.dot_dimension_numbers<[1], [0], [0], [1], [0, 0, 1, 1], [], []>} : vector<64x32xbf16>, vector<32x128xbf16>, vector<64x128xf32> -> vector<64x128xf32>
    %cst_44 = arith.constant 0.176776692 : f32
    %39 = vector.broadcast %cst_44 : f32 to vector<64x128xf32>
    %40 = arith.mulf %38, %39 : vector<64x128xf32>
    %41 = arith.addf %40, %11 : vector<64x128xf32>
    %cst_45 = arith.constant dense<0xFF800000> : vector<64xf32>
    %42 = vector.multi_reduction <maximumf>, %41, %cst_45 [1] : vector<64x128xf32> to vector<64xf32>
    %43 = vector.shape_cast %42 : vector<64xf32> to vector<64x1xf32>
    %44 = vector.broadcast %43 : vector<64x1xf32> to vector<64x128xf32>
    %45 = arith.subf %41, %44 : vector<64x128xf32>
    %46 = math.exp %45 : vector<64x128xf32>
    %cst_46 = arith.constant dense<0.000000e+00> : vector<64xf32>
    %47 = vector.multi_reduction <add>, %46, %cst_46 [1] : vector<64x128xf32> to vector<64xf32>
    %48 = vector.shape_cast %47 : vector<64xf32> to vector<64x1xf32>
    %49 = tpu.reciprocal %48 {approx = true} : vector<64x1xf32> -> vector<64x1xf32>
    %50 = arith.mulf %49, %13 : vector<64x1xf32>
    %51 = vector.broadcast %50 : vector<64x1xf32> to vector<64x128xf32>
    %52 = arith.mulf %46, %51 : vector<64x128xf32>
    %53 = arith.truncf %52 : vector<64x128xf32> to vector<64x128xbf16>
    %54 = arith.truncf %35 : vector<128x32xf32> to vector<128x32xbf16>
    %cst_47 = arith.constant dense<0.000000e+00> : vector<64x32xf32>
    %55 = tpu.matmul %53, %54, %cst_47 {dimension_numbers = #tpu.dot_dimension_numbers<[1], [0], [0], [1], [0, 0, 1, 1], [], []>} : vector<64x128xbf16>, vector<128x32xbf16>, vector<64x32xf32> -> vector<64x32xf32>
    %56 = arith.addf %14, %55 : vector<64x32xf32>
    %c0_48 = arith.constant 0 : index
    %c1 = arith.constant 1 : index
    %c0_49 = arith.constant 0 : index
    %c0_50 = arith.constant 0 : index
    %57 = vector.load %arg5[%c0_48, %c1, %c0_49, %c0_50] : memref<2x2x32x32xbf16, #tpu.memory_space<vmem>>, vector<1x1x32x32xbf16>
    %58 = vector.shape_cast %57 : vector<1x1x32x32xbf16> to vector<32x32xbf16>
    %cst_51 = arith.constant dense<0.000000e+00> : vector<64x32xf32>
    %59 = tpu.matmul %1, %58, %cst_51 {dimension_numbers = #tpu.dot_dimension_numbers<[1], [0], [0], [1], [0, 0, 1, 1], [], []>} : vector<64x32xbf16>, vector<32x32xbf16>, vector<64x32xf32> -> vector<64x32xf32>
    %c0_52 = arith.constant 0 : index
    %c1_53 = arith.constant 1 : index
    %c0_54 = arith.constant 0 : index
    %c0_55 = arith.constant 0 : index
    %60 = vector.load %arg6[%c0_52, %c1_53, %c0_54, %c0_55] : memref<2x2x1x32xf32, #tpu.memory_space<vmem>>, vector<1x1x1x32xf32>
    %61 = vector.shape_cast %60 : vector<1x1x1x32xf32> to vector<1x32xf32>
    %62 = vector.broadcast %61 : vector<1x32xf32> to vector<64x32xf32>
    %63 = arith.addf %59, %62 : vector<64x32xf32>
    %c0_56 = arith.constant 0 : index
    %c1_57 = arith.constant 1 : index
    %c0_58 = arith.constant 0 : index
    %c0_59 = arith.constant 0 : index
    %64 = vector.load %arg7[%c0_56, %c1_57, %c0_58, %c0_59] : memref<2x2x32x32xbf16, #tpu.memory_space<vmem>>, vector<1x1x32x32xbf16>
    %65 = vector.shape_cast %64 : vector<1x1x32x32xbf16> to vector<32x32xbf16>
    %cst_60 = arith.constant dense<0.000000e+00> : vector<32x128xf32>
    %66 = tpu.matmul %65, %2, %cst_60 {dimension_numbers = #tpu.dot_dimension_numbers<[1], [0], [0], [1], [0, 0, 1, 1], [], []>} : vector<32x32xbf16>, vector<32x128xbf16>, vector<32x128xf32> -> vector<32x128xf32>
    %c0_61 = arith.constant 0 : index
    %c1_62 = arith.constant 1 : index
    %c0_63 = arith.constant 0 : index
    %c0_64 = arith.constant 0 : index
    %67 = vector.load %arg8[%c0_61, %c1_62, %c0_63, %c0_64] : memref<2x2x32x1xf32, #tpu.memory_space<vmem>>, vector<1x1x32x1xf32>
    %68 = vector.shape_cast %67 : vector<1x1x32x1xf32> to vector<32x1xf32>
    %69 = vector.broadcast %68 : vector<32x1xf32> to vector<32x128xf32>
    %70 = arith.addf %66, %69 : vector<32x128xf32>
    %c0_65 = arith.constant 0 : index
    %c1_66 = arith.constant 1 : index
    %c0_67 = arith.constant 0 : index
    %c0_68 = arith.constant 0 : index
    %71 = vector.load %arg9[%c0_65, %c1_66, %c0_67, %c0_68] : memref<2x2x32x32xbf16, #tpu.memory_space<vmem>>, vector<1x1x32x32xbf16>
    %72 = vector.shape_cast %71 : vector<1x1x32x32xbf16> to vector<32x32xbf16>
    %cst_69 = arith.constant dense<0.000000e+00> : vector<128x32xf32>
    %73 = tpu.matmul %3, %72, %cst_69 {dimension_numbers = #tpu.dot_dimension_numbers<[1], [0], [0], [1], [0, 0, 1, 1], [], []>} : vector<128x32xbf16>, vector<32x32xbf16>, vector<128x32xf32> -> vector<128x32xf32>
    %c0_70 = arith.constant 0 : index
    %c1_71 = arith.constant 1 : index
    %c0_72 = arith.constant 0 : index
    %c0_73 = arith.constant 0 : index
    %74 = vector.load %arg10[%c0_70, %c1_71, %c0_72, %c0_73] : memref<2x2x1x32xf32, #tpu.memory_space<vmem>>, vector<1x1x1x32xf32>
    %75 = vector.shape_cast %74 : vector<1x1x1x32xf32> to vector<1x32xf32>
    %76 = vector.broadcast %75 : vector<1x32xf32> to vector<128x32xf32>
    %77 = arith.addf %73, %76 : vector<128x32xf32>
    %78 = arith.truncf %63 : vector<64x32xf32> to vector<64x32xbf16>
    %79 = arith.truncf %70 : vector<32x128xf32> to vector<32x128xbf16>
    %cst_74 = arith.constant dense<0.000000e+00> : vector<64x128xf32>
    %80 = tpu.matmul %78, %79, %cst_74 {dimension_numbers = #tpu.dot_dimension_numbers<[1], [0], [0], [1], [0, 0, 1, 1], [], []>} : vector<64x32xbf16>, vector<32x128xbf16>, vector<64x128xf32> -> vector<64x128xf32>
    %cst_75 = arith.constant 0.176776692 : f32
    %81 = vector.broadcast %cst_75 : f32 to vector<64x128xf32>
    %82 = arith.mulf %80, %81 : vector<64x128xf32>
    %83 = arith.addf %82, %11 : vector<64x128xf32>
    %cst_76 = arith.constant dense<0xFF800000> : vector<64xf32>
    %84 = vector.multi_reduction <maximumf>, %83, %cst_76 [1] : vector<64x128xf32> to vector<64xf32>
    %85 = vector.shape_cast %84 : vector<64xf32> to vector<64x1xf32>
    %86 = vector.broadcast %85 : vector<64x1xf32> to vector<64x128xf32>
    %87 = arith.subf %83, %86 : vector<64x128xf32>
    %88 = math.exp %87 : vector<64x128xf32>
    %cst_77 = arith.constant dense<0.000000e+00> : vector<64xf32>
    %89 = vector.multi_reduction <add>, %88, %cst_77 [1] : vector<64x128xf32> to vector<64xf32>
    %90 = vector.shape_cast %89 : vector<64xf32> to vector<64x1xf32>
    %91 = tpu.reciprocal %90 {approx = true} : vector<64x1xf32> -> vector<64x1xf32>
    %92 = arith.mulf %91, %13 : vector<64x1xf32>
    %93 = vector.broadcast %92 : vector<64x1xf32> to vector<64x128xf32>
    %94 = arith.mulf %88, %93 : vector<64x128xf32>
    %95 = arith.truncf %94 : vector<64x128xf32> to vector<64x128xbf16>
    %96 = arith.truncf %77 : vector<128x32xf32> to vector<128x32xbf16>
    %cst_78 = arith.constant dense<0.000000e+00> : vector<64x32xf32>
    %97 = tpu.matmul %95, %96, %cst_78 {dimension_numbers = #tpu.dot_dimension_numbers<[1], [0], [0], [1], [0, 0, 1, 1], [], []>} : vector<64x128xbf16>, vector<128x32xbf16>, vector<64x32xf32> -> vector<64x32xf32>
    %98 = arith.addf %56, %97 : vector<64x32xf32>
    %c0_79 = arith.constant 0 : index
    %c0_80 = arith.constant 0 : index
    %c0_81 = arith.constant 0 : index
    %99 = vector.load %arg11[%c0_79, %c0_80, %c0_81] : memref<2x32x32xbf16, #tpu.memory_space<vmem>>, vector<1x32x32xbf16>
    %100 = vector.shape_cast %99 : vector<1x32x32xbf16> to vector<32x32xbf16>
    %cst_82 = arith.constant dense<0.000000e+00> : vector<64x32xf32>
    %101 = tpu.matmul %1, %100, %cst_82 {dimension_numbers = #tpu.dot_dimension_numbers<[1], [0], [0], [1], [0, 0, 1, 1], [], []>} : vector<64x32xbf16>, vector<32x32xbf16>, vector<64x32xf32> -> vector<64x32xf32>
    %c0_83 = arith.constant 0 : index
    %c0_84 = arith.constant 0 : index
    %c0_85 = arith.constant 0 : index
    %102 = vector.load %arg12[%c0_83, %c0_84, %c0_85] : memref<2x1x32xf32, #tpu.memory_space<vmem>>, vector<1x1x32xf32>
    %103 = vector.shape_cast %102 : vector<1x1x32xf32> to vector<1x32xf32>
    %104 = vector.broadcast %103 : vector<1x32xf32> to vector<64x32xf32>
    %105 = arith.addf %101, %104 : vector<64x32xf32>
    %cst_86 = arith.constant 5.000000e-01 : f32
    %106 = vector.broadcast %cst_86 : f32 to vector<64x32xf32>
    %107 = arith.mulf %98, %106 : vector<64x32xf32>
    %108 = arith.addf %107, %105 : vector<64x32xf32>
    %109 = arith.truncf %108 : vector<64x32xf32> to vector<64x32xbf16>
    %c0_87 = arith.constant 0 : index
    %c0_88 = arith.constant 0 : index
    %110 = vector.load %arg13[%c0_87, %c0_88] : memref<32x32xbf16, #tpu.memory_space<vmem>>, vector<32x32xbf16>
    %cst_89 = arith.constant dense<0.000000e+00> : vector<64x32xf32>
    %111 = tpu.matmul %109, %110, %cst_89 {dimension_numbers = #tpu.dot_dimension_numbers<[1], [0], [0], [1], [0, 0, 1, 1], [], []>} : vector<64x32xbf16>, vector<32x32xbf16>, vector<64x32xf32> -> vector<64x32xf32>
    %112 = arith.addf %111, %8 : vector<64x32xf32>
    %113 = arith.negf %112 : vector<64x32xf32>
    %114 = math.exp %113 : vector<64x32xf32>
    %cst_90 = arith.constant 1.000000e+00 : f32
    %115 = vector.broadcast %cst_90 : f32 to vector<64x32xf32>
    %116 = arith.addf %115, %114 : vector<64x32xf32>
    %117 = arith.divf %115, %116 : vector<64x32xf32>
    %118 = math.tanh %108 : vector<64x32xf32>
    %119 = arith.mulf %118, %117 : vector<64x32xf32>
    %cst_91 = arith.constant 1.000000e+00 : f32
    %120 = vector.broadcast %cst_91 : f32 to vector<64x32xf32>
    %121 = arith.subf %120, %117 : vector<64x32xf32>
    %122 = arith.mulf %0, %121 : vector<64x32xf32>
    %123 = arith.addf %119, %122 : vector<64x32xf32>
    %c1_92 = arith.constant 1 : index
    %c0_93 = arith.constant 0 : index
    %c0_94 = arith.constant 0 : index
    %124 = vector.load %arg3[%c1_92, %c0_93, %c0_94] : memref<2x64x128xbf16, #tpu.memory_space<vmem>>, vector<1x64x128xbf16>
    %125 = vector.shape_cast %124 : vector<1x64x128xbf16> to vector<64x128xbf16>
    %126 = arith.extf %125 : vector<64x128xbf16> to vector<64x128xf32>
    %c1_95 = arith.constant 1 : index
    %c0_96 = arith.constant 0 : index
    %c0_97 = arith.constant 0 : index
    %127 = vector.load %arg4[%c1_95, %c0_96, %c0_97] : memref<2x64x1xf32, #tpu.memory_space<vmem>>, vector<1x64x1xf32>
    %128 = vector.shape_cast %127 : vector<1x64x1xf32> to vector<64x1xf32>
    %cst_98 = arith.constant 0.000000e+00 : f32
    %129 = vector.broadcast %cst_98 : f32 to vector<64x32xf32>
    %c1_99 = arith.constant 1 : index
    %c0_100 = arith.constant 0 : index
    %c0_101 = arith.constant 0 : index
    %c0_102 = arith.constant 0 : index
    %130 = vector.load %arg5[%c1_99, %c0_100, %c0_101, %c0_102] : memref<2x2x32x32xbf16, #tpu.memory_space<vmem>>, vector<1x1x32x32xbf16>
    %131 = vector.shape_cast %130 : vector<1x1x32x32xbf16> to vector<32x32xbf16>
    %cst_103 = arith.constant dense<0.000000e+00> : vector<64x32xf32>
    %132 = tpu.matmul %1, %131, %cst_103 {dimension_numbers = #tpu.dot_dimension_numbers<[1], [0], [0], [1], [0, 0, 1, 1], [], []>} : vector<64x32xbf16>, vector<32x32xbf16>, vector<64x32xf32> -> vector<64x32xf32>
    %c1_104 = arith.constant 1 : index
    %c0_105 = arith.constant 0 : index
    %c0_106 = arith.constant 0 : index
    %c0_107 = arith.constant 0 : index
    %133 = vector.load %arg6[%c1_104, %c0_105, %c0_106, %c0_107] : memref<2x2x1x32xf32, #tpu.memory_space<vmem>>, vector<1x1x1x32xf32>
    %134 = vector.shape_cast %133 : vector<1x1x1x32xf32> to vector<1x32xf32>
    %135 = vector.broadcast %134 : vector<1x32xf32> to vector<64x32xf32>
    %136 = arith.addf %132, %135 : vector<64x32xf32>
    %c1_108 = arith.constant 1 : index
    %c0_109 = arith.constant 0 : index
    %c0_110 = arith.constant 0 : index
    %c0_111 = arith.constant 0 : index
    %137 = vector.load %arg7[%c1_108, %c0_109, %c0_110, %c0_111] : memref<2x2x32x32xbf16, #tpu.memory_space<vmem>>, vector<1x1x32x32xbf16>
    %138 = vector.shape_cast %137 : vector<1x1x32x32xbf16> to vector<32x32xbf16>
    %cst_112 = arith.constant dense<0.000000e+00> : vector<32x128xf32>
    %139 = tpu.matmul %138, %2, %cst_112 {dimension_numbers = #tpu.dot_dimension_numbers<[1], [0], [0], [1], [0, 0, 1, 1], [], []>} : vector<32x32xbf16>, vector<32x128xbf16>, vector<32x128xf32> -> vector<32x128xf32>
    %c1_113 = arith.constant 1 : index
    %c0_114 = arith.constant 0 : index
    %c0_115 = arith.constant 0 : index
    %c0_116 = arith.constant 0 : index
    %140 = vector.load %arg8[%c1_113, %c0_114, %c0_115, %c0_116] : memref<2x2x32x1xf32, #tpu.memory_space<vmem>>, vector<1x1x32x1xf32>
    %141 = vector.shape_cast %140 : vector<1x1x32x1xf32> to vector<32x1xf32>
    %142 = vector.broadcast %141 : vector<32x1xf32> to vector<32x128xf32>
    %143 = arith.addf %139, %142 : vector<32x128xf32>
    %c1_117 = arith.constant 1 : index
    %c0_118 = arith.constant 0 : index
    %c0_119 = arith.constant 0 : index
    %c0_120 = arith.constant 0 : index
    %144 = vector.load %arg9[%c1_117, %c0_118, %c0_119, %c0_120] : memref<2x2x32x32xbf16, #tpu.memory_space<vmem>>, vector<1x1x32x32xbf16>
    %145 = vector.shape_cast %144 : vector<1x1x32x32xbf16> to vector<32x32xbf16>
    %cst_121 = arith.constant dense<0.000000e+00> : vector<128x32xf32>
    %146 = tpu.matmul %3, %145, %cst_121 {dimension_numbers = #tpu.dot_dimension_numbers<[1], [0], [0], [1], [0, 0, 1, 1], [], []>} : vector<128x32xbf16>, vector<32x32xbf16>, vector<128x32xf32> -> vector<128x32xf32>
    %c1_122 = arith.constant 1 : index
    %c0_123 = arith.constant 0 : index
    %c0_124 = arith.constant 0 : index
    %c0_125 = arith.constant 0 : index
    %147 = vector.load %arg10[%c1_122, %c0_123, %c0_124, %c0_125] : memref<2x2x1x32xf32, #tpu.memory_space<vmem>>, vector<1x1x1x32xf32>
    %148 = vector.shape_cast %147 : vector<1x1x1x32xf32> to vector<1x32xf32>
    %149 = vector.broadcast %148 : vector<1x32xf32> to vector<128x32xf32>
    %150 = arith.addf %146, %149 : vector<128x32xf32>
    %151 = arith.truncf %136 : vector<64x32xf32> to vector<64x32xbf16>
    %152 = arith.truncf %143 : vector<32x128xf32> to vector<32x128xbf16>
    %cst_126 = arith.constant dense<0.000000e+00> : vector<64x128xf32>
    %153 = tpu.matmul %151, %152, %cst_126 {dimension_numbers = #tpu.dot_dimension_numbers<[1], [0], [0], [1], [0, 0, 1, 1], [], []>} : vector<64x32xbf16>, vector<32x128xbf16>, vector<64x128xf32> -> vector<64x128xf32>
    %cst_127 = arith.constant 0.176776692 : f32
    %154 = vector.broadcast %cst_127 : f32 to vector<64x128xf32>
    %155 = arith.mulf %153, %154 : vector<64x128xf32>
    %156 = arith.addf %155, %126 : vector<64x128xf32>
    %cst_128 = arith.constant dense<0xFF800000> : vector<64xf32>
    %157 = vector.multi_reduction <maximumf>, %156, %cst_128 [1] : vector<64x128xf32> to vector<64xf32>
    %158 = vector.shape_cast %157 : vector<64xf32> to vector<64x1xf32>
    %159 = vector.broadcast %158 : vector<64x1xf32> to vector<64x128xf32>
    %160 = arith.subf %156, %159 : vector<64x128xf32>
    %161 = math.exp %160 : vector<64x128xf32>
    %cst_129 = arith.constant dense<0.000000e+00> : vector<64xf32>
    %162 = vector.multi_reduction <add>, %161, %cst_129 [1] : vector<64x128xf32> to vector<64xf32>
    %163 = vector.shape_cast %162 : vector<64xf32> to vector<64x1xf32>
    %164 = tpu.reciprocal %163 {approx = true} : vector<64x1xf32> -> vector<64x1xf32>
    %165 = arith.mulf %164, %128 : vector<64x1xf32>
    %166 = vector.broadcast %165 : vector<64x1xf32> to vector<64x128xf32>
    %167 = arith.mulf %161, %166 : vector<64x128xf32>
    %168 = arith.truncf %167 : vector<64x128xf32> to vector<64x128xbf16>
    %169 = arith.truncf %150 : vector<128x32xf32> to vector<128x32xbf16>
    %cst_130 = arith.constant dense<0.000000e+00> : vector<64x32xf32>
    %170 = tpu.matmul %168, %169, %cst_130 {dimension_numbers = #tpu.dot_dimension_numbers<[1], [0], [0], [1], [0, 0, 1, 1], [], []>} : vector<64x128xbf16>, vector<128x32xbf16>, vector<64x32xf32> -> vector<64x32xf32>
    %171 = arith.addf %129, %170 : vector<64x32xf32>
    %c1_131 = arith.constant 1 : index
    %c1_132 = arith.constant 1 : index
    %c0_133 = arith.constant 0 : index
    %c0_134 = arith.constant 0 : index
    %172 = vector.load %arg5[%c1_131, %c1_132, %c0_133, %c0_134] : memref<2x2x32x32xbf16, #tpu.memory_space<vmem>>, vector<1x1x32x32xbf16>
    %173 = vector.shape_cast %172 : vector<1x1x32x32xbf16> to vector<32x32xbf16>
    %cst_135 = arith.constant dense<0.000000e+00> : vector<64x32xf32>
    %174 = tpu.matmul %1, %173, %cst_135 {dimension_numbers = #tpu.dot_dimension_numbers<[1], [0], [0], [1], [0, 0, 1, 1], [], []>} : vector<64x32xbf16>, vector<32x32xbf16>, vector<64x32xf32> -> vector<64x32xf32>
    %c1_136 = arith.constant 1 : index
    %c1_137 = arith.constant 1 : index
    %c0_138 = arith.constant 0 : index
    %c0_139 = arith.constant 0 : index
    %175 = vector.load %arg6[%c1_136, %c1_137, %c0_138, %c0_139] : memref<2x2x1x32xf32, #tpu.memory_space<vmem>>, vector<1x1x1x32xf32>
    %176 = vector.shape_cast %175 : vector<1x1x1x32xf32> to vector<1x32xf32>
    %177 = vector.broadcast %176 : vector<1x32xf32> to vector<64x32xf32>
    %178 = arith.addf %174, %177 : vector<64x32xf32>
    %c1_140 = arith.constant 1 : index
    %c1_141 = arith.constant 1 : index
    %c0_142 = arith.constant 0 : index
    %c0_143 = arith.constant 0 : index
    %179 = vector.load %arg7[%c1_140, %c1_141, %c0_142, %c0_143] : memref<2x2x32x32xbf16, #tpu.memory_space<vmem>>, vector<1x1x32x32xbf16>
    %180 = vector.shape_cast %179 : vector<1x1x32x32xbf16> to vector<32x32xbf16>
    %cst_144 = arith.constant dense<0.000000e+00> : vector<32x128xf32>
    %181 = tpu.matmul %180, %2, %cst_144 {dimension_numbers = #tpu.dot_dimension_numbers<[1], [0], [0], [1], [0, 0, 1, 1], [], []>} : vector<32x32xbf16>, vector<32x128xbf16>, vector<32x128xf32> -> vector<32x128xf32>
    %c1_145 = arith.constant 1 : index
    %c1_146 = arith.constant 1 : index
    %c0_147 = arith.constant 0 : index
    %c0_148 = arith.constant 0 : index
    %182 = vector.load %arg8[%c1_145, %c1_146, %c0_147, %c0_148] : memref<2x2x32x1xf32, #tpu.memory_space<vmem>>, vector<1x1x32x1xf32>
    %183 = vector.shape_cast %182 : vector<1x1x32x1xf32> to vector<32x1xf32>
    %184 = vector.broadcast %183 : vector<32x1xf32> to vector<32x128xf32>
    %185 = arith.addf %181, %184 : vector<32x128xf32>
    %c1_149 = arith.constant 1 : index
    %c1_150 = arith.constant 1 : index
    %c0_151 = arith.constant 0 : index
    %c0_152 = arith.constant 0 : index
    %186 = vector.load %arg9[%c1_149, %c1_150, %c0_151, %c0_152] : memref<2x2x32x32xbf16, #tpu.memory_space<vmem>>, vector<1x1x32x32xbf16>
    %187 = vector.shape_cast %186 : vector<1x1x32x32xbf16> to vector<32x32xbf16>
    %cst_153 = arith.constant dense<0.000000e+00> : vector<128x32xf32>
    %188 = tpu.matmul %3, %187, %cst_153 {dimension_numbers = #tpu.dot_dimension_numbers<[1], [0], [0], [1], [0, 0, 1, 1], [], []>} : vector<128x32xbf16>, vector<32x32xbf16>, vector<128x32xf32> -> vector<128x32xf32>
    %c1_154 = arith.constant 1 : index
    %c1_155 = arith.constant 1 : index
    %c0_156 = arith.constant 0 : index
    %c0_157 = arith.constant 0 : index
    %189 = vector.load %arg10[%c1_154, %c1_155, %c0_156, %c0_157] : memref<2x2x1x32xf32, #tpu.memory_space<vmem>>, vector<1x1x1x32xf32>
    %190 = vector.shape_cast %189 : vector<1x1x1x32xf32> to vector<1x32xf32>
    %191 = vector.broadcast %190 : vector<1x32xf32> to vector<128x32xf32>
    %192 = arith.addf %188, %191 : vector<128x32xf32>
    %193 = arith.truncf %178 : vector<64x32xf32> to vector<64x32xbf16>
    %194 = arith.truncf %185 : vector<32x128xf32> to vector<32x128xbf16>
    %cst_158 = arith.constant dense<0.000000e+00> : vector<64x128xf32>
    %195 = tpu.matmul %193, %194, %cst_158 {dimension_numbers = #tpu.dot_dimension_numbers<[1], [0], [0], [1], [0, 0, 1, 1], [], []>} : vector<64x32xbf16>, vector<32x128xbf16>, vector<64x128xf32> -> vector<64x128xf32>
    %cst_159 = arith.constant 0.176776692 : f32
    %196 = vector.broadcast %cst_159 : f32 to vector<64x128xf32>
    %197 = arith.mulf %195, %196 : vector<64x128xf32>
    %198 = arith.addf %197, %126 : vector<64x128xf32>
    %cst_160 = arith.constant dense<0xFF800000> : vector<64xf32>
    %199 = vector.multi_reduction <maximumf>, %198, %cst_160 [1] : vector<64x128xf32> to vector<64xf32>
    %200 = vector.shape_cast %199 : vector<64xf32> to vector<64x1xf32>
    %201 = vector.broadcast %200 : vector<64x1xf32> to vector<64x128xf32>
    %202 = arith.subf %198, %201 : vector<64x128xf32>
    %203 = math.exp %202 : vector<64x128xf32>
    %cst_161 = arith.constant dense<0.000000e+00> : vector<64xf32>
    %204 = vector.multi_reduction <add>, %203, %cst_161 [1] : vector<64x128xf32> to vector<64xf32>
    %205 = vector.shape_cast %204 : vector<64xf32> to vector<64x1xf32>
    %206 = tpu.reciprocal %205 {approx = true} : vector<64x1xf32> -> vector<64x1xf32>
    %207 = arith.mulf %206, %128 : vector<64x1xf32>
    %208 = vector.broadcast %207 : vector<64x1xf32> to vector<64x128xf32>
    %209 = arith.mulf %203, %208 : vector<64x128xf32>
    %210 = arith.truncf %209 : vector<64x128xf32> to vector<64x128xbf16>
    %211 = arith.truncf %192 : vector<128x32xf32> to vector<128x32xbf16>
    %cst_162 = arith.constant dense<0.000000e+00> : vector<64x32xf32>
    %212 = tpu.matmul %210, %211, %cst_162 {dimension_numbers = #tpu.dot_dimension_numbers<[1], [0], [0], [1], [0, 0, 1, 1], [], []>} : vector<64x128xbf16>, vector<128x32xbf16>, vector<64x32xf32> -> vector<64x32xf32>
    %213 = arith.addf %171, %212 : vector<64x32xf32>
    %c1_163 = arith.constant 1 : index
    %c0_164 = arith.constant 0 : index
    %c0_165 = arith.constant 0 : index
    %214 = vector.load %arg11[%c1_163, %c0_164, %c0_165] : memref<2x32x32xbf16, #tpu.memory_space<vmem>>, vector<1x32x32xbf16>
    %215 = vector.shape_cast %214 : vector<1x32x32xbf16> to vector<32x32xbf16>
    %cst_166 = arith.constant dense<0.000000e+00> : vector<64x32xf32>
    %216 = tpu.matmul %1, %215, %cst_166 {dimension_numbers = #tpu.dot_dimension_numbers<[1], [0], [0], [1], [0, 0, 1, 1], [], []>} : vector<64x32xbf16>, vector<32x32xbf16>, vector<64x32xf32> -> vector<64x32xf32>
    %c1_167 = arith.constant 1 : index
    %c0_168 = arith.constant 0 : index
    %c0_169 = arith.constant 0 : index
    %217 = vector.load %arg12[%c1_167, %c0_168, %c0_169] : memref<2x1x32xf32, #tpu.memory_space<vmem>>, vector<1x1x32xf32>
    %218 = vector.shape_cast %217 : vector<1x1x32xf32> to vector<1x32xf32>
    %219 = vector.broadcast %218 : vector<1x32xf32> to vector<64x32xf32>
    %220 = arith.addf %216, %219 : vector<64x32xf32>
    %cst_170 = arith.constant 5.000000e-01 : f32
    %221 = vector.broadcast %cst_170 : f32 to vector<64x32xf32>
    %222 = arith.mulf %213, %221 : vector<64x32xf32>
    %223 = arith.addf %222, %220 : vector<64x32xf32>
    %224 = arith.truncf %223 : vector<64x32xf32> to vector<64x32xbf16>
    %c0_171 = arith.constant 0 : index
    %c0_172 = arith.constant 0 : index
    %225 = vector.load %arg13[%c0_171, %c0_172] : memref<32x32xbf16, #tpu.memory_space<vmem>>, vector<32x32xbf16>
    %cst_173 = arith.constant dense<0.000000e+00> : vector<64x32xf32>
    %226 = tpu.matmul %224, %225, %cst_173 {dimension_numbers = #tpu.dot_dimension_numbers<[1], [0], [0], [1], [0, 0, 1, 1], [], []>} : vector<64x32xbf16>, vector<32x32xbf16>, vector<64x32xf32> -> vector<64x32xf32>
    %227 = arith.addf %226, %8 : vector<64x32xf32>
    %228 = arith.negf %227 : vector<64x32xf32>
    %229 = math.exp %228 : vector<64x32xf32>
    %cst_174 = arith.constant 1.000000e+00 : f32
    %230 = vector.broadcast %cst_174 : f32 to vector<64x32xf32>
    %231 = arith.addf %230, %229 : vector<64x32xf32>
    %232 = arith.divf %230, %231 : vector<64x32xf32>
    %233 = math.tanh %223 : vector<64x32xf32>
    %234 = arith.mulf %233, %232 : vector<64x32xf32>
    %cst_175 = arith.constant 1.000000e+00 : f32
    %235 = vector.broadcast %cst_175 : f32 to vector<64x32xf32>
    %236 = arith.subf %235, %232 : vector<64x32xf32>
    %237 = arith.mulf %0, %236 : vector<64x32xf32>
    %238 = arith.addf %234, %237 : vector<64x32xf32>
    %239 = arith.truncf %123 : vector<64x32xf32> to vector<64x32xbf16>
    %c0_176 = arith.constant 0 : index
    %c0_177 = arith.constant 0 : index
    %240 = vector.load %arg16[%c0_176, %c0_177] : memref<32x256xbf16, #tpu.memory_space<vmem>>, vector<32x256xbf16>
    %cst_178 = arith.constant dense<0.000000e+00> : vector<64x256xf32>
    %241 = tpu.matmul %239, %240, %cst_178 {dimension_numbers = #tpu.dot_dimension_numbers<[1], [0], [0], [1], [0, 0, 1, 1], [], []>} : vector<64x32xbf16>, vector<32x256xbf16>, vector<64x256xf32> -> vector<64x256xf32>
    %c0_179 = arith.constant 0 : index
    %c0_180 = arith.constant 0 : index
    %242 = vector.load %arg17[%c0_179, %c0_180] : memref<1x256xf32, #tpu.memory_space<vmem>>, vector<1x256xf32>
    %243 = vector.broadcast %242 : vector<1x256xf32> to vector<64x256xf32>
    %244 = arith.addf %241, %243 : vector<64x256xf32>
    %245 = math.tanh %244 : vector<64x256xf32>
    %c0_181 = arith.constant 0 : index
    %c0_182 = arith.constant 0 : index
    %246 = vector.load %arg18[%c0_181, %c0_182] : memref<1x256xf32, #tpu.memory_space<vmem>>, vector<1x256xf32>
    %247 = vector.broadcast %246 : vector<1x256xf32> to vector<64x256xf32>
    %248 = arith.mulf %245, %247 : vector<64x256xf32>
    %249 = arith.truncf %238 : vector<64x32xf32> to vector<64x32xbf16>
    %c0_183 = arith.constant 0 : index
    %c0_184 = arith.constant 0 : index
    %250 = vector.load %arg16[%c0_183, %c0_184] : memref<32x256xbf16, #tpu.memory_space<vmem>>, vector<32x256xbf16>
    %cst_185 = arith.constant dense<0.000000e+00> : vector<64x256xf32>
    %251 = tpu.matmul %249, %250, %cst_185 {dimension_numbers = #tpu.dot_dimension_numbers<[1], [0], [0], [1], [0, 0, 1, 1], [], []>} : vector<64x32xbf16>, vector<32x256xbf16>, vector<64x256xf32> -> vector<64x256xf32>
    %c0_186 = arith.constant 0 : index
    %c0_187 = arith.constant 0 : index
    %252 = vector.load %arg17[%c0_186, %c0_187] : memref<1x256xf32, #tpu.memory_space<vmem>>, vector<1x256xf32>
    %253 = vector.broadcast %252 : vector<1x256xf32> to vector<64x256xf32>
    %254 = arith.addf %251, %253 : vector<64x256xf32>
    %255 = math.tanh %254 : vector<64x256xf32>
    %c0_188 = arith.constant 0 : index
    %c0_189 = arith.constant 0 : index
    %256 = vector.load %arg18[%c0_188, %c0_189] : memref<1x256xf32, #tpu.memory_space<vmem>>, vector<1x256xf32>
    %257 = vector.broadcast %256 : vector<1x256xf32> to vector<64x256xf32>
    %258 = arith.mulf %255, %257 : vector<64x256xf32>
    %cst_190 = arith.constant 0.000000e+00 : f32
    %259 = vector.broadcast %cst_190 : f32 to vector<1x1xf32>
    %cst_191 = arith.constant 0.000000e+00 : f32
    %260 = vector.broadcast %cst_191 : f32 to vector<1x1xf32>
    %261 = vector.extract_strided_slice %248 {offsets = [0, 0], sizes = [64, 128], strides = [1, 1]} : vector<64x256xf32> to vector<64x128xf32>
    %262 = vector.shape_cast %261 : vector<64x128xf32> to vector<1x64x128xf32>
    %cst_192 = arith.constant dense<0.000000e+00> : vector<1xf32>
    %263 = vector.multi_reduction <add>, %262, %cst_192 [1, 2] : vector<1x64x128xf32> to vector<1xf32>
    %264 = vector.shape_cast %263 : vector<1xf32> to vector<1x1x1xf32>
    %265 = vector.extract %264[0, 0, 0] : f32 from vector<1x1x1xf32>
    %266 = vector.broadcast %265 : f32 to vector<1x1xf32>
    %cst_193 = arith.constant 1.562500e-02 : f32
    %267 = vector.broadcast %cst_193 : f32 to vector<1x1xf32>
    %268 = arith.mulf %266, %267 : vector<1x1xf32>
    %269 = vector.extract_strided_slice %258 {offsets = [0, 0], sizes = [64, 128], strides = [1, 1]} : vector<64x256xf32> to vector<64x128xf32>
    %270 = vector.shape_cast %269 : vector<64x128xf32> to vector<1x64x128xf32>
    %cst_194 = arith.constant dense<0.000000e+00> : vector<1xf32>
    %271 = vector.multi_reduction <add>, %270, %cst_194 [1, 2] : vector<1x64x128xf32> to vector<1xf32>
    %272 = vector.shape_cast %271 : vector<1xf32> to vector<1x1x1xf32>
    %273 = vector.extract %272[0, 0, 0] : f32 from vector<1x1x1xf32>
    %274 = vector.broadcast %273 : f32 to vector<1x1xf32>
    %cst_195 = arith.constant 1.562500e-02 : f32
    %275 = vector.broadcast %cst_195 : f32 to vector<1x1xf32>
    %276 = arith.mulf %274, %275 : vector<1x1xf32>
    %277 = arith.maximumf %268, %276 : vector<1x1xf32>
    %278 = arith.subf %268, %277 : vector<1x1xf32>
    %279 = math.exp %278 : vector<1x1xf32>
    %280 = arith.subf %276, %277 : vector<1x1xf32>
    %281 = math.exp %280 : vector<1x1xf32>
    %282 = arith.addf %279, %281 : vector<1x1xf32>
    %cst_196 = arith.constant 1.000000e+00 : f32
    %283 = vector.broadcast %cst_196 : f32 to vector<1x1xf32>
    %284 = arith.divf %283, %282 : vector<1x1xf32>
    %285 = arith.mulf %279, %284 : vector<1x1xf32>
    %286 = arith.addf %259, %285 : vector<1x1xf32>
    %287 = arith.mulf %281, %284 : vector<1x1xf32>
    %288 = arith.addf %260, %287 : vector<1x1xf32>
    %289 = vector.extract_strided_slice %248 {offsets = [0, 128], sizes = [64, 128], strides = [1, 1]} : vector<64x256xf32> to vector<64x128xf32>
    %290 = vector.shape_cast %289 : vector<64x128xf32> to vector<1x64x128xf32>
    %cst_197 = arith.constant dense<0.000000e+00> : vector<1xf32>
    %291 = vector.multi_reduction <add>, %290, %cst_197 [1, 2] : vector<1x64x128xf32> to vector<1xf32>
    %292 = vector.shape_cast %291 : vector<1xf32> to vector<1x1x1xf32>
    %293 = vector.extract %292[0, 0, 0] : f32 from vector<1x1x1xf32>
    %294 = vector.broadcast %293 : f32 to vector<1x1xf32>
    %cst_198 = arith.constant 1.562500e-02 : f32
    %295 = vector.broadcast %cst_198 : f32 to vector<1x1xf32>
    %296 = arith.mulf %294, %295 : vector<1x1xf32>
    %297 = vector.extract_strided_slice %258 {offsets = [0, 128], sizes = [64, 128], strides = [1, 1]} : vector<64x256xf32> to vector<64x128xf32>
    %298 = vector.shape_cast %297 : vector<64x128xf32> to vector<1x64x128xf32>
    %cst_199 = arith.constant dense<0.000000e+00> : vector<1xf32>
    %299 = vector.multi_reduction <add>, %298, %cst_199 [1, 2] : vector<1x64x128xf32> to vector<1xf32>
    %300 = vector.shape_cast %299 : vector<1xf32> to vector<1x1x1xf32>
    %301 = vector.extract %300[0, 0, 0] : f32 from vector<1x1x1xf32>
    %302 = vector.broadcast %301 : f32 to vector<1x1xf32>
    %cst_200 = arith.constant 1.562500e-02 : f32
    %303 = vector.broadcast %cst_200 : f32 to vector<1x1xf32>
    %304 = arith.mulf %302, %303 : vector<1x1xf32>
    %305 = arith.maximumf %296, %304 : vector<1x1xf32>
    %306 = arith.subf %296, %305 : vector<1x1xf32>
    %307 = math.exp %306 : vector<1x1xf32>
    %308 = arith.subf %304, %305 : vector<1x1xf32>
    %309 = math.exp %308 : vector<1x1xf32>
    %310 = arith.addf %307, %309 : vector<1x1xf32>
    %cst_201 = arith.constant 1.000000e+00 : f32
    %311 = vector.broadcast %cst_201 : f32 to vector<1x1xf32>
    %312 = arith.divf %311, %310 : vector<1x1xf32>
    %313 = arith.mulf %307, %312 : vector<1x1xf32>
    %314 = arith.addf %286, %313 : vector<1x1xf32>
    %315 = arith.mulf %309, %312 : vector<1x1xf32>
    %316 = arith.addf %288, %315 : vector<1x1xf32>
    %cst_202 = arith.constant 5.000000e-01 : f32
    %317 = vector.broadcast %cst_202 : f32 to vector<1x1xf32>
    %318 = arith.mulf %314, %317 : vector<1x1xf32>
    %319 = vector.broadcast %318 : vector<1x1xf32> to vector<64x32xf32>
    %320 = arith.mulf %319, %123 : vector<64x32xf32>
    %cst_203 = arith.constant 5.000000e-01 : f32
    %321 = vector.broadcast %cst_203 : f32 to vector<1x1xf32>
    %322 = arith.mulf %316, %321 : vector<1x1xf32>
    %323 = vector.broadcast %322 : vector<1x1xf32> to vector<64x32xf32>
    %324 = arith.mulf %323, %238 : vector<64x32xf32>
    %325 = arith.addf %320, %324 : vector<64x32xf32>
    %c0_204 = arith.constant 0 : index
    %c0_205 = arith.constant 0 : index
    %326 = vector.load %arg19[%c0_204, %c0_205] : memref<64x32xf32, #tpu.memory_space<vmem>>, vector<64x32xf32>
    tpu.vector_store %arg19[%c0_204, %c0_205], %325 {strides = array<i32>} : memref<64x32xf32, #tpu.memory_space<vmem>>, vector<64x32xf32>,
    return
  }
}

</mosaic_0001>

<bundles_post_ra>
// kernel: tpu_custom_call.1
= control target key start
LH: loop header
LB: loop body
LE: loop exit
PB: predicated region body
PF: predicated region fallthrough
CT: control target
= control target key end

     0   :  { %v6397_v1 = vmov 0   ;;  %vm118_vm0 = vcmask 261120   ;;  %s6373_s14 = inlined_call_operand.vmem [shape: bf16[32,32], index: 14, kind: input, shape index: {}]   ;;  %s6374_s5 = inlined_call_operand.vmem [shape: bf16[2,2,32,32], index: 5, kind: input, shape index: {}]   ;;  %s6375_s0 = inlined_call_operand.vmem [shape: f32[64,32], index: 0, kind: input, shape index: {}]   ;;  %s6376_s1 = inlined_call_operand.vmem [shape: bf16[32,128], index: 1, kind: input, shape index: {}]   ;;  %s6377_s9 = inlined_call_operand.vmem [shape: bf16[2,2,32,32], index: 9, kind: input, shape index: {}]   ;;  %s6378_s7 = inlined_call_operand.vmem [shape: bf16[2,2,32,32], index: 7, kind: input, shape index: {}]   ;;  %s6379_s2 = inlined_call_operand.vmem [shape: bf16[128,32], index: 2, kind: input, shape index: {}]   ;;  %s6380_s8 = inlined_call_operand.vmem [shape: f32[2,2,32,1], index: 8, kind: input, shape index: {}]   ;;  %s6381_s6 = inlined_call_operand.vmem [shape: f32[2,2,1,32], index: 6, kind: input, shape index: {}]   ;;  %s6382_s10 = inlined_call_operand.vmem [shape: f32[2,2,1,32], index: 10, kind: input, shape index: {}]   ;;  %s6383_s3 = inlined_call_operand.vmem [shape: bf16[2,64,128], index: 3, kind: input, shape index: {}]   ;;  %s6384_s4 = inlined_call_operand.vmem [shape: f32[2,64,1], index: 4, kind: input, shape index: {}]   ;;  %s6385_s11 = inlined_call_operand.vmem [shape: bf16[2,32,32], index: 11, kind: input, shape index: {}]   ;;  %s6386_s13 = inlined_call_operand.vmem [shape: bf16[32,32], index: 13, kind: input, shape index: {}]   ;;  %s6387_s12 = inlined_call_operand.vmem [shape: f32[2,1,32], index: 12, kind: input, shape index: {}]   ;;  %s6388_s15 = inlined_call_operand.vmem [shape: f32[1,32], index: 15, kind: input, shape index: {}]   ;;  %s6389_s16 = inlined_call_operand.vmem [shape: bf16[32,256], index: 16, kind: input, shape index: {}]   ;;  %s6390_s17 = inlined_call_operand.vmem [shape: f32[1,256], index: 17, kind: input, shape index: {}]   ;;  %s6391_s18 = inlined_call_operand.vmem [shape: f32[1,256], index: 18, kind: input, shape index: {}]   ;;  %s6392_s19 = inlined_call_operand.vmem [shape: f32[64,32], index: 19, kind: output, shape index: {}]  }
   0x1   :  { %6402 = sst [smem:[#allocation5_spill]] %s6373_s14  ;;  %4562 = vset.pattern.permute.xlu0 %v6397_v1  ;;  %4563 = vset.pattern.permute.xlu1 %v6397_v1  ;;  %v4569_v15 = vld [vmem:[%s6377_s9 + $0x8] sm:$0xff]   ;;  %v4571_v18 = vld [vmem:[%s6377_s9] sm:$0xff]   ;;  %v314_v24 = vld [vmem:[%s6380_s8 + $0x10] sm:$0xff] }
   0x2   :  { %6403 = sst [smem:[#allocation6_spill]] %s6374_s5  ;;  %v4572_v21 = vld [vmem:[%s6378_s7] sm:$0xff]   ;;  %v4574_v23 = vld [vmem:[%s6378_s7 + $0x8] sm:$0xff]   ;;  %328 = vperm.xlu0 %4562, %v314_v24   ;;  %v5143_v27 = vld [vmem:[%s6379_s2 + $0x10] sm:$0xff]  }
   0x3   :  { %6404 = sst [smem:[#allocation7_spill]] %s6375_s0  ;;  %v5117_v22 = vld [vmem:[%s6379_s2] sm:$0xff]   ;;  %v5135_v25 = vld [vmem:[%s6379_s2 + $0x8] sm:$0xff]   ;;  %v315_v28 = vld [vmem:[%s6380_s8 + $0x18] sm:$0xff] }
   0x4   :  { %6405 = sst [smem:[#allocation8_spill]] %s6376_s1  ;;  %v312_v26 = vld [vmem:[%s6380_s8] sm:$0xff]  ;;  %v313_v29 = vld [vmem:[%s6380_s8 + $0x8] sm:$0xff]  ;;  %v3781_v30 = vld [vmem:[%s6380_s8 + $0x30] sm:$0xff] }
   0x5   :  { %s6406_s20 = sld [smem:[#allocation5_spill]]  ;;  %318 = vperm.xlu1 %4563, %v312_v26   ;;  %v3782_v31 = vld [vmem:[%s6380_s8 + $0x38] sm:$0xff]  ;;  %v5170_v33 = vld [vmem:[%s6379_s2 + $0x20] sm:$0xff]   ;;  %v3780_v35 = vld [vmem:[%s6380_s8 + $0x28] sm:$0xff] }
   0x6   :  { %s6407_s22 = sld [smem:[#allocation6_spill]]  ;;  %333 = vperm.xlu0 %4562, %v315_v28   ;;  %v5165_v32 = vld [vmem:[%s6379_s2 + $0x18] sm:$0xff]   ;;  %v3779_v34 = vld [vmem:[%s6380_s8 + $0x20] sm:$0xff]  ;;  %v5185_v36 = vld [vmem:[%s6379_s2 + $0x28] sm:$0xff]  }
   0x7   :  { %s6408_s27 = sld [smem:[#allocation7_spill]]  ;;  %v5190_v37 = vld [vmem:[%s6379_s2 + $0x30] sm:$0xff]   ;;  %v5199_v38 = vld [vmem:[%s6379_s2 + $0x38] sm:$0xff]   ;;  %v5218_v44 = vld [vmem:[%s6381_s6] ss:$0 sm:$0xff] }
   0x8   :  { %s6409_s26 = sld [smem:[#allocation8_spill]]  ;;  %v4582_v39 = vld [vmem:[%s6378_s7 + $0x10] sm:$0xff]   ;;  %v4583_v40 = vld [vmem:[%s6378_s7 + $0x18] sm:$0xff]   ;;  %v5240_v62 = vld [vmem:[%s6382_s10] ss:$0 sm:$0xff] }
   0x9   :  { %323 = vperm.xlu1 %4563, %v313_v29  }
   0xa   :  { %940 = vperm.xlu0 %4562, %v3781_v30  }
   0xb   :  { %v4564_v0 = vld [vmem:[%s6406_s20 + $0x8] sm:$0xff]   ;;  %v4566_v3 = vld [vmem:[%s6406_s20] sm:$0xff]  }
   0xc   :  { %v4565_v2 = vld [vmem:[%s6407_s22 + $0x8] sm:$0xff]   ;;  %4189 = vmatprep.subr.bf16.mxu0 %v4564_v0  ;;  %v4567_v4 = vld [vmem:[%s6407_s22] sm:$0xff]  }
   0xd   :  { %4201 = vmatprep.subr.bf16.mxu1 %v4565_v2  ;;  %4190 = vmatpush3.bf16.msra.mxu0 %v4564_v0  ;;  %v63_v5 = vld [vmem:[%s6408_s27] sm:$0xff]  ;;  %v64_v6 = vld [vmem:[%s6408_s27 + $0x8] sm:$0xff]  ;;  %v65_v7 = vld [vmem:[%s6408_s27 + $0x10] sm:$0xff] }
   0xe   :  { %4202 = vmatpush3.bf16.msra.mxu1 %v4565_v2  ;;  %4191 = vmatprep.subr.bf16.mxu0 %v4566_v3  ;;  %v5064_v8 = vpack.c.bf16 %v64_v6, %v63_v5  ;;  %v66_v9 = vld [vmem:[%s6408_s27 + $0x18] sm:$0xff]  ;;  %v67_v10 = vld [vmem:[%s6408_s27 + $0x20] sm:$0xff]  ;;  %v68_v11 = vld [vmem:[%s6408_s27 + $0x28] sm:$0xff] }
   0xf   :  { %4203 = vmatprep.subr.bf16.mxu1 %v4567_v4  ;;  %v5075_v12 = vpack.c.bf16 %v66_v9, %v65_v7  ;;  %v5079_v13 = vpack.c.bf16 %v68_v11, %v67_v10  ;;  %v4568_v14 = vld [vmem:[%s6409_s26 + $0x8] sm:$0xff]   ;;  %v69_v16 = vld [vmem:[%s6408_s27 + $0x30] sm:$0xff]  ;;  %v4570_v17 = vld [vmem:[%s6409_s26] sm:$0xff]   ;;  %945 = vperm.xlu1 %4563, %v3782_v31  }
  0x10   :  { %4193 = vmatprep.mubr.msk.bf16.mxu0 %vm118_vm0, %v5064_v8  ;;  %4205 = vmatprep.mubr.msk.bf16.mxu1 %vm118_vm0, %v5064_v8  ;;  %v70_v19 = vld [vmem:[%s6408_s27 + $0x38] sm:$0xff] }
  0x11   :  { %4192 = vmatpush3.bf16.msra.mxu0 %v4566_v3  ;;  %v5109_v20 = vpack.c.bf16 %v70_v19, %v69_v16  ;;  %930 = vperm.xlu0 %4562, %v3779_v34  }
  0x12   :  { %4204 = vmatpush3.bf16.msra.mxu1 %v4567_v4  ;;  %4213 = vmatprep.subr.bf16.mxu0 %v4568_v14 }
  0x13   :  { %4221 = vmatprep.subr.bf16.mxu1 %v4569_v15  ;;  %935 = vperm.xlu1 %4563, %v3780_v35  }
  0x14   :  { %4194 = vmatmul.mubr.msk.bf16.vlgmr.msra.gmra.mxu0 %vm118_vm0, %v5075_v12 }
  0x15   :  { %4206 = vmatmul.mubr.msk.bf16.vlgmr.msra.gmra.mxu1 %vm118_vm0, %v5075_v12  ;;  %4197 = vmatprep.mubr.msk.bf16.mxu0 %vm118_vm0, %v5079_v13 }
  0x16   :  { %4209 = vmatprep.mubr.msk.bf16.mxu1 %vm118_vm0, %v5079_v13  ;;  %4214 = vmatpush3.bf16.msra.mxu0 %v4568_v14 }
  0x17   :  { %4222 = vmatpush3.bf16.msra.mxu1 %v4569_v15  ;;  %4215 = vmatprep.subr.bf16.mxu0 %v4570_v17 }
  0x18   :  { %4223 = vmatprep.subr.bf16.mxu1 %v4571_v18 }
  0x1a   :  { %4216 = vmatpush3.bf16.msra.mxu0 %v4570_v17 }
  0x1b   :  { %4224 = vmatpush3.bf16.msra.mxu1 %v4571_v18 }
  0x1c   :  { %4198 = vmatmul.mubr.msk.bf16.gmra.mxu0 %vm118_vm0, %v5109_v20  ;;  %4265 = vmatprep.subr.bf16.mxu1 %v4568_v14 }
  0x1d   :  { %4210 = vmatmul.mubr.msk.bf16.gmra.mxu1 %vm118_vm0, %v5109_v20  ;;  %4217 = vmatprep.mubr.msk.bf16.mxu0 %vm118_vm0, %v4572_v21 }
  0x1e   :  { %4225 = vmatprep.mubr.msk.bf16.mxu1 %vm118_vm0, %v5117_v22 }
  0x24   :  { %4218 = vmatmul.mubr.msk.bf16.vlgmr.msra.gmra.mxu0 %vm118_vm0, %v4574_v23 }
  0x25   :  { %4226 = vmatmul.mubr.msk.bf16.vlgmr.msra.gmra.mxu1 %vm118_vm0, %v5135_v25 }
  0x26   :  { %4229 = vmatprep.mubr.msk.bf16.mxu1 %vm118_vm0, %v5143_v27  ;;  %4266 = vmatpush3.bf16.msra.mxu1 %v4568_v14 }
  0x27   :  { %4267 = vmatprep.subr.bf16.mxu1 %v4570_v17 }
  0x2a   :  { %4268 = vmatpush3.bf16.msra.mxu1 %v4570_v17 }
  0x2d   :  { %4230 = vmatmul.mubr.msk.bf16.gmra.mxu1 %vm118_vm0, %v5165_v32 }
  0x2e   :  { %4233 = vmatprep.mubr.msk.bf16.mxu1 %vm118_vm0, %v5170_v33 }
  0x35   :  { %4234 = vmatmul.mubr.msk.bf16.gmra.mxu1 %vm118_vm0, %v5185_v36 }
  0x36   :  { %4237 = vmatprep.mubr.msk.bf16.mxu1 %vm118_vm0, %v5190_v37 }
  0x3d   :  { %4238 = vmatmul.mubr.msk.bf16.gmra.mxu1 %vm118_vm0, %v5199_v38 }
  0x3e   :  { %4269 = vmatprep.mubr.msk.bf16.mxu1 %vm118_vm0, %v4582_v39 }
  0x45   :  { %4270 = vmatmul.mubr.msk.bf16.vlgmr.msra.gmra.mxu1 %vm118_vm0, %v4583_v40 }
  0x7d   :  { %v329_v59 = vpop.permute.xlu0 %328 }
  0x80   :  { %v319_v63 = vpop.permute.xlu1 %318 }
  0x81   :  { %v334_v6 = vpop.permute.xlu0 %333 }
  0x84   :  { %v324_v15 = vpop.permute.xlu1 %323 }
  0xd4   :  { %v5211_v41 = vpop.f32.mrf.mxu0 }
  0xd5   :  { %v4207_v42 = vpop.f32.mrf.mxu1 }
  0xd6   :  { %v5213_v43 = vpop.f32.mrf.mxu0  ;;  %v286_v39 = vadd.f32 %v4207_v42, %v5218_v44  ;;  %v4585_v42 = vld [vmem:[%s6407_s22 + $0x10] sm:$0xff]  }
  0xd7   :  { %v277_v45 = vpop.f32.mrf.mxu1 }
  0xd8   :  { %v5220_v46 = vpop.f32.mrf.mxu0  ;;  %v278_v48 = vadd.f32 %v5218_v44, %v277_v45 }
  0xd9   :  { %v4208_v47 = vpop.f32.mrf.mxu1 }
  0xda   :  { %v5223_v49 = vpop.f32.mrf.mxu0  ;;  %v289_v40 = vadd.f32 %v4208_v47, %v5218_v44 }
  0xdb   :  { %v280_v50 = vpop.f32.mrf.mxu1 }
  0xdc   :  { %v281_v51 = vadd.f32 %v5218_v44, %v280_v50  ;;  %v5226_v52 = vpop.f32.mrf.mxu0 }
  0xdd   :  { %v5228_v53 = vpop.f32.mrf.mxu1 }
  0xde   :  { %v597_v54 = vpack.c.bf16 %v281_v51, %v278_v48  ;;  %v5230_v55 = vpop.f32.mrf.mxu0  ;;  %v4584_v48 = vld [vmem:[%s6407_s22 + $0x18] sm:$0xff]  }
  0xdf   :  { %v293_v56 = vpop.f32.mrf.mxu1 }
  0xe0   :  { %v5232_v57 = vpop.f32.mrf.mxu0  ;;  %4245 = vmatprep.mubr.msk.bf16.mxu0 %vm118_vm0, %v597_v54  ;;  %v294_v30 = vadd.f32 %v5218_v44, %v293_v56 }
  0xe1   :  { %v4212_v58 = vpop.f32.mrf.mxu1 }
  0xe2   :  { %v5235_v60 = vpop.f32.mrf.mxu0 }
  0xe3   :  { %v296_v61 = vpop.f32.mrf.mxu1 }
  0xe4   :  { %v4219_v0 = vpop.f32.mrf.mxu0  ;;  %v297_v31 = vadd.f32 %v5218_v44, %v296_v61 }
  0xe5   :  { %v4227_v2 = vpop.f32.mrf.mxu1  ;;  %v407_v10 = vadd.f32 %v4219_v0, %v329_v59  ;;  %v598_v59 = vpack.c.bf16 %v289_v40, %v286_v39 }
  0xe6   :  { %v543_v3 = vadd.f32 %v4227_v2, %v5240_v62  ;;  %v398_v4 = vpop.f32.mrf.mxu0  ;;  %v599_v54 = vpack.c.bf16 %v297_v31, %v294_v30 }
  0xe7   :  { %v534_v5 = vpop.f32.mrf.mxu1  ;;  %v399_v18 = vadd.f32 %v398_v4, %v319_v63  ;;  %v302_v4 = vadd.f32 %v5228_v53, %v5218_v44 }
  0xe8   :  { %v535_v7 = vadd.f32 %v5240_v62, %v534_v5  ;;  %v4220_v9 = vpop.f32.mrf.mxu0  ;;  %v305_v5 = vadd.f32 %v4212_v58, %v5218_v44 }
  0xe9   :  { %v410_v11 = vadd.f32 %v4220_v9, %v334_v6  ;;  %v4228_v14 = vpop.f32.mrf.mxu1 }
  0xea   :  { %v546_v16 = vadd.f32 %v4228_v14, %v5240_v62  ;;  %v401_v17 = vpop.f32.mrf.mxu0 }
  0xeb   :  { %v602_v19 = vpack.c.bf16 %v410_v11, %v407_v10  ;;  %v402_v21 = vadd.f32 %v401_v17, %v324_v15  ;;  %v537_v23 = vpop.f32.mrf.mxu1  ;;  %v600_v11 = vpack.c.bf16 %v305_v5, %v302_v4 }
  0xec   :  { %v5245_v24 = vpack.c.bf16 %v546_v16, %v543_v3  ;;  %v538_v26 = vadd.f32 %v5240_v62, %v537_v23 }
  0xed   :  { %v601_v28 = vpack.c.bf16 %v402_v21, %v399_v18  ;;  %v4231_v29 = vpop.f32.mrf.mxu1  ;;  %4241 = vmatprep.subr.bf16.mxu0 %v602_v19  ;;  %v941_v21 = vpop.permute.xlu0 %940 }
  0xee   :  { %v5250_v34 = vpack.c.bf16 %v538_v26, %v535_v7  ;;  %v559_v35 = vadd.f32 %v4231_v29, %v5240_v62  ;;  %4242 = vmatpush3.bf16.msra.mxu0 %v602_v19  ;;  %v946_v26 = vpop.permute.xlu1 %945 }
  0xef   :  { %v550_v45 = vpop.f32.mrf.mxu1  ;;  %4243 = vmatprep.subr.bf16.mxu0 %v601_v28 }
  0xf0   :  { %v551_v50 = vadd.f32 %v5240_v62, %v550_v45 }
  0xf1   :  { %v4232_v51 = vpop.f32.mrf.mxu1 }
  0xf2   :  { %v562_v56 = vadd.f32 %v4232_v51, %v5240_v62  ;;  %4244 = vmatpush3.bf16.msra.mxu0 %v601_v28  ;;  %v936_v45 = vpop.permute.xlu1 %935 }
  0xf3   :  { %v553_v61 = vpop.f32.mrf.mxu1  ;;  %4253 = vmatprep.subr.bf16.mxu0 %v4584_v48 }
  0xf4   :  { %v5263_v47 = vpack.c.bf16 %v562_v56, %v559_v35  ;;  %v554_v63 = vadd.f32 %v5240_v62, %v553_v61  ;;  %v931_v35 = vpop.permute.xlu0 %930 }
  0xf5   :  { %v4235_v0 = vpop.f32.mrf.mxu1  ;;  %4246 = vmatmul.mubr.msk.bf16.vlgmr.msra.gmra.mxu0 %vm118_vm0, %v598_v59 }
  0xf6   :  { %v5267_v2 = vpack.c.bf16 %v554_v63, %v551_v50  ;;  %v575_v3 = vadd.f32 %v4235_v0, %v5240_v62  ;;  %4249 = vmatprep.mubr.msk.bf16.mxu0 %vm118_vm0, %v599_v54  ;;  %4254 = vmatpush3.bf16.msra.mxu0 %v4584_v48 }
  0xf7   :  { %v566_v6 = vpop.f32.mrf.mxu1  ;;  %4255 = vmatprep.subr.bf16.mxu0 %v4585_v42 }
  0xf8   :  { %v567_v7 = vadd.f32 %v5240_v62, %v566_v6 }
  0xf9   :  { %v4236_v9 = vpop.f32.mrf.mxu1 }
  0xfa   :  { %v578_v10 = vadd.f32 %v4236_v9, %v5240_v62  ;;  %4256 = vmatpush3.bf16.msra.mxu0 %v4585_v42 }
  0xfb   :  { %v569_v14 = vpop.f32.mrf.mxu1 }
  0xfc   :  { %v5276_v15 = vpack.c.bf16 %v578_v10, %v575_v3  ;;  %v570_v16 = vadd.f32 %v5240_v62, %v569_v14 }
  0xfd   :  { %v4239_v17 = vpop.f32.mrf.mxu1  ;;  %4250 = vmatmul.mubr.msk.bf16.gmra.mxu0 %vm118_vm0, %v600_v11  ;;  %v3768_v11 = vld [vmem:[%s6381_s6 + $0x1] ss:$0 sm:$0xff] }
  0xfe   :  { %v5280_v53 = vpack.c.bf16 %v570_v16, %v567_v7  ;;  %4257 = vmatprep.mubr.msk.bf16.mxu0 %vm118_vm0, %v5064_v8  ;;  %v591_v48 = vadd.f32 %v4239_v17, %v5240_v62 }
  0xff   :  { %v582_v44 = vpop.f32.mrf.mxu1 }
 0x100   :  { %v583_v58 = vadd.f32 %v5240_v62, %v582_v44 }
 0x101   :  { %v4240_v18 = vpop.f32.mrf.mxu1 }
 0x102   :  { %v594_v51 = vadd.f32 %v4240_v18, %v5240_v62 }
 0x103   :  { %v585_v19 = vpop.f32.mrf.mxu1 }
 0x104   :  { %v586_v23 = vadd.f32 %v5240_v62, %v585_v19  ;;  %v827_v42 = vpack.c.bf16 %v594_v51, %v591_v48 }
 0x105   :  { %v4271_v28 = vpop.f32.mrf.mxu1  ;;  %4258 = vmatmul.mubr.msk.bf16.vlgmr.msra.gmra.mxu0 %vm118_vm0, %v5075_v12 }
 0x106   :  { %v826_v29 = vpack.c.bf16 %v586_v23, %v583_v58  ;;  %4261 = vmatprep.mubr.msk.bf16.mxu0 %vm118_vm0, %v5079_v13  ;;  %v1007_v39 = vadd.f32 %v4271_v28, %v941_v21 }
 0x107   :  { %v998_v30 = vpop.f32.mrf.mxu1 }
 0x108   :  { %v999_v54 = vadd.f32 %v998_v30, %v931_v35 }
 0x109   :  { %v4272_v31 = vpop.f32.mrf.mxu1 }
 0x10a   :  { %v1010_v40 = vadd.f32 %v4272_v31, %v946_v26 }
 0x10b   :  { %v1001_v50 = vpop.f32.mrf.mxu1 }
 0x10c   :  { %v1140_v56 = vpack.c.bf16 %v1010_v40, %v1007_v39  ;;  %v1002_v59 = vadd.f32 %v1001_v50, %v936_v45 }
 0x10d   :  { %4262 = vmatmul.mubr.msk.bf16.gmra.mxu0 %vm118_vm0, %v5109_v20 }
 0x10e   :  { %v1139_v61 = vpack.c.bf16 %v1002_v59, %v999_v54  ;;  %4293 = vmatprep.subr.bf16.mxu1 %v1140_v56  ;;  %4277 = vmatprep.mubr.msk.bf16.mxu0 %vm118_vm0, %v5117_v22 }
 0x10f   :  { %4294 = vmatpush3.bf16.msra.mxu1 %v1140_v56  ;;  %v4002_v56 = vld [vmem:[%s6383_s3 + $0x18] sm:$0xff]  }
 0x110   :  { %4295 = vmatprep.subr.bf16.mxu1 %v1139_v61 }
 0x113   :  { %4296 = vmatpush3.bf16.msra.mxu1 %v1139_v61 }
 0x114   :  { %4329 = vmatprep.subr.bf16.mxu1 %v827_v42 }
 0x1b5   :  { %v5296_v63 = vpop.f32.mrf.mxu0 }
 0x1b7   :  { %v5298_v0 = vpop.f32.mrf.mxu0 }
 0x1b9   :  { %v5300_v62 = vpop.f32.mrf.mxu0 }
 0x1bb   :  { %v5302_v3 = vpop.f32.mrf.mxu0 }
 0x1bd   :  { %v5304_v4 = vpop.f32.mrf.mxu0 }
 0x1bf   :  { %v5306_v5 = vpop.f32.mrf.mxu0 }
 0x1c1   :  { %v5308_v6 = vpop.f32.mrf.mxu0 }
 0x1c3   :  { %v5310_v22 = vpop.f32.mrf.mxu0 }
 0x1c5   :  { %v4259_v7 = vpop.f32.mrf.mxu0 }
 0x1c6   :  { %v896_v58 = vadd.f32 %v4259_v7, %v3768_v11 }
 0x1c7   :  { %v887_v9 = vpop.f32.mrf.mxu0 }
 0x1c8   :  { %v888_v17 = vadd.f32 %v3768_v11, %v887_v9 }
 0x1c9   :  { %v4260_v10 = vpop.f32.mrf.mxu0 }
 0x1ca   :  { %v899_v14 = vadd.f32 %v4260_v10, %v3768_v11  ;;  %v3982_v10 = vunpack.c.l.bf16 %v4002_v56 }
 0x1cb   :  { %v890_v16 = vpop.f32.mrf.mxu0 }
 0x1cc   :  { %v891_v44 = vadd.f32 %v3768_v11, %v890_v16  ;;  %v1136_v21 = vpack.c.bf16 %v899_v14, %v896_v58  ;;  %v4001_v14 = vld [vmem:[%s6383_s3 + $0x10] sm:$0xff]   ;;  %v3983_v58 = vunpack.c.h.bf16 %v4002_v56 }
 0x1cd   :  { %v4263_v18 = vpop.f32.mrf.mxu0 }
 0x1ce   :  { %v1135_v19 = vpack.c.bf16 %v891_v44, %v888_v17  ;;  %v912_v28 = vadd.f32 %v4263_v18, %v3768_v11 }
 0x1cf   :  { %v903_v23 = vpop.f32.mrf.mxu0 }
 0x1d0   :  { %4297 = vmatprep.mubr.msk.bf16.mxu1 %vm118_vm0, %v1135_v19  ;;  %v904_v35 = vadd.f32 %v3768_v11, %v903_v23  ;;  %v3978_v23 = vunpack.c.l.bf16 %v4001_v14 }
 0x1d1   :  { %v4264_v26 = vpop.f32.mrf.mxu0  ;;  %4298 = vmatmul.mubr.msk.bf16.vlgmr.msra.gmra.mxu1 %vm118_vm0, %v1136_v21 }
 0x1d2   :  { %4330 = vmatpush3.bf16.msra.mxu1 %v827_v42  ;;  %v915_v30 = vadd.f32 %v4264_v26, %v3768_v11  ;;  %v680_v26 = vmul.f32 0.17677669, %v5298_v0 }
 0x1d3   :  { %4331 = vmatprep.subr.bf16.mxu1 %v826_v29  ;;  %v906_v31 = vpop.f32.mrf.mxu0 }
 0x1d4   :  { %v907_v39 = vadd.f32 %v3768_v11, %v906_v31  ;;  %v1138_v45 = vpack.c.bf16 %v915_v30, %v912_v28  ;;  %v3979_v30 = vunpack.c.h.bf16 %v4001_v14  ;;  %v681_v31 = vmul.f32 0.17677669, %v5302_v3 }
 0x1d6   :  { %v1137_v40 = vpack.c.bf16 %v907_v39, %v904_v35  ;;  %4332 = vmatpush3.bf16.msra.mxu1 %v826_v29  ;;  %v682_v39 = vmul.f32 0.17677669, %v5296_v63 }
 0x1d7   :  { %4333 = vmatprep.subr.bf16.mxu1 %v5276_v15 }
 0x1d8   :  { %4301 = vmatprep.mubr.msk.bf16.mxu1 %vm118_vm0, %v1137_v40 }
 0x1d9   :  { %4302 = vmatmul.mubr.msk.bf16.gmra.mxu1 %vm118_vm0, %v1138_v45  ;;  %v683_v45 = vmul.f32 0.17677669, %v5300_v62  ;;  %v687_v62 = vmul.f32 0.17677669, %v5308_v6 }
 0x1da   :  { %4334 = vmatpush3.bf16.msra.mxu1 %v5276_v15  ;;  %v4586_v15 = vld [vmem:[%s6377_s9 + $0x18] sm:$0xff]  }
 0x1db   :  { %4335 = vmatprep.subr.bf16.mxu1 %v5280_v53  ;;  %4273 = vmatprep.subr.bf16.mxu0 %v4586_v15 }
 0x1dc   :  { %4274 = vmatpush3.bf16.msra.mxu0 %v4586_v15 }
 0x1de   :  { %4336 = vmatpush3.bf16.msra.mxu1 %v5280_v53 }
 0x1df   :  { %4337 = vmatprep.subr.bf16.mxu1 %v5263_v47 }
 0x1e2   :  { %4338 = vmatpush3.bf16.msra.mxu1 %v5263_v47  ;;  %v4587_v47 = vld [vmem:[%s6377_s9 + $0x10] sm:$0xff]  }
 0x1e3   :  { %4339 = vmatprep.subr.bf16.mxu1 %v5267_v2  ;;  %4275 = vmatprep.subr.bf16.mxu0 %v4587_v47 }
 0x1e4   :  { %4276 = vmatpush3.bf16.msra.mxu0 %v4587_v47  ;;  %v684_v47 = vmul.f32 0.17677669, %v5306_v5 }
 0x1e6   :  { %4340 = vmatpush3.bf16.msra.mxu1 %v5267_v2  ;;  %v5382_v63 = vadd.f32 %v3978_v23, %v684_v47 }
 0x1e7   :  { %4341 = vmatprep.subr.bf16.mxu1 %v5245_v24  ;;  %4278 = vmatmul.mubr.msk.bf16.vlgmr.msra.gmra.mxu0 %vm118_vm0, %v5135_v25  ;;  %v4000_v25 = vld [vmem:[%s6383_s3 + $0x8] sm:$0xff]  }
 0x1e8   :  { %4281 = vmatprep.mubr.msk.bf16.mxu0 %vm118_vm0, %v5143_v27  ;;  %v3975_v42 = vunpack.c.h.bf16 %v4000_v25 }
 0x1ea   :  { %4342 = vmatpush3.bf16.msra.mxu1 %v5245_v24  ;;  %v5378_v3 = vadd.f32 %v3975_v42, %v683_v45 }
 0x1eb   :  { %4343 = vmatprep.subr.bf16.mxu1 %v5250_v34 }
 0x1ee   :  { %4344 = vmatpush3.bf16.msra.mxu1 %v5250_v34  ;;  %v3974_v34 = vunpack.c.l.bf16 %v4000_v25  ;;  %v685_v25 = vmul.f32 0.17677669, %v5310_v22  ;;  %v5392_v22 = vadd.f32 %v3983_v58, %v687_v62 }
 0x1ef   :  { %4282 = vmatmul.mubr.msk.bf16.gmra.mxu0 %vm118_vm0, %v5165_v32 }
 0x1f0   :  { %4285 = vmatprep.mubr.msk.bf16.mxu0 %vm118_vm0, %v5170_v33  ;;  %v3969_v33 = vld [vmem:[%s6383_s3] sm:$0xff]   ;;  %v690_v0 = vadd.f32 %v3974_v34, %v682_v39 }
 0x1f1   :  { %v3971_v51 = vunpack.c.h.bf16 %v3969_v33 }
 0x1f3   :  { %v5373_v15 = vadd.f32 %v3971_v51, %v681_v31 }
 0x1f7   :  { %4286 = vmatmul.mubr.msk.bf16.gmra.mxu0 %vm118_vm0, %v5185_v36 }
 0x1f8   :  { %4289 = vmatprep.mubr.msk.bf16.mxu0 %vm118_vm0, %v5190_v37  ;;  %v3970_v37 = vunpack.c.l.bf16 %v3969_v33 }
 0x1fa   :  { %v688_v40 = vadd.f32 %v3970_v37, %v680_v26 }
 0x1ff   :  { %4290 = vmatmul.mubr.msk.bf16.gmra.mxu0 %vm118_vm0, %v5199_v38 }
 0x291   :  { %v4299_v27 = vpop.f32.mrf.mxu1 }
 0x292   :  { %v1220_v24 = vmul.f32 0.17677669, %v4299_v27  ;;  %v686_v27 = vmul.f32 0.17677669, %v5304_v4 }
 0x293   :  { %v1187_v32 = vpop.f32.mrf.mxu1 }
 0x294   :  { %v1218_v2 = vmul.f32 0.17677669, %v1187_v32  ;;  %v5357_v36 = vadd.f32 %v3974_v34, %v1220_v24  ;;  %v5386_v24 = vadd.f32 %v3979_v30, %v685_v25  ;;  %v5389_v5 = vadd.f32 %v3982_v10, %v686_v27 }
 0x295   :  { %v4300_v53 = vpop.f32.mrf.mxu1 }
 0x296   :  { %1238 = vmax.xlane.f32.xlu0 %v5357_v36  ;;  %v1221_v29 = vmul.f32 0.17677669, %v4300_v53  ;;  %v1226_v50 = vadd.f32 %v3970_v37, %v1218_v2 }
 0x297   :  { %v1190_v38 = vpop.f32.mrf.mxu1 }
 0x298   :  { %v1219_v48 = vmul.f32 0.17677669, %v1190_v38  ;;  %v1229_v9 = vadd.f32 %v3975_v42, %v1221_v29 }
 0x299   :  { %v4303_v54 = vpop.f32.mrf.mxu1 }
 0x29a   :  { %v1224_v59 = vmul.f32 0.17677669, %v4303_v54  ;;  %1234 = vmax.xlane.f32.xlu0 %v1226_v50  ;;  %v5363_v61 = vadd.f32 %v3971_v51, %v1219_v48 }
 0x29b   :  { %v1203_v7 = vpop.f32.mrf.mxu1 }
 0x29c   :  { %1236 = vmax.xlane.f32.xlu1 %v5363_v61  ;;  %v1222_v16 = vmul.f32 0.17677669, %v1203_v7  ;;  %v1232_v44 = vadd.f32 %v3982_v10, %v1224_v59 }
 0x29d   :  { %v4304_v11 = vpop.f32.mrf.mxu1 }
 0x29e   :  { %v1225_v17 = vmul.f32 0.17677669, %v4304_v11  ;;  %1240 = vmax.xlane.f32.xlu0 %v1229_v9  ;;  %v1230_v28 = vadd.f32 %v3978_v23, %v1222_v16 }
 0x29f   :  { %v1206_v18 = vpop.f32.mrf.mxu1 }
 0x2a0   :  { %v1223_v19 = vmul.f32 0.17677669, %v1206_v18  ;;  %1246 = vmax.xlane.f32.xlu1 %v1232_v44  ;;  %v1233_v21 = vadd.f32 %v3983_v58, %v1225_v17 }
 0x2a2   :  { %1248 = vmax.xlane.f32.xlu0 %v1233_v21  ;;  %v1231_v35 = vadd.f32 %v3979_v30, %v1223_v19 }
 0x2a4   :  { %1242 = vmax.xlane.f32.xlu1 %v1230_v28 }
 0x2a6   :  { %1244 = vmax.xlane.f32.xlu0 %v1231_v35 }
 0x2a8   :  { %696 = vmax.xlane.f32.xlu1 %v688_v40 }
 0x2aa   :  { %698 = vmax.xlane.f32.xlu0 %v5373_v15 }
 0x2ac   :  { %700 = vmax.xlane.f32.xlu1 %v690_v0 }
 0x2ae   :  { %702 = vmax.xlane.f32.xlu0 %v5378_v3 }
 0x2b0   :  { %704 = vmax.xlane.f32.xlu1 %v5382_v63 }
 0x2b2   :  { %706 = vmax.xlane.f32.xlu0 %v5386_v24 }
 0x2b4   :  { %708 = vmax.xlane.f32.xlu1 %v5389_v5 }
 0x2b6   :  { %710 = vmax.xlane.f32.xlu0 %v5392_v22 }
 0x31f   :  { %v1239_v4 = vpop.xlane.xlu0 %1238 }
 0x320   :  { %v1252_v34 = vsub.f32 %v5357_v36, %v1239_v4 }
 0x322   :  { %v1262_v32 = vmul.f32 1.442695, %v1252_v34 }
 0x323   :  { %v1235_v33 = vpop.xlane.xlu0 %1234 }
 0x324   :  { %4612 = vpow2.f32 %v1262_v32  ;;  %v1250_v6 = vsub.f32 %v1226_v50, %v1235_v33 }
 0x325   :  { %v1237_v2 = vpop.xlane.xlu1 %1236 }
 0x326   :  { %v1258_v53 = vmul.f32 1.442695, %v1250_v6  ;;  %v1251_v38 = vsub.f32 %v5363_v61, %v1237_v2 }
 0x327   :  { %v1241_v37 = vpop.xlane.xlu0 %1240 }
 0x328   :  { %4614 = vpow2.f32 %v1258_v53  ;;  %v1253_v29 = vsub.f32 %v1229_v9, %v1241_v37  ;;  %v1260_v59 = vmul.f32 1.442695, %v1251_v38 }
 0x329   :  { %v1247_v48 = vpop.xlane.xlu1 %1246 }
 0x32a   :  { %v1264_v51 = vmul.f32 1.442695, %v1253_v29  ;;  %v1256_v54 = vsub.f32 %v1232_v44, %v1247_v48 }
 0x32b   :  { %v1249_v56 = vpop.xlane.xlu0 %1248 }
 0x32c   :  { %4616 = vpow2.f32 %v1264_v51  ;;  %v1270_v42 = vmul.f32 1.442695, %v1256_v54  ;;  %v1257_v7 = vsub.f32 %v1233_v21, %v1249_v56  ;;  %v4279_v56 = vpop.f32.mrf.mxu0 }
 0x32d   :  { %v1243_v36 = vpop.xlane.xlu1 %1242 }
 0x32e   :  { %4618 = vpow2.f32 %v1270_v42  ;;  %v1254_v10 = vsub.f32 %v1230_v28, %v1243_v36  ;;  %v1272_v50 = vmul.f32 1.442695, %v1257_v7 }
 0x32f   :  { %v1245_v11 = vpop.xlane.xlu0 %1244  ;;  %4620 = vpow2.f32 %v1260_v59  ;;  %v1072_v59 = vpop.f32.mrf.mxu0 }
 0x330   :  { %v1266_v14 = vmul.f32 1.442695, %v1254_v10  ;;  %v1255_v16 = vsub.f32 %v1231_v35, %v1245_v11 }
 0x331   :  { %v5397_v17 = vpop.eup %4612  ;;  %v697_v61 = vpop.xlane.xlu1 %696 }
 0x332   :  { %4622 = vpow2.f32 %v1266_v14  ;;  %v712_v9 = vsub.f32 %v688_v40, %v697_v61  ;;  %1278 = vadd.xlane.f32.xlu1 %v5397_v17  ;;  %v1268_v58 = vmul.f32 1.442695, %v1255_v16  ;;  %v4280_v42 = vpop.f32.mrf.mxu0 }
 0x333   :  { %v699_v44 = vpop.xlane.xlu0 %698  ;;  %4624 = vpow2.f32 %v1272_v50 }
 0x334   :  { %v720_v18 = vmul.f32 1.442695, %v712_v9  ;;  %v713_v19 = vsub.f32 %v5373_v15, %v699_v44  ;;  %v1075_v7 = vpop.f32.mrf.mxu0  ;;  %v3792_v44 = vld [vmem:[%s6382_s10 + $0x1] ss:$0 sm:$0xff] }
 0x335   :  { %v5401_v21 = vpop.eup %4614  ;;  %v701_v23 = vpop.xlane.xlu1 %700 }
 0x336   :  { %4626 = vpow2.f32 %v720_v18  ;;  %v714_v26 = vsub.f32 %v690_v0, %v701_v23  ;;  %1274 = vadd.xlane.f32.xlu1 %v5401_v21  ;;  %v722_v30 = vmul.f32 1.442695, %v713_v19  ;;  %v4283_v36 = vpop.f32.mrf.mxu0 }
 0x337   :  { %v703_v28 = vpop.xlane.xlu0 %702  ;;  %4628 = vpow2.f32 %v1268_v58 }
 0x338   :  { %v724_v31 = vmul.f32 1.442695, %v714_v26  ;;  %v715_v35 = vsub.f32 %v5378_v3, %v703_v28  ;;  %v1088_v10 = vpop.f32.mrf.mxu0 }
 0x339   :  { %v5405_v39 = vpop.eup %4616  ;;  %v705_v40 = vpop.xlane.xlu1 %704 }
 0x33a   :  { %4630 = vpow2.f32 %v724_v31  ;;  %v716_v45 = vsub.f32 %v5382_v63, %v705_v40  ;;  %1280 = vadd.xlane.f32.xlu0 %v5405_v39  ;;  %v726_v0 = vmul.f32 1.442695, %v715_v35  ;;  %v4284_v11 = vpop.f32.mrf.mxu0 }
 0x33b   :  { %v5409_v15 = vpop.eup %4618  ;;  %v707_v47 = vpop.xlane.xlu0 %706  ;;  %4632 = vpow2.f32 %v722_v30 }
 0x33c   :  { %v728_v25 = vmul.f32 1.442695, %v716_v45  ;;  %v717_v27 = vsub.f32 %v5386_v24, %v707_v47  ;;  %1286 = vadd.xlane.f32.xlu1 %v5409_v15  ;;  %v5413_v62 = vpop.eup %4620  ;;  %v1091_v50 = vpop.f32.mrf.mxu0 }
 0x33d   :  { %v709_v3 = vpop.xlane.xlu1 %708 }
 0x33e   :  { %4634 = vpow2.f32 %v728_v25  ;;  %v718_v4 = vsub.f32 %v5389_v5, %v709_v3  ;;  %1276 = vadd.xlane.f32.xlu0 %v5413_v62  ;;  %v730_v32 = vmul.f32 1.442695, %v717_v27  ;;  %v4287_v14 = vpop.f32.mrf.mxu0  ;;  %v1097_v3 = vadd.f32 %v4283_v36, %v3792_v44 }
 0x33f   :  { %v5417_v63 = vpop.eup %4622  ;;  %v711_v34 = vpop.xlane.xlu0 %710  ;;  %4636 = vpow2.f32 %v726_v0  ;;  %v1113_v31 = vadd.f32 %v4287_v14, %v3792_v44  ;;  %v1084_v14 = vadd.f32 %v4280_v42, %v3792_v44 }
 0x340   :  { %v732_v33 = vmul.f32 1.442695, %v718_v4  ;;  %v719_v6 = vsub.f32 %v5392_v22, %v711_v34  ;;  %1282 = vadd.xlane.f32.xlu1 %v5417_v63  ;;  %v5421_v24 = vpop.eup %4624  ;;  %v1104_v16 = vpop.f32.mrf.mxu0  ;;  %v1100_v4 = vadd.f32 %v4284_v11, %v3792_v44 }
 0x341   :  { %v1105_v0 = vadd.f32 %v3792_v44, %v1104_v16  ;;  %v1073_v16 = vadd.f32 %v3792_v44, %v1072_v59  ;;  %v5457_v59 = vld [vmem:[%s6384_s4 + $0x10] sm:$0xff] }
 0x342   :  { %4638 = vpow2.f32 %v732_v33  ;;  %1288 = vadd.xlane.f32.xlu0 %v5421_v24  ;;  %v734_v5 = vmul.f32 1.442695, %v719_v6  ;;  %v4288_v61 = vpop.f32.mrf.mxu0  ;;  %v1361_v33 = vpack.c.bf16 %v1100_v4, %v1097_v3  ;;  %v1092_v6 = vadd.f32 %v3792_v44, %v1091_v50 }
 0x343   :  { %v5424_v2 = vpop.eup %4626  ;;  %4640 = vpow2.f32 %v730_v32  ;;  %v1116_v35 = vadd.f32 %v4288_v61, %v3792_v44  ;;  %v1089_v32 = vadd.f32 %v3792_v44, %v1088_v10 }
 0x344   :  { %736 = vadd.xlane.f32.xlu1 %v5424_v2  ;;  %v5427_v53 = vpop.eup %4628  ;;  %4642 = vpow2.f32 %v734_v5  ;;  %v1107_v9 = vpop.f32.mrf.mxu0  ;;  %v1081_v5 = vadd.f32 %v4279_v56, %v3792_v44 }
 0x345   :  { %v1363_v25 = vpack.c.bf16 %v1116_v35, %v1113_v31  ;;  %v1108_v27 = vadd.f32 %v3792_v44, %v1107_v9  ;;  %v1360_v61 = vpack.c.bf16 %v1092_v6, %v1089_v32  ;;  %v1076_v9 = vadd.f32 %v3792_v44, %v1075_v7  ;;  %v215_v35 = vld [vmem:[%s6384_s4 + $0x18] sm:$0xff] }
 0x346   :  { %1284 = vadd.xlane.f32.xlu0 %v5427_v53  ;;  %v4291_v58 = vpop.f32.mrf.mxu0  ;;  %v219_v6 = vld [vmem:[%s6384_s4 + $0x38] sm:$0xff] }
 0x347   :  { %v5430_v37 = vpop.eup %4630  ;;  %v1129_v19 = vadd.f32 %v4291_v58, %v3792_v44  ;;  %v1362_v34 = vpack.c.bf16 %v1108_v27, %v1105_v0  ;;  %v1359_v58 = vpack.c.bf16 %v1084_v14, %v1081_v5  ;;  %v1358_v36 = vpack.c.bf16 %v1076_v9, %v1073_v16 }
 0x348   :  { %740 = vadd.xlane.f32.xlu1 %v5430_v37  ;;  %v5433_v22 = vpop.eup %4632  ;;  %v1120_v18 = vpop.f32.mrf.mxu0 }
 0x349   :  { %v1121_v26 = vadd.f32 %v3792_v44, %v1120_v18 }
 0x34a   :  { %738 = vadd.xlane.f32.xlu0 %v5433_v22  ;;  %v4292_v23 = vpop.f32.mrf.mxu0 }
 0x34b   :  { %v5436_v38 = vpop.eup %4634  ;;  %v1132_v28 = vadd.f32 %v4292_v23, %v3792_v44  ;;  %v212_v23 = vld [vmem:[%s6384_s4] sm:$0xff] }
 0x34c   :  { %744 = vadd.xlane.f32.xlu1 %v5436_v38  ;;  %v5439_v29 = vpop.eup %4636  ;;  %v1123_v30 = vpop.f32.mrf.mxu0 }
 0x34d   :  { %v1365_v40 = vpack.c.bf16 %v1132_v28, %v1129_v19  ;;  %v1124_v45 = vadd.f32 %v3792_v44, %v1123_v30 }
 0x34e   :  { %742 = vadd.xlane.f32.xlu0 %v5439_v29 }
 0x34f   :  { %v5442_v48 = vpop.eup %4638  ;;  %v1364_v47 = vpack.c.bf16 %v1124_v45, %v1121_v26  ;;  %4305 = vmatprep.subr.bf16.mxu0 %v1365_v40 }
 0x350   :  { %748 = vadd.xlane.f32.xlu1 %v5442_v48  ;;  %v5445_v51 = vpop.eup %4640  ;;  %4306 = vmatpush3.bf16.msra.mxu0 %v1365_v40 }
 0x351   :  { %v5448_v54 = vpop.eup %4642  ;;  %4307 = vmatprep.subr.bf16.mxu0 %v1364_v47 }
 0x352   :  { %746 = vadd.xlane.f32.xlu0 %v5445_v51 }
 0x354   :  { %4308 = vmatpush3.bf16.msra.mxu0 %v1364_v47 }
 0x355   :  { %4309 = vmatprep.subr.bf16.mxu0 %v1363_v25 }
 0x356   :  { %750 = vadd.xlane.f32.xlu0 %v5448_v54 }
 0x358   :  { %4310 = vmatpush3.bf16.msra.mxu0 %v1363_v25  ;;  %v213_v25 = vld [vmem:[%s6384_s4 + $0x8] sm:$0xff] }
 0x359   :  { %4311 = vmatprep.subr.bf16.mxu0 %v1362_v34 }
 0x35c   :  { %4312 = vmatpush3.bf16.msra.mxu0 %v1362_v34 }
 0x35d   :  { %4313 = vmatprep.subr.bf16.mxu0 %v1361_v33 }
 0x360   :  { %4314 = vmatpush3.bf16.msra.mxu0 %v1361_v33  ;;  %v218_v33 = vld [vmem:[%s6384_s4 + $0x30] sm:$0xff] }
 0x361   :  { %4315 = vmatprep.subr.bf16.mxu0 %v1360_v61 }
 0x364   :  { %4316 = vmatpush3.bf16.msra.mxu0 %v1360_v61 }
 0x365   :  { %4317 = vmatprep.subr.bf16.mxu0 %v1359_v58 }
 0x368   :  { %4318 = vmatpush3.bf16.msra.mxu0 %v1359_v58 }
 0x369   :  { %4319 = vmatprep.subr.bf16.mxu0 %v1358_v36 }
 0x36c   :  { %4320 = vmatpush3.bf16.msra.mxu0 %v1358_v36  ;;  %v216_v36 = vld [vmem:[%s6384_s4 + $0x20] sm:$0xff] }
 0x3bb   :  { %v1279_v10 = vpop.xlane.xlu1 %1278 }
 0x3bc   :  { %4644 = vrcp.f32 %v1279_v10  ;;  %v217_v10 = vld [vmem:[%s6384_s4 + $0x28] sm:$0xff] }
 0x3bf   :  { %v1275_v11 = vpop.xlane.xlu1 %1274 }
 0x3c0   :  { %4646 = vrcp.f32 %v1275_v11 }
 0x3c3   :  { %v1281_v50 = vpop.xlane.xlu0 %1280 }
 0x3c4   :  { %4648 = vrcp.f32 %v1281_v50 }
 0x3c5   :  { %v1287_v56 = vpop.xlane.xlu1 %1286 }
 0x3c7   :  { %v1277_v42 = vpop.xlane.xlu0 %1276 }
 0x3c8   :  { %4650 = vrcp.f32 %v1277_v42 }
 0x3c9   :  { %v4645_v7 = vpop.eup %4644  ;;  %v1283_v44 = vpop.xlane.xlu1 %1282  ;;  %4652 = vrcp.f32 %v1287_v56 }
 0x3ca   :  { %v1300_v18 = vmul.f32 %v4645_v7, %v5457_v59 }
 0x3cb   :  { %v1289_v19 = vpop.xlane.xlu0 %1288 }
 0x3cc   :  { %4654 = vrcp.f32 %v1289_v19  ;;  %1318 = vperm.xlu1 %4563, %v1300_v18  }
 0x3cd   :  { %v4647_v26 = vpop.eup %4646  ;;  %v737_v28 = vpop.xlane.xlu1 %736  ;;  %4656 = vrcp.f32 %v1283_v44  ;;  %v4588_v44 = vld [vmem:[%s6385_s11 + $0x8] sm:$0xff]  }
 0x3ce   :  { %v1298_v30 = vmul.f32 %v4647_v26, %v212_v23  ;;  %4353 = vmatprep.subr.bf16.mxu0 %v4588_v44 }
 0x3cf   :  { %v1285_v31 = vpop.xlane.xlu0 %1284 }
 0x3d0   :  { %4658 = vrcp.f32 %v1285_v31  ;;  %1308 = vperm.xlu1 %4563, %v1298_v30  }
 0x3d1   :  { %v4649_v40 = vpop.eup %4648  ;;  %v741_v45 = vpop.xlane.xlu1 %740  ;;  %4660 = vrcp.f32 %v737_v28 }
 0x3d2   :  { %v1301_v47 = vmul.f32 %v4649_v40, %v215_v35 }
 0x3d3   :  { %v739_v0 = vpop.xlane.xlu0 %738 }
 0x3d4   :  { %4662 = vrcp.f32 %v739_v0  ;;  %1323 = vperm.xlu1 %4563, %v1301_v47  }
 0x3d5   :  { %v4651_v27 = vpop.eup %4650  ;;  %v745_v3 = vpop.xlane.xlu1 %744  ;;  %4664 = vrcp.f32 %v741_v45 }
 0x3d6   :  { %v1299_v4 = vmul.f32 %v4651_v27, %v213_v25  ;;  %v4653_v34 = vpop.eup %4652 }
 0x3d7   :  { %v743_v32 = vpop.xlane.xlu0 %742  ;;  %v1304_v14 = vmul.f32 %v4653_v34, %v218_v33  ;;  %v3862_v34 = vld [vmem:[%s6380_s8 + $0x50] sm:$0xff] }
 0x3d8   :  { %4666 = vrcp.f32 %v743_v32  ;;  %1313 = vperm.xlu0 %4562, %v1299_v4   ;;  %v3861_v32 = vld [vmem:[%s6380_s8 + $0x48] sm:$0xff] }
 0x3d9   :  { %v4655_v5 = vpop.eup %4654  ;;  %4668 = vrcp.f32 %v745_v3  ;;  %v749_v58 = vpop.xlane.xlu1 %748 }
 0x3da   :  { %v1305_v61 = vmul.f32 %v4655_v5, %v219_v6  ;;  %v4657_v16 = vpop.eup %4656  ;;  %v3904_v5 = vld [vmem:[%s6380_s8 + $0x60] sm:$0xff] }
 0x3db   :  { %v747_v9 = vpop.xlane.xlu0 %746  ;;  %v1302_v50 = vmul.f32 %v4657_v16, %v216_v36 }
 0x3dc   :  { %4670 = vrcp.f32 %v747_v9  ;;  %1338 = vperm.xlu0 %4562, %v1304_v14   ;;  %1343 = vperm.xlu1 %4563, %v1305_v61   ;;  %v3905_v14 = vld [vmem:[%s6380_s8 + $0x68] sm:$0xff] }
 0x3dd   :  { %v4659_v11 = vpop.eup %4658  ;;  %4672 = vrcp.f32 %v749_v58 }
 0x3de   :  { %v1303_v56 = vmul.f32 %v4659_v11, %v217_v10  ;;  %v4661_v42 = vpop.eup %4660 }
 0x3df   :  { %v751_v7 = vpop.xlane.xlu0 %750  ;;  %v760_v19 = vmul.f32 %v4661_v42, %v212_v23 }
 0x3e0   :  { %4674 = vrcp.f32 %v751_v7  ;;  %1328 = vperm.xlu0 %4562, %v1302_v50   ;;  %1333 = vperm.xlu1 %4563, %v1303_v56  }
 0x3e1   :  { %v4663_v18 = vpop.eup %4662 }
 0x3e2   :  { %v761_v26 = vmul.f32 %v4663_v18, %v213_v25  ;;  %v4665_v28 = vpop.eup %4664 }
 0x3e3   :  { %v762_v31 = vmul.f32 %v4665_v28, %v5457_v59  ;;  %v3863_v59 = vld [vmem:[%s6380_s8 + $0x58] sm:$0xff] }
 0x3e4   :  { %770 = vperm.xlu0 %4562, %v760_v19   ;;  %775 = vperm.xlu1 %4563, %v761_v26   ;;  %v4589_v19 = vld [vmem:[%s6385_s11] sm:$0xff]  }
 0x3e5   :  { %v4667_v30 = vpop.eup %4666 }
 0x3e6   :  { %v763_v40 = vmul.f32 %v4667_v30, %v215_v35  ;;  %v4669_v45 = vpop.eup %4668  ;;  %v3860_v35 = vld [vmem:[%s6380_s8 + $0x40] sm:$0xff] }
 0x3e7   :  { %v764_v0 = vmul.f32 %v4669_v45, %v216_v36 }
 0x3e8   :  { %780 = vperm.xlu0 %4562, %v762_v31   ;;  %785 = vperm.xlu1 %4563, %v763_v40  }
 0x3e9   :  { %v4671_v47 = vpop.eup %4670 }
 0x3ea   :  { %v765_v27 = vmul.f32 %v4671_v47, %v217_v10  ;;  %v4673_v3 = vpop.eup %4672 }
 0x3eb   :  { %v766_v23 = vmul.f32 %v4673_v3, %v218_v33  ;;  %v3906_v33 = vld [vmem:[%s6380_s8 + $0x70] sm:$0xff] }
 0x3ec   :  { %790 = vperm.xlu0 %4562, %v764_v0   ;;  %795 = vperm.xlu1 %4563, %v765_v27  }
 0x3ed   :  { %v4675_v4 = vpop.eup %4674 }
 0x3ee   :  { %v767_v25 = vmul.f32 %v4675_v4, %v219_v6  ;;  %v3907_v6 = vld [vmem:[%s6380_s8 + $0x78] sm:$0xff] }
 0x3f0   :  { %800 = vperm.xlu0 %4562, %v766_v23   ;;  %805 = vperm.xlu1 %4563, %v767_v25  }
 0x3f4   :  { %1923 = vperm.xlu0 %4562, %v3862_v34   ;;  %1928 = vperm.xlu1 %4563, %v3863_v59  }
 0x3f8   :  { %1913 = vperm.xlu0 %4562, %v3860_v35   ;;  %1918 = vperm.xlu1 %4563, %v3861_v32   ;;  %v4596_v35 = vld [vmem:[%s6407_s22 + $0x20] sm:$0xff]  }
 0x3fc   :  { %2461 = vperm.xlu0 %4562, %v3906_v33   ;;  %2466 = vperm.xlu1 %4563, %v3907_v6  }
 0x400   :  { %2451 = vperm.xlu0 %4562, %v3904_v5   ;;  %2456 = vperm.xlu1 %4563, %v3905_v14  }
 0x447   :  { %v1319_v61 = vpop.permute.xlu1 %1318 }
 0x448   :  { %v1348_v50 = vmul.f32 %v5397_v17, %v1319_v61 }
 0x44b   :  { %v1309_v16 = vpop.permute.xlu1 %1308 }
 0x44c   :  { %v1346_v10 = vmul.f32 %v5401_v21, %v1309_v16 }
 0x44f   :  { %v1324_v58 = vpop.permute.xlu1 %1323 }
 0x450   :  { %v1349_v9 = vmul.f32 %v5405_v39, %v1324_v58 }
 0x452   :  { %v1355_v42 = vpack.c.bf16 %v1349_v9, %v1348_v50 }
 0x453   :  { %v1314_v36 = vpop.permute.xlu0 %1313 }
 0x454   :  { %v1347_v11 = vmul.f32 %v5413_v62, %v1314_v36 }
 0x456   :  { %v1354_v56 = vpack.c.bf16 %v1347_v11, %v1346_v10 }
 0x457   :  { %v1344_v7 = vpop.permute.xlu1 %1343  ;;  %v1339_v18 = vpop.permute.xlu0 %1338 }
 0x458   :  { %4321 = vmatprep.mubr.bf16.mxu0 %v1354_v56  ;;  %v1353_v39 = vmul.f32 %v5421_v24, %v1344_v7  ;;  %v1352_v26 = vmul.f32 %v5409_v15, %v1339_v18 }
 0x459   :  { %4322 = vmatmul.mubr.bf16.vlgmr.msra.gmra.mxu0 %v1355_v42  ;;  %v3807_v42 = vld [vmem:[%s6387_s12] ss:$0 sm:$0xff] }
 0x45a   :  { %4354 = vmatpush3.bf16.msra.mxu0 %v4588_v44  ;;  %v1357_v31 = vpack.c.bf16 %v1353_v39, %v1352_v26 }
 0x45b   :  { %v1334_v21 = vpop.permute.xlu1 %1333  ;;  %v1329_v28 = vpop.permute.xlu0 %1328  ;;  %4355 = vmatprep.subr.bf16.mxu0 %v4589_v19 }
 0x45c   :  { %v1351_v17 = vmul.f32 %v5427_v53, %v1334_v21  ;;  %v1350_v62 = vmul.f32 %v5417_v63, %v1329_v28 }
 0x45e   :  { %v1356_v30 = vpack.c.bf16 %v1351_v17, %v1350_v62  ;;  %4356 = vmatpush3.bf16.msra.mxu0 %v4589_v19 }
 0x45f   :  { %v776_v40 = vpop.permute.xlu1 %775  ;;  %v771_v45 = vpop.permute.xlu0 %770 }
 0x460   :  { %v809_v47 = vmul.f32 %v5433_v22, %v776_v40  ;;  %v808_v44 = vmul.f32 %v5424_v2, %v771_v45  ;;  %4325 = vmatprep.mubr.bf16.mxu0 %v1356_v30 }
 0x461   :  { %4326 = vmatmul.mubr.bf16.gmra.mxu0 %v1357_v31 }
 0x462   :  { %v816_v24 = vpack.c.bf16 %v809_v47, %v808_v44  ;;  %4357 = vmatprep.mubr.msk.bf16.mxu0 %vm118_vm0, %v5064_v8 }
 0x463   :  { %v786_v15 = vpop.permute.xlu1 %785  ;;  %v781_v0 = vpop.permute.xlu0 %780 }
 0x464   :  { %v811_v53 = vmul.f32 %v5439_v29, %v786_v15  ;;  %v810_v63 = vmul.f32 %v5430_v37, %v781_v0  ;;  %4345 = vmatprep.mubr.bf16.mxu1 %v816_v24 }
 0x466   :  { %v817_v27 = vpack.c.bf16 %v811_v53, %v810_v63 }
 0x467   :  { %v796_v3 = vpop.permute.xlu1 %795  ;;  %v791_v4 = vpop.permute.xlu0 %790 }
 0x468   :  { %v813_v22 = vmul.f32 %v5445_v51, %v796_v3  ;;  %v812_v2 = vmul.f32 %v5436_v38, %v791_v4  ;;  %4346 = vmatmul.mubr.bf16.vlgmr.msra.gmra.mxu1 %v817_v27  ;;  %v5541_v38 = vld [vmem:[%s6386_s13 + $0x8] sm:$0xff]  }
 0x469   :  { %4358 = vmatmul.mubr.msk.bf16.vlgmr.msra.gmra.mxu0 %vm118_vm0, %v5075_v12  ;;  %4365 = vmatprep.subr.bf16.mxu1 %v5541_v38  ;;  %v5551_v51 = vld [vmem:[%s6409_s26 + $0x8] sm:$0xff]  }
 0x46a   :  { %v818_v23 = vpack.c.bf16 %v813_v22, %v812_v2  ;;  %4361 = vmatprep.mubr.msk.bf16.mxu0 %vm118_vm0, %v5079_v13  ;;  %4366 = vmatpush3.bf16.msra.mxu1 %v5541_v38 }
 0x46b   :  { %v806_v25 = vpop.permute.xlu1 %805  ;;  %v801_v29 = vpop.permute.xlu0 %800 }
 0x46c   :  { %v815_v37 = vmul.f32 %v5448_v54, %v806_v25  ;;  %v814_v34 = vmul.f32 %v5442_v48, %v801_v29  ;;  %4349 = vmatprep.mubr.bf16.mxu1 %v818_v23  ;;  %v4591_v48 = vld [vmem:[%s6386_s13] sm:$0xff]   ;;  %v4592_v54 = vld [vmem:[%s6407_s22 + $0x28] sm:$0xff]  }
 0x46d   :  { %4367 = vmatprep.subr.bf16.mxu1 %v4591_v48  ;;  %4377 = vmatprep.subr.bf16.mxu0 %v4592_v54 }
 0x46e   :  { %v819_v59 = vpack.c.bf16 %v815_v37, %v814_v34  ;;  %4368 = vmatpush3.bf16.msra.mxu1 %v4591_v48  ;;  %4378 = vmatpush3.bf16.msra.mxu0 %v4592_v54 }
 0x46f   :  { %4389 = vmatprep.subr.bf16.mxu1 %v5551_v51  ;;  %4379 = vmatprep.subr.bf16.mxu0 %v4596_v35 }
 0x470   :  { %4350 = vmatmul.mubr.bf16.gmra.mxu1 %v819_v59 }
 0x471   :  { %4362 = vmatmul.mubr.msk.bf16.gmra.mxu0 %vm118_vm0, %v5109_v20 }
 0x472   :  { %4381 = vmatprep.mubr.msk.bf16.mxu0 %vm118_vm0, %v5064_v8  ;;  %4380 = vmatpush3.bf16.msra.mxu0 %v4596_v35 }
 0x479   :  { %4382 = vmatmul.mubr.msk.bf16.vlgmr.msra.gmra.mxu0 %vm118_vm0, %v5075_v12 }
 0x47a   :  { %4385 = vmatprep.mubr.msk.bf16.mxu0 %vm118_vm0, %v5079_v13 }
 0x481   :  { %4386 = vmatmul.mubr.msk.bf16.gmra.mxu0 %vm118_vm0, %v5109_v20 }
 0x519   :  { %v4323_v32 = vpop.f32.mrf.mxu0 }
 0x51b   :  { %v1400_v33 = vpop.f32.mrf.mxu0 }
 0x51d   :  { %v4324_v6 = vpop.f32.mrf.mxu0 }
 0x51f   :  { %v1403_v5 = vpop.f32.mrf.mxu0 }
 0x521   :  { %v4327_v14 = vpop.f32.mrf.mxu0 }
 0x523   :  { %v1416_v61 = vpop.f32.mrf.mxu0 }
 0x525   :  { %v4328_v16 = vpop.f32.mrf.mxu0 }
 0x527   :  { %v1419_v58 = vpop.f32.mrf.mxu0 }
 0x528   :  { %v4347_v9 = vpop.f32.mrf.mxu1 }
 0x529   :  { %v4359_v36 = vpop.f32.mrf.mxu0  ;;  %v1474_v56 = vadd.f32 %v4347_v9, %v4323_v32  ;;  %v4913_v9 = vld [vmem:[%s6409_s26] sm:$0xff]  }
 0x52a   :  { %v1465_v10 = vpop.f32.mrf.mxu1  ;;  %v1562_v40 = vadd.f32 %v4359_v36, %v3807_v42 }
 0x52b   :  { %v1466_v11 = vadd.f32 %v1465_v10, %v1400_v33  ;;  %v1553_v50 = vpop.f32.mrf.mxu0  ;;  %v1586_v31 = vmul.f32 0.5, %v1474_v56  ;;  %v4593_v56 = vld [vmem:[%s6378_s7 + $0x20] sm:$0xff]  }
 0x52c   :  { %v4348_v7 = vpop.f32.mrf.mxu1  ;;  %v1554_v28 = vadd.f32 %v3807_v42, %v1553_v50 }
 0x52d   :  { %v1477_v18 = vadd.f32 %v4348_v7, %v4324_v6  ;;  %v4360_v19 = vpop.f32.mrf.mxu0  ;;  %v1584_v21 = vmul.f32 0.5, %v1466_v11  ;;  %v5575_v3 = vadd.f32 %v1586_v31, %v1562_v40  ;;  %v4594_v7 = vld [vmem:[%s6378_s7 + $0x28] sm:$0xff]   ;;  %v4599_v31 = vld [vmem:[%s6378_s7 + $0x38] sm:$0xff]  }
 0x52e   :  { %v1565_v39 = vadd.f32 %v4360_v19, %v3807_v42  ;;  %v1468_v26 = vpop.f32.mrf.mxu1  ;;  %v5618_v19 = vld [vmem:[%s6379_s2] sm:$0xff]  }
 0x52f   :  { %v1587_v17 = vmul.f32 0.5, %v1477_v18  ;;  %v1469_v62 = vadd.f32 %v1468_v26, %v1403_v5  ;;  %v1556_v30 = vpop.f32.mrf.mxu0  ;;  %v5571_v53 = vadd.f32 %v1584_v21, %v1554_v28  ;;  %v4597_v18 = vld [vmem:[%s6377_s9 + $0x20] sm:$0xff]   ;;  %v5633_v26 = vld [vmem:[%s6379_s2 + $0x10] sm:$0xff]   ;;  %v5641_v21 = vld [vmem:[%s6379_s2 + $0x18] sm:$0xff]  }
 0x530   :  { %v1557_v45 = vadd.f32 %v3807_v42, %v1556_v30  ;;  %v4351_v47 = vpop.f32.mrf.mxu1  ;;  %v5648_v28 = vld [vmem:[%s6379_s2 + $0x20] sm:$0xff]   ;;  %v5672_v30 = vld [vmem:[%s6379_s2 + $0x38] sm:$0xff]  }
 0x531   :  { %v1585_v44 = vmul.f32 0.5, %v1469_v62  ;;  %v4363_v24 = vpop.f32.mrf.mxu0  ;;  %v5569_v15 = vadd.f32 %v1587_v17, %v1565_v39  ;;  %v1490_v4 = vadd.f32 %v4351_v47, %v4327_v14  ;;  %v5626_v39 = vld [vmem:[%s6379_s2 + $0x8] sm:$0xff]   ;;  %v5662_v17 = vld [vmem:[%s6379_s2 + $0x30] sm:$0xff]  }
 0x532   :  { %v1481_v0 = vpop.f32.mrf.mxu1  ;;  %v1578_v5 = vadd.f32 %v4363_v24, %v3807_v42  ;;  %v4598_v62 = vld [vmem:[%s6378_s7 + $0x30] sm:$0xff]  }
 0x533   :  { %v5573_v63 = vadd.f32 %v1585_v44, %v1557_v45  ;;  %v1569_v27 = vpop.f32.mrf.mxu0  ;;  %v1482_v22 = vadd.f32 %v1481_v0, %v1416_v61  ;;  %v1601_v37 = vpack.c.bf16 %v5569_v15, %v5575_v3  ;;  %v1590_v6 = vmul.f32 0.5, %v1490_v4  ;;  %v5684_v44 = vld [vmem:[%s6381_s6 + $0x2] ss:$0 sm:$0xff] }
 0x534   :  { %v4352_v2 = vpop.f32.mrf.mxu1  ;;  %v1570_v54 = vadd.f32 %v3807_v42, %v1569_v27 }
 0x535   :  { %v1600_v23 = vpack.c.bf16 %v5573_v63, %v5571_v53  ;;  %v1493_v25 = vadd.f32 %v4352_v2, %v4328_v16  ;;  %v4364_v29 = vpop.f32.mrf.mxu0  ;;  %v1588_v48 = vmul.f32 0.5, %v1482_v22  ;;  %v5596_v11 = vadd.f32 %v1590_v6, %v1578_v5 }
 0x536   :  { %v1581_v34 = vadd.f32 %v4364_v29, %v3807_v42  ;;  %v1484_v59 = vpop.f32.mrf.mxu1 }
 0x537   :  { %v1591_v35 = vmul.f32 0.5, %v1493_v25  ;;  %v1485_v32 = vadd.f32 %v1484_v59, %v1419_v58  ;;  %v1572_v33 = vpop.f32.mrf.mxu0  ;;  %4369 = vmatprep.mubr.msk.bf16.mxu1 %vm118_vm0, %v1600_v23  ;;  %v4595_v58 = vld [vmem:[%s6377_s9 + $0x28] sm:$0xff]   ;;  %v5592_v36 = vadd.f32 %v1588_v48, %v1570_v54  ;;  %v3720_v25 = vld [vmem:[%s6388_s15] ss:$0 sm:$0xff] }
 0x538   :  { %v1573_v14 = vadd.f32 %v3807_v42, %v1572_v33  ;;  %4370 = vmatmul.mubr.msk.bf16.vlgmr.msra.gmra.mxu1 %vm118_vm0, %v1601_v37  ;;  %v5701_v29 = vadd.f32 %v5211_v41, %v3720_v25  ;;  %v5708_v54 = vadd.f32 %v5220_v46, %v3720_v25  ;;  %v5712_v6 = vadd.f32 %v3720_v25, %v5223_v49 }
 0x539   :  { %v1589_v61 = vmul.f32 0.5, %v1485_v32  ;;  %4390 = vmatpush3.bf16.msra.mxu1 %v5551_v51  ;;  %v5584_v16 = vadd.f32 %v1591_v35, %v1581_v34  ;;  %v4383_v40 = vpop.f32.mrf.mxu0  ;;  %v5704_v34 = vadd.f32 %v3720_v25, %v5213_v43  ;;  %v5716_v43 = vadd.f32 %v5226_v52, %v3720_v25 }
 0x53a   :  { %4391 = vmatprep.subr.bf16.mxu1 %v4913_v9  ;;  %v5687_v0 = vadd.f32 %v4383_v40, %v5684_v44 }
 0x53b   :  { %v5594_v10 = vadd.f32 %v1589_v61, %v1573_v14  ;;  %v1603_v42 = vpack.c.bf16 %v5584_v16, %v5596_v11  ;;  %v1870_v45 = vpop.f32.mrf.mxu0  ;;  %6410 = vst [vmem:[#allocation2_spill] sm:$0xff] %v5716_v43 }
 0x53c   :  { %v1871_v27 = vadd.f32 %v5684_v44, %v1870_v45 }
 0x53d   :  { %v1602_v50 = vpack.c.bf16 %v5594_v10, %v5592_v36  ;;  %4392 = vmatpush3.bf16.msra.mxu1 %v4913_v9  ;;  %v4384_v47 = vpop.f32.mrf.mxu0 }
 0x53e   :  { %4397 = vmatprep.subr.bf16.mxu1 %v4595_v58  ;;  %v5691_v4 = vadd.f32 %v4384_v47, %v5684_v44  ;;  %v1924_v47 = vpop.permute.xlu0 %1923 }
 0x53f   :  { %4373 = vmatprep.mubr.msk.bf16.mxu1 %vm118_vm0, %v1602_v50  ;;  %v1873_v24 = vpop.f32.mrf.mxu0 }
 0x540   :  { %4374 = vmatmul.mubr.msk.bf16.gmra.mxu1 %vm118_vm0, %v1603_v42  ;;  %v1874_v22 = vadd.f32 %v5684_v44, %v1873_v24  ;;  %v2119_v2 = vpack.c.bf16 %v5691_v4, %v5687_v0  ;;  %v5724_v42 = vadd.f32 %v5232_v57, %v3720_v25 }
 0x541   :  { %4393 = vmatprep.mubr.msk.bf16.mxu1 %vm118_vm0, %v4593_v56 }
 0x542   :  { %v2118_v23 = vpack.c.bf16 %v1874_v22, %v1871_v27  ;;  %6411 = vst [vmem:[#allocation3_spill] sm:$0xff] %v5724_v42  ;;  %v1929_v22 = vpop.permute.xlu1 %1928 }
 0x544   :  { %4421 = vmatprep.mubr.msk.bf16.mxu0 %vm118_vm0, %v2118_v23 }
 0x548   :  { %4394 = vmatmul.mubr.msk.bf16.vlgmr.msra.gmra.mxu1 %vm118_vm0, %v4594_v7 }
 0x549   :  { %4398 = vmatpush3.bf16.msra.mxu1 %v4595_v58  ;;  %4401 = vmatprep.mubr.msk.bf16.mxu1 %vm118_vm0, %v5618_v19  ;;  %v5720_v58 = vadd.f32 %v3720_v25, %v5230_v55 }
 0x54a   :  { %4399 = vmatprep.subr.bf16.mxu1 %v4597_v18 }
 0x54d   :  { %4400 = vmatpush3.bf16.msra.mxu1 %v4597_v18  ;;  %v5727_v18 = vpop.f32.mrf.mxu0 }
 0x54e   :  { %4441 = vmatprep.subr.bf16.mxu1 %v5551_v51 }
 0x54f   :  { %v1886_v27 = vpop.f32.mrf.mxu0 }
 0x550   :  { %4402 = vmatmul.mubr.msk.bf16.vlgmr.msra.gmra.mxu1 %vm118_vm0, %v5626_v39 }
 0x551   :  { %4405 = vmatprep.mubr.msk.bf16.mxu1 %vm118_vm0, %v5633_v26  ;;  %4442 = vmatpush3.bf16.msra.mxu1 %v5551_v51  ;;  %v5655_v51 = vld [vmem:[%s6379_s2 + $0x28] sm:$0xff]  }
 0x552   :  { %4443 = vmatprep.subr.bf16.mxu1 %v4913_v9 }
 0x555   :  { %4444 = vmatpush3.bf16.msra.mxu1 %v4913_v9 }
 0x558   :  { %4406 = vmatmul.mubr.msk.bf16.gmra.mxu1 %vm118_vm0, %v5641_v21 }
 0x559   :  { %4409 = vmatprep.mubr.msk.bf16.mxu1 %vm118_vm0, %v5648_v28 }
 0x560   :  { %4410 = vmatmul.mubr.msk.bf16.gmra.mxu1 %vm118_vm0, %v5655_v51 }
 0x561   :  { %4413 = vmatprep.mubr.msk.bf16.mxu1 %vm118_vm0, %v5662_v17 }
 0x568   :  { %4414 = vmatmul.mubr.msk.bf16.gmra.mxu1 %vm118_vm0, %v5672_v30 }
 0x569   :  { %4445 = vmatprep.mubr.msk.bf16.mxu1 %vm118_vm0, %v4598_v62 }
 0x570   :  { %4446 = vmatmul.mubr.msk.bf16.vlgmr.msra.gmra.mxu1 %vm118_vm0, %v4599_v31  ;;  %v5730_v31 = vadd.f32 %v3720_v25, %v5235_v60  ;;  %v5734_v60 = vpop.f32.mrf.mxu0 }
 0x572   :  { %6412 = vst [vmem:[#allocation4_spill] sm:$0xff] %v5730_v31 }
 0x5f8   :  { %v4371_v37 = vpop.f32.mrf.mxu1 }
 0x5f9   :  { %v1675_v59 = vadd.f32 %v4371_v37, %v5701_v29 }
 0x5fa   :  { %v1666_v48 = vpop.f32.mrf.mxu1 }
 0x5fb   :  { %v3822_v35 = vmul.f32 -1.442695, %v1675_v59  ;;  %v1667_v32 = vadd.f32 %v1666_v48, %v5704_v34 }
 0x5fc   :  { %v4372_v33 = vpop.f32.mrf.mxu1 }
 0x5fd   :  { %4676 = vpow2.f32 %v3822_v35  ;;  %v3820_v41 = vmul.f32 -1.442695, %v1667_v32  ;;  %v1678_v5 = vadd.f32 %v4372_v33, %v5708_v54  ;;  %v1914_v33 = vpop.permute.xlu0 %1913 }
 0x5fe   :  { %v1669_v14 = vpop.f32.mrf.mxu1 }
 0x5ff   :  { %4678 = vpow2.f32 %v3820_v41  ;;  %v3823_v61 = vmul.f32 -1.442695, %v1678_v5  ;;  %v1670_v46 = vadd.f32 %v1669_v14, %v5712_v6 }
 0x600   :  { %v4375_v9 = vpop.f32.mrf.mxu1 }
 0x601   :  { %4680 = vpow2.f32 %v3823_v61  ;;  %v3821_v50 = vmul.f32 -1.442695, %v1670_v46  ;;  %v1691_v49 = vadd.f32 %v4375_v9, %v5716_v43  ;;  %v1919_v46 = vpop.permute.xlu1 %1918 }
 0x602   :  { %v1682_v56 = vpop.f32.mrf.mxu1 }
 0x603   :  { %4682 = vpow2.f32 %v3821_v50  ;;  %v3826_v7 = vmul.f32 -1.442695, %v1691_v49  ;;  %v1683_v52 = vadd.f32 %v1682_v56, %v5720_v58  ;;  %v5741_v49 = vld [vmem:[%s6382_s10 + $0x2] ss:$0 sm:$0xff] }
 0x604   :  { %v4376_v62 = vpop.f32.mrf.mxu1 }
 0x605   :  { %4684 = vpow2.f32 %v3826_v7  ;;  %v3824_v55 = vmul.f32 -1.442695, %v1683_v52  ;;  %v1694_v40 = vadd.f32 %v4376_v62, %v5724_v42  ;;  %v1889_v52 = vpop.f32.mrf.mxu0 }
 0x606   :  { %v1685_v45 = vpop.f32.mrf.mxu1 }
 0x607   :  { %4686 = vpow2.f32 %v3824_v55  ;;  %v3827_v24 = vmul.f32 -1.442695, %v1694_v40  ;;  %v1686_v57 = vadd.f32 %v1685_v45, %v5730_v31 }
 0x608   :  { %v4395_v23 = vpop.f32.mrf.mxu1 }
 0x609   :  { %4688 = vpow2.f32 %v3827_v24  ;;  %v3825_v37 = vmul.f32 -1.442695, %v1686_v57  ;;  %v1990_v5 = vadd.f32 %v4395_v23, %v1924_v47  ;;  %v1887_v57 = vadd.f32 %v5684_v44, %v1886_v27 }
 0x60a   :  { %v4677_v59 = vpop.eup %4676  ;;  %v1981_v48 = vpop.f32.mrf.mxu1 }
 0x60b   :  { %v1723_v35 = vadd.f32 1.0, %v4677_v59  ;;  %4690 = vpow2.f32 %v3825_v37  ;;  %v1982_v9 = vadd.f32 %v1981_v48, %v1914_v33  ;;  %v4600_v37 = vld [vmem:[%s6407_s22 + $0x38] sm:$0xff]  }
 0x60c   :  { %v4679_v25 = vpop.eup %4678  ;;  %4692 = vtanh.f32 %v5575_v3  ;;  %v4396_v32 = vpop.f32.mrf.mxu1 }
 0x60d   :  { %4694 = vrcp.f32 %v1723_v35  ;;  %v1721_v41 = vadd.f32 1.0, %v4679_v25  ;;  %v1993_v14 = vadd.f32 %v4396_v32, %v1929_v22  ;;  %v1890_v22 = vadd.f32 %v5684_v44, %v1889_v52 }
 0x60e   :  { %v4681_v61 = vpop.eup %4680  ;;  %4696 = vtanh.f32 %v5571_v53  ;;  %v1984_v50 = vpop.f32.mrf.mxu1 }
 0x60f   :  { %4698 = vrcp.f32 %v1721_v41  ;;  %v1724_v56 = vadd.f32 1.0, %v4681_v61  ;;  %v2123_v3 = vpack.c.bf16 %v1993_v14, %v1990_v5  ;;  %v1985_v7 = vadd.f32 %v1984_v50, %v1919_v46 }
 0x610   :  { %v4683_v62 = vpop.eup %4682  ;;  %4700 = vtanh.f32 %v5569_v15  ;;  %v4403_v55 = vpop.f32.mrf.mxu1  ;;  %v2120_v32 = vpack.c.bf16 %v1890_v22, %v1887_v57  ;;  %v4923_v22 = vld [vmem:[%s6408_s27] sm:$0xff] }
 0x611   :  { %4702 = vrcp.f32 %v1724_v56  ;;  %v1722_v40 = vadd.f32 1.0, %v4683_v62  ;;  %v2122_v45 = vpack.c.bf16 %v1985_v7, %v1982_v9  ;;  %v2064_v53 = vadd.f32 %v4403_v55, %v5741_v49  ;;  %4417 = vmatprep.subr.bf16.mxu0 %v2123_v3 }
 0x612   :  { %v4685_v47 = vpop.eup %4684  ;;  %4704 = vtanh.f32 %v5573_v63  ;;  %v2055_v24 = vpop.f32.mrf.mxu1  ;;  %4418 = vmatpush3.bf16.msra.mxu0 %v2123_v3  ;;  %v1895_v3 = vadd.f32 %v5727_v18, %v5684_v44 }
 0x613   :  { %4706 = vrcp.f32 %v1722_v40  ;;  %v1727_v23 = vadd.f32 1.0, %v4685_v47  ;;  %v2056_v15 = vadd.f32 %v5741_v49, %v2055_v24  ;;  %4419 = vmatprep.subr.bf16.mxu0 %v2122_v45 }
 0x614   :  { %v4687_v59 = vpop.eup %4686  ;;  %4708 = vtanh.f32 %v5596_v11  ;;  %v4404_v48 = vpop.f32.mrf.mxu1  ;;  %v4601_v11 = vld [vmem:[%s6407_s22 + $0x30] sm:$0xff]  }
 0x615   :  { %4710 = vrcp.f32 %v1727_v23  ;;  %v1725_v63 = vadd.f32 1.0, %v4687_v59  ;;  %v2067_v35 = vadd.f32 %v4404_v48, %v5741_v49 }
 0x616   :  { %v4689_v27 = vpop.eup %4688  ;;  %4712 = vtanh.f32 %v5592_v36  ;;  %v2058_v25 = vpop.f32.mrf.mxu1  ;;  %4420 = vmatpush3.bf16.msra.mxu0 %v2122_v45 }
 0x617   :  { %4714 = vrcp.f32 %v1725_v63  ;;  %v1728_v33 = vadd.f32 1.0, %v4689_v27  ;;  %v5755_v41 = vpack.c.bf16 %v2067_v35, %v2064_v53  ;;  %v2059_v5 = vadd.f32 %v5741_v49, %v2058_v25  ;;  %4429 = vmatprep.subr.bf16.mxu0 %v4600_v37 }
 0x618   :  { %v4691_v14 = vpop.eup %4690  ;;  %4716 = vtanh.f32 %v5584_v16  ;;  %v4407_v61 = vpop.f32.mrf.mxu1  ;;  %v1898_v16 = vadd.f32 %v5734_v60, %v5684_v44  ;;  %v4922_v44 = vld [vmem:[%s6408_s27 + $0x10] sm:$0xff] }
 0x619   :  { %v4693_v46 = vpop.eup %4692  ;;  %4718 = vrcp.f32 %v1728_v33  ;;  %v1726_v36 = vadd.f32 1.0, %v4691_v14  ;;  %v5762_v9 = vpack.c.bf16 %v2059_v5, %v2056_v15  ;;  %v2080_v50 = vadd.f32 %v4407_v61, %v5741_v49  ;;  %4422 = vmatmul.mubr.msk.bf16.vlgmr.msra.gmra.mxu0 %vm118_vm0, %v2119_v2 }
 0x61a   :  { %v4695_v56 = vpop.eup %4694  ;;  %4720 = vtanh.f32 %v5594_v10  ;;  %v2071_v7 = vpop.f32.mrf.mxu1  ;;  %4425 = vmatprep.mubr.msk.bf16.mxu0 %vm118_vm0, %v2120_v32  ;;  %4430 = vmatpush3.bf16.msra.mxu0 %v4600_v37  ;;  %v2121_v47 = vpack.c.bf16 %v1898_v16, %v1895_v3  ;;  %v4925_v3 = vld [vmem:[%s6408_s27 + $0x8] sm:$0xff] }
 0x61b   :  { %v4697_v52 = vpop.eup %4696  ;;  %4722 = vrcp.f32 %v1726_v36  ;;  %v2072_v62 = vadd.f32 %v5741_v49, %v2071_v7  ;;  %4431 = vmatprep.subr.bf16.mxu0 %v4601_v11  ;;  %v1755_v0 = vmul.f32 %v4695_v56, %v4693_v46  ;;  %v1763_v4 = vsub.f32 1.0, %v4695_v56  ;;  %v4924_v36 = vld [vmem:[%s6408_s27 + $0x18] sm:$0xff] }
 0x61c   :  { %v4699_v2 = vpop.eup %4698  ;;  %v4408_v55 = vpop.f32.mrf.mxu1 }
 0x61d   :  { %v4701_v10 = vpop.eup %4700  ;;  %v1753_v40 = vmul.f32 %v4699_v2, %v4697_v52  ;;  %v1761_v45 = vsub.f32 1.0, %v4699_v2  ;;  %v2083_v18 = vadd.f32 %v4408_v55, %v5741_v49  ;;  %v1771_v60 = vmul.f32 %v4922_v44, %v1763_v4 }
 0x61e   :  { %v4703_v53 = vpop.eup %4702  ;;  %v2074_v24 = vpop.f32.mrf.mxu1  ;;  %4432 = vmatpush3.bf16.msra.mxu0 %v4601_v11 }
 0x61f   :  { %v4705_v57 = vpop.eup %4704  ;;  %v1769_v23 = vmul.f32 %v4923_v22, %v1761_v45  ;;  %v5783_v15 = vpack.c.bf16 %v2083_v18, %v2080_v50  ;;  %v2075_v37 = vadd.f32 %v5741_v49, %v2074_v24  ;;  %v1756_v59 = vmul.f32 %v4703_v53, %v4701_v10 }
 0x620   :  { %v4707_v48 = vpop.eup %4706  ;;  %v4411_v63 = vpop.f32.mrf.mxu1  ;;  %v1764_v35 = vsub.f32 1.0, %v4703_v53  ;;  %v5786_v27 = vadd.f32 %v1771_v60, %v1755_v0  ;;  %v4926_v53 = vld [vmem:[%s6408_s27 + $0x30] sm:$0xff] }
 0x621   :  { %v4709_v25 = vpop.eup %4708  ;;  %v5788_v32 = vadd.f32 %v1769_v23, %v1753_v40  ;;  %v1754_v33 = vmul.f32 %v4707_v48, %v4705_v57  ;;  %v1762_v5 = vsub.f32 1.0, %v4707_v48  ;;  %v5790_v11 = vpack.c.bf16 %v2075_v37, %v2072_v62  ;;  %4426 = vmatmul.mubr.msk.bf16.gmra.mxu0 %vm118_vm0, %v2121_v47  ;;  %v4927_v23 = vld [vmem:[%s6408_s27 + $0x20] sm:$0xff] }
 0x622   :  { %v4711_v14 = vpop.eup %4710  ;;  %v2096_v61 = vadd.f32 %v4411_v63, %v5741_v49  ;;  %v2087_v46 = vpop.f32.mrf.mxu1  ;;  %4433 = vmatprep.mubr.msk.bf16.mxu0 %vm118_vm0, %v5064_v8  ;;  %v1772_v50 = vmul.f32 %v4924_v36, %v1764_v35  ;;  %v4928_v36 = vld [vmem:[%s6408_s27 + $0x38] sm:$0xff] }
 0x623   :  { %v4713_v56 = vpop.eup %4712  ;;  %v1770_v16 = vmul.f32 %v4925_v3, %v1762_v5  ;;  %v2088_v7 = vadd.f32 %v5741_v49, %v2087_v46  ;;  %v1759_v52 = vmul.f32 %v4711_v14, %v4709_v25  ;;  %v1767_v62 = vsub.f32 1.0, %v4711_v14  ;;  %v4929_v3 = vld [vmem:[%s6408_s27 + $0x28] sm:$0xff] }
 0x624   :  { %v4715_v0 = vpop.eup %4714  ;;  %v4412_v4 = vpop.f32.mrf.mxu1  ;;  %v5803_v2 = vadd.f32 %v1772_v50, %v1756_v59 }
 0x625   :  { %v4717_v55 = vpop.eup %4716  ;;  %v5805_v10 = vadd.f32 %v1770_v16, %v1754_v33  ;;  %v2099_v40 = vadd.f32 %v4412_v4, %v5741_v49  ;;  %v1757_v45 = vmul.f32 %v4715_v0, %v4713_v56  ;;  %v1765_v18 = vsub.f32 1.0, %v4715_v0  ;;  %v2467_v4 = vpop.permute.xlu1 %2466 }
 0x626   :  { %v4719_v44 = vpop.eup %4718  ;;  %v2090_v60 = vpop.f32.mrf.mxu1  ;;  %v1775_v47 = vmul.f32 %v4926_v53, %v1767_v62 }
 0x627   :  { %v4721_v24 = vpop.eup %4720  ;;  %v5811_v57 = vpack.c.bf16 %v2099_v40, %v2096_v61  ;;  %v2091_v22 = vadd.f32 %v5741_v49, %v2090_v60  ;;  %v1773_v37 = vmul.f32 %v4927_v23, %v1765_v18  ;;  %v1760_v63 = vmul.f32 %v4719_v44, %v4717_v55  ;;  %v2462_v40 = vpop.permute.xlu0 %2461 }
 0x628   :  { %v4723_v59 = vpop.eup %4722  ;;  %v4415_v48 = vpop.f32.mrf.mxu1  ;;  %v1768_v35 = vsub.f32 1.0, %v4719_v44  ;;  %v5817_v25 = vadd.f32 %v1775_v47, %v1759_v52 }
 0x629   :  { %v5819_v33 = vpack.c.bf16 %v2091_v22, %v2088_v7  ;;  %4434 = vmatmul.mubr.msk.bf16.vlgmr.msra.gmra.mxu0 %vm118_vm0, %v5075_v12  ;;  %v1758_v5 = vmul.f32 %v4723_v59, %v4721_v24  ;;  %v1766_v14 = vsub.f32 1.0, %v4723_v59  ;;  %v5825_v46 = vadd.f32 %v1773_v37, %v1757_v45  ;;  %v2457_v53 = vpop.permute.xlu1 %2456 }
 0x62a   :  { %v2103_v61 = vpop.f32.mrf.mxu1  ;;  %4437 = vmatprep.mubr.msk.bf16.mxu0 %vm118_vm0, %v5079_v13  ;;  %v1776_v50 = vmul.f32 %v4928_v36, %v1768_v35  ;;  %v2112_v23 = vadd.f32 %v4415_v48, %v5741_v49 }
 0x62b   :  { %v2104_v56 = vadd.f32 %v5741_v49, %v2103_v61  ;;  %v1774_v16 = vmul.f32 %v4929_v3, %v1766_v14  ;;  %v2452_v22 = vpop.permute.xlu0 %2451 }
 0x62c   :  { %v4416_v7 = vpop.f32.mrf.mxu1  ;;  %v5834_v52 = vadd.f32 %v1776_v50, %v1760_v63 }
 0x62d   :  { %v5836_v62 = vadd.f32 %v1774_v16, %v1758_v5  ;;  %v2115_v59 = vadd.f32 %v4416_v7, %v5741_v49 }
 0x62e   :  { %v2106_v0 = vpop.f32.mrf.mxu1 }
 0x62f   :  { %v2107_v55 = vadd.f32 %v5741_v49, %v2106_v0  ;;  %v2348_v61 = vpack.c.bf16 %v2115_v59, %v2112_v23 }
 0x630   :  { %v4447_v45 = vpop.f32.mrf.mxu1 }
 0x631   :  { %v2347_v18 = vpack.c.bf16 %v2107_v55, %v2104_v56  ;;  %4438 = vmatmul.mubr.msk.bf16.gmra.mxu0 %vm118_vm0, %v5109_v20  ;;  %v2528_v47 = vadd.f32 %v4447_v45, %v2462_v40  ;;  %v3893_v55 = vld [vmem:[%s6381_s6 + $0x3] ss:$0 sm:$0xff] }
 0x632   :  { %v2519_v44 = vpop.f32.mrf.mxu1  ;;  %4453 = vmatprep.mubr.msk.bf16.mxu0 %vm118_vm0, %v5618_v19 }
 0x633   :  { %v2520_v63 = vadd.f32 %v2519_v44, %v2452_v22 }
 0x634   :  { %v4448_v60 = vpop.f32.mrf.mxu1 }
 0x635   :  { %v2531_v24 = vadd.f32 %v4448_v60, %v2467_v4 }
 0x636   :  { %v2522_v37 = vpop.f32.mrf.mxu1 }
 0x637   :  { %v2661_v35 = vpack.c.bf16 %v2531_v24, %v2528_v47  ;;  %v2523_v5 = vadd.f32 %v2522_v37, %v2457_v53 }
 0x639   :  { %v2660_v14 = vpack.c.bf16 %v2523_v5, %v2520_v63  ;;  %4469 = vmatprep.subr.bf16.mxu1 %v2661_v35 }
 0x63a   :  { %4470 = vmatpush3.bf16.msra.mxu1 %v2661_v35 }
 0x63b   :  { %4471 = vmatprep.subr.bf16.mxu1 %v2660_v14 }
 0x63e   :  { %4472 = vmatpush3.bf16.msra.mxu1 %v2660_v14 }
 0x63f   :  { %4505 = vmatprep.subr.bf16.mxu1 %v2348_v61 }
 0x6d9   :  { %v5845_v19 = vpop.f32.mrf.mxu0 }
 0x6db   :  { %v5847_v36 = vpop.f32.mrf.mxu0 }
 0x6dd   :  { %v5849_v50 = vpop.f32.mrf.mxu0 }
 0x6df   :  { %v5851_v48 = vpop.f32.mrf.mxu0 }
 0x6e1   :  { %v5853_v56 = vpop.f32.mrf.mxu0 }
 0x6e3   :  { %v5855_v49 = vpop.f32.mrf.mxu0 }
 0x6e5   :  { %v5857_v3 = vpop.f32.mrf.mxu0 }
 0x6e7   :  { %v5859_v16 = vpop.f32.mrf.mxu0 }
 0x6e9   :  { %v4435_v7 = vpop.f32.mrf.mxu0 }
 0x6ea   :  { %v2417_v53 = vadd.f32 %v4435_v7, %v3893_v55 }
 0x6eb   :  { %v2408_v0 = vpop.f32.mrf.mxu0 }
 0x6ec   :  { %v2409_v44 = vadd.f32 %v3893_v55, %v2408_v0 }
 0x6ed   :  { %v4436_v4 = vpop.f32.mrf.mxu0 }
 0x6ee   :  { %v2420_v40 = vadd.f32 %v4436_v4, %v3893_v55 }
 0x6ef   :  { %v2411_v45 = vpop.f32.mrf.mxu0 }
 0x6f0   :  { %v2412_v60 = vadd.f32 %v3893_v55, %v2411_v45  ;;  %v2657_v22 = vpack.c.bf16 %v2420_v40, %v2417_v53  ;;  %v4602_v40 = vld [vmem:[%s6377_s9 + $0x38] sm:$0xff]  }
 0x6f1   :  { %v4439_v47 = vpop.f32.mrf.mxu0  ;;  %4449 = vmatprep.subr.bf16.mxu0 %v4602_v40 }
 0x6f2   :  { %v2656_v24 = vpack.c.bf16 %v2412_v60, %v2409_v44  ;;  %v2433_v59 = vadd.f32 %v4439_v47, %v3893_v55  ;;  %4450 = vmatpush3.bf16.msra.mxu0 %v4602_v40 }
 0x6f3   :  { %v2424_v23 = vpop.f32.mrf.mxu0 }
 0x6f4   :  { %4473 = vmatprep.mubr.msk.bf16.mxu1 %vm118_vm0, %v2656_v24  ;;  %v2425_v5 = vadd.f32 %v3893_v55, %v2424_v23  ;;  %v4006_v24 = vld [vmem:[%s6383_s3 + $0x38] sm:$0xff]  }
 0x6f5   :  { %v4440_v37 = vpop.f32.mrf.mxu0  ;;  %4474 = vmatmul.mubr.msk.bf16.vlgmr.msra.gmra.mxu1 %vm118_vm0, %v2657_v22 }
 0x6f6   :  { %4506 = vmatpush3.bf16.msra.mxu1 %v2348_v61  ;;  %v2436_v63 = vadd.f32 %v4440_v37, %v3893_v55 }
 0x6f7   :  { %4507 = vmatprep.subr.bf16.mxu1 %v2347_v18  ;;  %v2427_v35 = vpop.f32.mrf.mxu0 }
 0x6f8   :  { %v2428_v14 = vadd.f32 %v3893_v55, %v2427_v35  ;;  %v2659_v0 = vpack.c.bf16 %v2436_v63, %v2433_v59  ;;  %v4603_v63 = vld [vmem:[%s6377_s9 + $0x30] sm:$0xff]  }
 0x6f9   :  { %4451 = vmatprep.subr.bf16.mxu0 %v4603_v63 }
 0x6fa   :  { %v2658_v4 = vpack.c.bf16 %v2428_v14, %v2425_v5  ;;  %4508 = vmatpush3.bf16.msra.mxu1 %v2347_v18  ;;  %v3998_v5 = vunpack.c.l.bf16 %v4006_v24  ;;  %4452 = vmatpush3.bf16.msra.mxu0 %v4603_v63 }
 0x6fb   :  { %4509 = vmatprep.subr.bf16.mxu1 %v5811_v57 }
 0x6fc   :  { %4477 = vmatprep.mubr.msk.bf16.mxu1 %vm118_vm0, %v2658_v4  ;;  %v4005_v4 = vld [vmem:[%s6383_s3 + $0x30] sm:$0xff]  }
 0x6fd   :  { %4478 = vmatmul.mubr.msk.bf16.gmra.mxu1 %vm118_vm0, %v2659_v0  ;;  %4454 = vmatmul.mubr.msk.bf16.vlgmr.msra.gmra.mxu0 %vm118_vm0, %v5626_v39  ;;  %v2204_v39 = vmul.f32 0.17677669, %v5849_v50 }
 0x6fe   :  { %4510 = vmatpush3.bf16.msra.mxu1 %v5811_v57  ;;  %v5884_v57 = vld [vmem:[%s6383_s3 + $0x28] sm:$0xff]   ;;  %4457 = vmatprep.mubr.msk.bf16.mxu0 %vm118_vm0, %v5633_v26  ;;  %v2205_v26 = vmul.f32 0.17677669, %v5855_v49  ;;  %v2208_v49 = vmul.f32 0.17677669, %v5857_v3 }
 0x6ff   :  { %4511 = vmatprep.subr.bf16.mxu1 %v5819_v33  ;;  %v3990_v18 = vunpack.c.l.bf16 %v5884_v57  ;;  %v3991_v37 = vunpack.c.h.bf16 %v5884_v57 }
 0x701   :  { %v5944_v50 = vadd.f32 %v3991_v37, %v2204_v39 }
 0x702   :  { %4512 = vmatpush3.bf16.msra.mxu1 %v5819_v33 }
 0x703   :  { %4513 = vmatprep.subr.bf16.mxu1 %v5783_v15 }
 0x705   :  { %4458 = vmatmul.mubr.msk.bf16.gmra.mxu0 %vm118_vm0, %v5641_v21 }
 0x706   :  { %4514 = vmatpush3.bf16.msra.mxu1 %v5783_v15  ;;  %4461 = vmatprep.mubr.msk.bf16.mxu0 %vm118_vm0, %v5648_v28 }
 0x707   :  { %4515 = vmatprep.subr.bf16.mxu1 %v5790_v11 }
 0x70a   :  { %4516 = vmatpush3.bf16.msra.mxu1 %v5790_v11 }
 0x70b   :  { %4517 = vmatprep.subr.bf16.mxu1 %v5755_v41 }
 0x70d   :  { %4462 = vmatmul.mubr.msk.bf16.gmra.mxu0 %vm118_vm0, %v5655_v51 }
 0x70e   :  { %4518 = vmatpush3.bf16.msra.mxu1 %v5755_v41  ;;  %v4003_v41 = vld [vmem:[%s6383_s3 + $0x20] sm:$0xff]   ;;  %4465 = vmatprep.mubr.msk.bf16.mxu0 %vm118_vm0, %v5662_v17 }
 0x70f   :  { %4519 = vmatprep.subr.bf16.mxu1 %v5762_v9  ;;  %v3987_v53 = vunpack.c.h.bf16 %v4003_v41 }
 0x712   :  { %4520 = vmatpush3.bf16.msra.mxu1 %v5762_v9 }
 0x713   :  { %4541 = vmatprep.subr.bf16.mxu1 %v5541_v38  ;;  %v3986_v38 = vunpack.c.l.bf16 %v4003_v41 }
 0x715   :  { %4466 = vmatmul.mubr.msk.bf16.gmra.mxu0 %vm118_vm0, %v5672_v30 }
 0x7b5   :  { %v4475_v15 = vpop.f32.mrf.mxu1 }
 0x7b6   :  { %v2741_v33 = vmul.f32 0.17677669, %v4475_v15 }
 0x7b7   :  { %v2708_v11 = vpop.f32.mrf.mxu1 }
 0x7b8   :  { %v2739_v61 = vmul.f32 0.17677669, %v2708_v11  ;;  %v5890_v7 = vadd.f32 %v3990_v18, %v2741_v33  ;;  %v3999_v33 = vunpack.c.h.bf16 %v4006_v24  ;;  %v2203_v24 = vmul.f32 0.17677669, %v5845_v19 }
 0x7b9   :  { %v4476_v9 = vpop.f32.mrf.mxu1  ;;  %v2206_v19 = vmul.f32 0.17677669, %v5859_v16 }
 0x7ba   :  { %2759 = vmax.xlane.f32.xlu0 %v5890_v7  ;;  %v2742_v45 = vmul.f32 0.17677669, %v4476_v9  ;;  %v5896_v60 = vadd.f32 %v3986_v38, %v2739_v61  ;;  %v3994_v9 = vunpack.c.l.bf16 %v4005_v4 }
 0x7bb   :  { %v2711_v55 = vpop.f32.mrf.mxu1 }
 0x7bc   :  { %v2740_v44 = vmul.f32 0.17677669, %v2711_v55  ;;  %v5909_v35 = vadd.f32 %v3991_v37, %v2742_v45  ;;  %v2201_v55 = vmul.f32 0.17677669, %v5847_v36  ;;  %v3995_v45 = vunpack.c.h.bf16 %v4005_v4 }
 0x7bd   :  { %v4479_v47 = vpop.f32.mrf.mxu1  ;;  %v5948_v21 = vadd.f32 %v3994_v9, %v2205_v26 }
 0x7be   :  { %v2745_v22 = vmul.f32 0.17677669, %v4479_v47  ;;  %2755 = vmax.xlane.f32.xlu0 %v5896_v60  ;;  %v5902_v23 = vadd.f32 %v3987_v53, %v2740_v44  ;;  %v2202_v44 = vmul.f32 0.17677669, %v5851_v48  ;;  %v5938_v48 = vadd.f32 %v3990_v18, %v2203_v24 }
 0x7bf   :  { %v2724_v59 = vpop.f32.mrf.mxu1  ;;  %v5952_v18 = vadd.f32 %v3995_v45, %v2206_v19 }
 0x7c0   :  { %2757 = vmax.xlane.f32.xlu1 %v5902_v23  ;;  %v2743_v0 = vmul.f32 0.17677669, %v2724_v59  ;;  %v5915_v57 = vadd.f32 %v3998_v5, %v2745_v22  ;;  %v2209_v22 = vadd.f32 %v3986_v38, %v2201_v55  ;;  %v5932_v36 = vadd.f32 %v3987_v53, %v2202_v44 }
 0x7c1   :  { %v4480_v14 = vpop.f32.mrf.mxu1  ;;  %v2207_v38 = vmul.f32 0.17677669, %v5853_v56  ;;  %v5962_v56 = vadd.f32 %v3999_v33, %v2208_v49 }
 0x7c2   :  { %v2746_v15 = vmul.f32 0.17677669, %v4480_v14  ;;  %2761 = vmax.xlane.f32.xlu0 %v5909_v35  ;;  %v2751_v40 = vadd.f32 %v3994_v9, %v2743_v0 }
 0x7c3   :  { %v2727_v11 = vpop.f32.mrf.mxu1  ;;  %v5957_v28 = vadd.f32 %v3998_v5, %v2207_v38 }
 0x7c4   :  { %v2744_v41 = vmul.f32 0.17677669, %v2727_v11  ;;  %2767 = vmax.xlane.f32.xlu1 %v5915_v57  ;;  %v5918_v61 = vadd.f32 %v3999_v33, %v2746_v15 }
 0x7c6   :  { %2769 = vmax.xlane.f32.xlu0 %v5918_v61  ;;  %v5927_v47 = vadd.f32 %v3995_v45, %v2744_v41 }
 0x7c8   :  { %2763 = vmax.xlane.f32.xlu1 %v2751_v40 }
 0x7ca   :  { %2765 = vmax.xlane.f32.xlu0 %v5927_v47 }
 0x7cc   :  { %2217 = vmax.xlane.f32.xlu1 %v2209_v22 }
 0x7ce   :  { %2219 = vmax.xlane.f32.xlu0 %v5932_v36 }
 0x7d0   :  { %2221 = vmax.xlane.f32.xlu1 %v5938_v48 }
 0x7d2   :  { %2223 = vmax.xlane.f32.xlu0 %v5944_v50 }
 0x7d4   :  { %2225 = vmax.xlane.f32.xlu1 %v5948_v21 }
 0x7d6   :  { %2227 = vmax.xlane.f32.xlu0 %v5952_v18 }
 0x7d8   :  { %2229 = vmax.xlane.f32.xlu1 %v5957_v28 }
 0x7da   :  { %2231 = vmax.xlane.f32.xlu0 %v5962_v56 }
 0x843   :  { %v2760_v3 = vpop.xlane.xlu0 %2759 }
 0x844   :  { %v2773_v16 = vsub.f32 %v5890_v7, %v2760_v3 }
 0x846   :  { %v2783_v51 = vmul.f32 1.442695, %v2773_v16 }
 0x847   :  { %v2756_v53 = vpop.xlane.xlu0 %2755 }
 0x848   :  { %4724 = vpow2.f32 %v2783_v51  ;;  %v2771_v37 = vsub.f32 %v5896_v60, %v2756_v53 }
 0x849   :  { %v2758_v59 = vpop.xlane.xlu1 %2757 }
 0x84a   :  { %v2779_v63 = vmul.f32 1.442695, %v2771_v37  ;;  %v2772_v5 = vsub.f32 %v5902_v23, %v2758_v59 }
 0x84b   :  { %v2762_v17 = vpop.xlane.xlu0 %2761 }
 0x84c   :  { %4726 = vpow2.f32 %v2779_v63  ;;  %v2774_v14 = vsub.f32 %v5909_v35, %v2762_v17  ;;  %v2781_v33 = vmul.f32 1.442695, %v2772_v5 }
 0x84d   :  { %v2768_v4 = vpop.xlane.xlu1 %2767 }
 0x84e   :  { %v2785_v0 = vmul.f32 1.442695, %v2774_v14  ;;  %v2777_v30 = vsub.f32 %v5915_v57, %v2768_v4 }
 0x84f   :  { %v2770_v15 = vpop.xlane.xlu0 %2769 }
 0x850   :  { %4728 = vpow2.f32 %v2785_v0  ;;  %v2791_v7 = vmul.f32 1.442695, %v2777_v30  ;;  %v2778_v11 = vsub.f32 %v5918_v61, %v2770_v15 }
 0x851   :  { %v2764_v41 = vpop.xlane.xlu1 %2763 }
 0x852   :  { %4730 = vpow2.f32 %v2791_v7  ;;  %v2775_v60 = vsub.f32 %v2751_v40, %v2764_v41  ;;  %v2793_v55 = vmul.f32 1.442695, %v2778_v11 }
 0x853   :  { %v2766_v9 = vpop.xlane.xlu0 %2765  ;;  %4732 = vpow2.f32 %v2781_v33 }
 0x854   :  { %v2787_v45 = vmul.f32 1.442695, %v2775_v60  ;;  %v2776_v23 = vsub.f32 %v5927_v47, %v2766_v9 }
 0x855   :  { %v5974_v35 = vpop.eup %4724  ;;  %v2218_v44 = vpop.xlane.xlu1 %2217 }
 0x856   :  { %4734 = vpow2.f32 %v2787_v45  ;;  %v2233_v57 = vsub.f32 %v2209_v22, %v2218_v44  ;;  %2799 = vadd.xlane.f32.xlu1 %v5974_v35  ;;  %v2789_v39 = vmul.f32 1.442695, %v2776_v23  ;;  %v4455_v45 = vpop.f32.mrf.mxu0 }
 0x857   :  { %v2220_v24 = vpop.xlane.xlu0 %2219  ;;  %4736 = vpow2.f32 %v2793_v55 }
 0x858   :  { %v2241_v61 = vmul.f32 1.442695, %v2233_v57  ;;  %v2234_v26 = vsub.f32 %v5932_v36, %v2220_v24  ;;  %v2593_v23 = vpop.f32.mrf.mxu0 }
 0x859   :  { %v5978_v40 = vpop.eup %4726  ;;  %v2222_v19 = vpop.xlane.xlu1 %2221 }
 0x85a   :  { %4738 = vpow2.f32 %v2241_v61  ;;  %v2235_v38 = vsub.f32 %v5938_v48, %v2222_v19  ;;  %2795 = vadd.xlane.f32.xlu1 %v5978_v40  ;;  %v2243_v49 = vmul.f32 1.442695, %v2234_v26  ;;  %v4456_v44 = vpop.f32.mrf.mxu0 }
 0x85b   :  { %v2224_v47 = vpop.xlane.xlu0 %2223  ;;  %4740 = vpow2.f32 %v2789_v39 }
 0x85c   :  { %v2245_v22 = vmul.f32 1.442695, %v2235_v38  ;;  %v2236_v3 = vsub.f32 %v5944_v50, %v2224_v47  ;;  %v2596_v57 = vpop.f32.mrf.mxu0 }
 0x85d   :  { %v5983_v16 = vpop.eup %4728  ;;  %v2226_v51 = vpop.xlane.xlu1 %2225 }
 0x85e   :  { %4742 = vpow2.f32 %v2245_v22  ;;  %v2237_v36 = vsub.f32 %v5948_v21, %v2226_v51  ;;  %2801 = vadd.xlane.f32.xlu0 %v5983_v16  ;;  %v2247_v48 = vmul.f32 1.442695, %v2236_v3  ;;  %v4459_v24 = vpop.f32.mrf.mxu0  ;;  %v3917_v22 = vld [vmem:[%s6382_s10 + $0x3] ss:$0 sm:$0xff] }
 0x85f   :  { %v5987_v53 = vpop.eup %4730  ;;  %v2228_v37 = vpop.xlane.xlu0 %2227  ;;  %4744 = vpow2.f32 %v2243_v49  ;;  %v2618_v43 = vadd.f32 %v4459_v24, %v3917_v22 }
 0x860   :  { %v2249_v59 = vmul.f32 1.442695, %v2237_v36  ;;  %v2238_v63 = vsub.f32 %v5952_v18, %v2228_v37  ;;  %2807 = vadd.xlane.f32.xlu1 %v5987_v53  ;;  %v5991_v17 = vpop.eup %4732  ;;  %v2609_v39 = vpop.f32.mrf.mxu0 }
 0x861   :  { %v2230_v50 = vpop.xlane.xlu1 %2229 }
 0x862   :  { %4746 = vpow2.f32 %v2249_v59  ;;  %v2239_v5 = vsub.f32 %v5957_v28, %v2230_v50  ;;  %2797 = vadd.xlane.f32.xlu0 %v5991_v17  ;;  %v2251_v4 = vmul.f32 1.442695, %v2238_v63  ;;  %v4460_v61 = vpop.f32.mrf.mxu0 }
 0x863   :  { %v5995_v21 = vpop.eup %4734  ;;  %v2232_v14 = vpop.xlane.xlu0 %2231  ;;  %4748 = vpow2.f32 %v2247_v48  ;;  %v2621_v31 = vadd.f32 %v4460_v61, %v3917_v22 }
 0x864   :  { %v2253_v0 = vmul.f32 1.442695, %v2239_v5  ;;  %v2240_v30 = vsub.f32 %v5962_v56, %v2232_v14  ;;  %2803 = vadd.xlane.f32.xlu1 %v5995_v21  ;;  %v5999_v18 = vpop.eup %4736  ;;  %v2612_v26 = vpop.f32.mrf.mxu0 }
 0x866   :  { %4750 = vpow2.f32 %v2253_v0  ;;  %2809 = vadd.xlane.f32.xlu0 %v5999_v18  ;;  %v2255_v28 = vmul.f32 1.442695, %v2240_v30  ;;  %v4463_v19 = vpop.f32.mrf.mxu0 }
 0x867   :  { %v6002_v15 = vpop.eup %4738  ;;  %4752 = vpow2.f32 %v2251_v4  ;;  %v2634_v50 = vadd.f32 %v4463_v19, %v3917_v22  ;;  %v2602_v19 = vadd.f32 %v4455_v45, %v3917_v22 }
 0x868   :  { %2257 = vadd.xlane.f32.xlu1 %v6002_v15  ;;  %v6005_v33 = vpop.eup %4740  ;;  %4754 = vpow2.f32 %v2255_v28  ;;  %v2625_v38 = vpop.f32.mrf.mxu0 }
 0x869   :  { %v2626_v30 = vadd.f32 %v3917_v22, %v2625_v38  ;;  %v2594_v38 = vadd.f32 %v3917_v22, %v2593_v23  ;;  %v6035_v23 = vld [vmem:[%s6384_s4 + $0x50] sm:$0xff] }
 0x86a   :  { %2805 = vadd.xlane.f32.xlu0 %v6005_v33  ;;  %v4464_v47 = vpop.f32.mrf.mxu0 }
 0x86b   :  { %v6008_v7 = vpop.eup %4742  ;;  %v2637_v5 = vadd.f32 %v4464_v47, %v3917_v22  ;;  %v2605_v47 = vadd.f32 %v4456_v44, %v3917_v22 }
 0x86c   :  { %2261 = vadd.xlane.f32.xlu1 %v6008_v7  ;;  %v6011_v56 = vpop.eup %4744  ;;  %v2628_v49 = vpop.f32.mrf.mxu0 }
 0x86d   :  { %v2884_v28 = vpack.c.bf16 %v2637_v5, %v2634_v50  ;;  %v2629_v1 = vadd.f32 %v3917_v22, %v2628_v49  ;;  %v2597_v49 = vadd.f32 %v3917_v22, %v2596_v57  ;;  %v3839_v5 = vld [vmem:[%s6384_s4 + $0x58] sm:$0xff] }
 0x86e   :  { %2259 = vadd.xlane.f32.xlu0 %v6011_v56  ;;  %v4467_v3 = vpop.f32.mrf.mxu0 }
 0x86f   :  { %v6014_v11 = vpop.eup %4746  ;;  %v2650_v36 = vadd.f32 %v4467_v3, %v3917_v22  ;;  %v2883_v42 = vpack.c.bf16 %v2629_v1, %v2626_v30  ;;  %v2610_v3 = vadd.f32 %v3917_v22, %v2609_v39  ;;  %v2879_v24 = vpack.c.bf16 %v2597_v49, %v2594_v38  ;;  %v3843_v38 = vld [vmem:[%s6384_s4 + $0x78] sm:$0xff] }
 0x870   :  { %2265 = vadd.xlane.f32.xlu1 %v6014_v11  ;;  %v6017_v41 = vpop.eup %4748  ;;  %v2641_v51 = vpop.f32.mrf.mxu0 }
 0x871   :  { %v2642_v48 = vadd.f32 %v3917_v22, %v2641_v51  ;;  %v2882_v51 = vpack.c.bf16 %v2621_v31, %v2618_v43 }
 0x872   :  { %2263 = vadd.xlane.f32.xlu0 %v6017_v41  ;;  %v4468_v37 = vpop.f32.mrf.mxu0 }
 0x873   :  { %v6020_v60 = vpop.eup %4750  ;;  %v2653_v59 = vadd.f32 %v4468_v37, %v3917_v22  ;;  %v2613_v37 = vadd.f32 %v3917_v22, %v2612_v26  ;;  %v3836_v26 = vld [vmem:[%s6384_s4 + $0x40] sm:$0xff] }
 0x874   :  { %2269 = vadd.xlane.f32.xlu1 %v6020_v60  ;;  %v6023_v9 = vpop.eup %4752  ;;  %v2644_v63 = vpop.f32.mrf.mxu0 }
 0x875   :  { %v6026_v55 = vpop.eup %4754  ;;  %v2886_v14 = vpack.c.bf16 %v2653_v59, %v2650_v36  ;;  %v2645_v4 = vadd.f32 %v3917_v22, %v2644_v63  ;;  %v2881_v36 = vpack.c.bf16 %v2613_v37, %v2610_v3 }
 0x876   :  { %2267 = vadd.xlane.f32.xlu0 %v6023_v9 }
 0x877   :  { %v2885_v0 = vpack.c.bf16 %v2645_v4, %v2642_v48  ;;  %4481 = vmatprep.subr.bf16.mxu0 %v2886_v14  ;;  %v2880_v48 = vpack.c.bf16 %v2605_v47, %v2602_v19 }
 0x878   :  { %4482 = vmatpush3.bf16.msra.mxu0 %v2886_v14 }
 0x879   :  { %4483 = vmatprep.subr.bf16.mxu0 %v2885_v0 }
 0x87a   :  { %2271 = vadd.xlane.f32.xlu0 %v6026_v55 }
 0x87c   :  { %4484 = vmatpush3.bf16.msra.mxu0 %v2885_v0 }
 0x87d   :  { %4485 = vmatprep.subr.bf16.mxu0 %v2884_v28 }
 0x880   :  { %4486 = vmatpush3.bf16.msra.mxu0 %v2884_v28  ;;  %v3837_v28 = vld [vmem:[%s6384_s4 + $0x48] sm:$0xff] }
 0x881   :  { %4487 = vmatprep.subr.bf16.mxu0 %v2883_v42 }
 0x884   :  { %4488 = vmatpush3.bf16.msra.mxu0 %v2883_v42 }
 0x885   :  { %4489 = vmatprep.subr.bf16.mxu0 %v2882_v51 }
 0x888   :  { %4490 = vmatpush3.bf16.msra.mxu0 %v2882_v51 }
 0x889   :  { %4491 = vmatprep.subr.bf16.mxu0 %v2881_v36 }
 0x88c   :  { %4492 = vmatpush3.bf16.msra.mxu0 %v2881_v36  ;;  %v3842_v36 = vld [vmem:[%s6384_s4 + $0x70] sm:$0xff] }
 0x88d   :  { %4493 = vmatprep.subr.bf16.mxu0 %v2880_v48 }
 0x890   :  { %4494 = vmatpush3.bf16.msra.mxu0 %v2880_v48 }
 0x891   :  { %4495 = vmatprep.subr.bf16.mxu0 %v2879_v24 }
 0x894   :  { %4496 = vmatpush3.bf16.msra.mxu0 %v2879_v24 }
 0x8df   :  { %v2800_v1 = vpop.xlane.xlu1 %2799 }
 0x8e0   :  { %4756 = vrcp.f32 %v2800_v1 }
 0x8e3   :  { %v2796_v43 = vpop.xlane.xlu1 %2795 }
 0x8e4   :  { %4758 = vrcp.f32 %v2796_v43 }
 0x8e7   :  { %v2802_v42 = vpop.xlane.xlu0 %2801 }
 0x8e8   :  { %4760 = vrcp.f32 %v2802_v42 }
 0x8e9   :  { %v2808_v31 = vpop.xlane.xlu1 %2807 }
 0x8eb   :  { %v2798_v45 = vpop.xlane.xlu0 %2797 }
 0x8ec   :  { %4762 = vrcp.f32 %v2798_v45  ;;  %v3841_v45 = vld [vmem:[%s6384_s4 + $0x68] sm:$0xff] }
 0x8ed   :  { %v4757_v44 = vpop.eup %4756  ;;  %v2804_v57 = vpop.xlane.xlu1 %2803  ;;  %4764 = vrcp.f32 %v2808_v31  ;;  %v3840_v31 = vld [vmem:[%s6384_s4 + $0x60] sm:$0xff] }
 0x8ee   :  { %v2821_v39 = vmul.f32 %v4757_v44, %v6035_v23 }
 0x8ef   :  { %v2810_v61 = vpop.xlane.xlu0 %2809 }
 0x8f0   :  { %4766 = vrcp.f32 %v2810_v61  ;;  %2839 = vperm.xlu1 %4563, %v2821_v39  }
 0x8f1   :  { %v4759_v22 = vpop.eup %4758  ;;  %v2258_v59 = vpop.xlane.xlu1 %2257  ;;  %4768 = vrcp.f32 %v2804_v57 }
 0x8f2   :  { %v2819_v63 = vmul.f32 %v4759_v22, %v3836_v26 }
 0x8f3   :  { %v2806_v50 = vpop.xlane.xlu0 %2805 }
 0x8f4   :  { %4770 = vrcp.f32 %v2806_v50  ;;  %2829 = vperm.xlu1 %4563, %v2819_v63  }
 0x8f5   :  { %v4761_v14 = vpop.eup %4760  ;;  %v2262_v4 = vpop.xlane.xlu1 %2261  ;;  %4772 = vrcp.f32 %v2258_v59  ;;  %v4604_v59 = vld [vmem:[%s6385_s11 + $0x18] sm:$0xff]  }
 0x8f6   :  { %v2822_v0 = vmul.f32 %v4761_v14, %v3839_v5  ;;  %4529 = vmatprep.subr.bf16.mxu0 %v4604_v59 }
 0x8f7   :  { %v2260_v30 = vpop.xlane.xlu0 %2259 }
 0x8f8   :  { %4774 = vrcp.f32 %v2260_v30  ;;  %2844 = vperm.xlu1 %4563, %v2822_v0  }
 0x8f9   :  { %v4763_v3 = vpop.eup %4762  ;;  %v2266_v51 = vpop.xlane.xlu1 %2265  ;;  %4776 = vrcp.f32 %v2262_v4 }
 0x8fa   :  { %v2820_v37 = vmul.f32 %v4763_v3, %v3837_v28  ;;  %v4765_v19 = vpop.eup %4764 }
 0x8fb   :  { %v2264_v47 = vpop.xlane.xlu0 %2263  ;;  %v2825_v49 = vmul.f32 %v4765_v19, %v3842_v36 }
 0x8fc   :  { %4778 = vrcp.f32 %v2264_v47  ;;  %2834 = vperm.xlu0 %4562, %v2820_v37  }
 0x8fd   :  { %v4767_v48 = vpop.eup %4766  ;;  %4780 = vrcp.f32 %v2266_v51  ;;  %v2270_v43 = vpop.xlane.xlu1 %2269 }
 0x8fe   :  { %v2826_v24 = vmul.f32 %v4767_v48, %v3843_v38  ;;  %v4769_v1 = vpop.eup %4768 }
 0x8ff   :  { %v2268_v42 = vpop.xlane.xlu0 %2267  ;;  %v2823_v57 = vmul.f32 %v4769_v1, %v3840_v31 }
 0x900   :  { %4782 = vrcp.f32 %v2268_v42  ;;  %2859 = vperm.xlu0 %4562, %v2825_v49   ;;  %2864 = vperm.xlu1 %4563, %v2826_v24  }
 0x901   :  { %v4771_v44 = vpop.eup %4770  ;;  %4784 = vrcp.f32 %v2270_v43 }
 0x902   :  { %v2824_v39 = vmul.f32 %v4771_v44, %v3841_v45  ;;  %v4773_v61 = vpop.eup %4772 }
 0x903   :  { %v2272_v22 = vpop.xlane.xlu0 %2271  ;;  %v2281_v50 = vmul.f32 %v4773_v61, %v3836_v26 }
 0x904   :  { %4786 = vrcp.f32 %v2272_v22  ;;  %2849 = vperm.xlu0 %4562, %v2823_v57   ;;  %2854 = vperm.xlu1 %4563, %v2824_v39  }
 0x905   :  { %v4775_v63 = vpop.eup %4774 }
 0x906   :  { %v2282_v14 = vmul.f32 %v4775_v63, %v3837_v28  ;;  %v4777_v4 = vpop.eup %4776 }
 0x907   :  { %v2283_v30 = vmul.f32 %v4777_v4, %v6035_v23 }
 0x908   :  { %2291 = vperm.xlu0 %4562, %v2281_v50   ;;  %2296 = vperm.xlu1 %4563, %v2282_v14  }
 0x909   :  { %v4779_v0 = vpop.eup %4778 }
 0x90a   :  { %v2284_v3 = vmul.f32 %v4779_v0, %v3839_v5  ;;  %v4781_v51 = vpop.eup %4780 }
 0x90b   :  { %v2285_v19 = vmul.f32 %v4781_v51, %v3840_v31 }
 0x90c   :  { %2301 = vperm.xlu0 %4562, %v2283_v30   ;;  %2306 = vperm.xlu1 %4563, %v2284_v3  }
 0x90d   :  { %v4783_v37 = vpop.eup %4782 }
 0x90e   :  { %v2286_v47 = vmul.f32 %v4783_v37, %v3841_v45  ;;  %v4785_v48 = vpop.eup %4784 }
 0x90f   :  { %v2287_v26 = vmul.f32 %v4785_v48, %v3842_v36  ;;  %v4605_v36 = vld [vmem:[%s6385_s11 + $0x10] sm:$0xff]  }
 0x910   :  { %2311 = vperm.xlu0 %4562, %v2285_v19   ;;  %2316 = vperm.xlu1 %4563, %v2286_v47   ;;  %v6091_v19 = vld [vmem:[%s6389_s16 + $0x4] ss:$8 sps:$4 sm:$0xff]  }
 0x911   :  { %v4787_v49 = vpop.eup %4786 }
 0x912   :  { %v2288_v28 = vmul.f32 %v4787_v49, %v3843_v38 }
 0x914   :  { %2321 = vperm.xlu0 %4562, %v2287_v26   ;;  %2326 = vperm.xlu1 %4563, %v2288_v28   ;;  %v6413_v28 = vmov 0  }
 0x96b   :  { %v2840_v24 = vpop.permute.xlu1 %2839 }
 0x96c   :  { %v2869_v31 = vmul.f32 %v5974_v35, %v2840_v24  ;;  %v4608_v35 = vld [vmem:[%s6389_s16 + $0x14] ss:$8 sps:$4 sm:$0xff]   ;;  %v3292_v24 = vpack.c.bf16 %v5805_v10, %v5788_v32 }
 0x96f   :  { %v2830_v1 = vpop.permute.xlu1 %2829 }
 0x970   :  { %v2867_v42 = vmul.f32 %v5978_v40, %v2830_v1 }
 0x973   :  { %v2845_v43 = vpop.permute.xlu1 %2844 }
 0x974   :  { %v2870_v23 = vmul.f32 %v5983_v16, %v2845_v43 }
 0x976   :  { %v2876_v57 = vpack.c.bf16 %v2870_v23, %v2869_v31 }
 0x977   :  { %v2835_v5 = vpop.permute.xlu0 %2834 }
 0x978   :  { %v2868_v44 = vmul.f32 %v5991_v17, %v2835_v5 }
 0x97a   :  { %v2875_v45 = vpack.c.bf16 %v2868_v44, %v2867_v42 }
 0x97b   :  { %v2865_v39 = vpop.permute.xlu1 %2864  ;;  %v2860_v61 = vpop.permute.xlu0 %2859 }
 0x97c   :  { %4497 = vmatprep.mubr.bf16.mxu0 %v2875_v45  ;;  %v2874_v16 = vmul.f32 %v5999_v18, %v2865_v39  ;;  %v2873_v38 = vmul.f32 %v5987_v53, %v2860_v61 }
 0x97d   :  { %4498 = vmatmul.mubr.bf16.vlgmr.msra.gmra.mxu0 %v2876_v57 }
 0x97e   :  { %4530 = vmatpush3.bf16.msra.mxu0 %v4604_v59  ;;  %v2878_v14 = vpack.c.bf16 %v2874_v16, %v2873_v38 }
 0x97f   :  { %v2855_v40 = vpop.permute.xlu1 %2854  ;;  %v2850_v22 = vpop.permute.xlu0 %2849  ;;  %4531 = vmatprep.subr.bf16.mxu0 %v4605_v36 }
 0x980   :  { %v2872_v17 = vmul.f32 %v6005_v33, %v2855_v40  ;;  %v2871_v63 = vmul.f32 %v5995_v21, %v2850_v22  ;;  %v3937_v40 = vld [vmem:[%s6387_s12 + $0x1] ss:$0 sm:$0xff] }
 0x982   :  { %v2877_v50 = vpack.c.bf16 %v2872_v17, %v2871_v63  ;;  %4532 = vmatpush3.bf16.msra.mxu0 %v4605_v36 }
 0x983   :  { %v2297_v4 = vpop.permute.xlu1 %2296  ;;  %v2292_v59 = vpop.permute.xlu0 %2291  ;;  %3356 = vmatprep.subr.bf16.mxu0 %v4608_v35 }
 0x984   :  { %v2330_v18 = vmul.f32 %v6011_v56, %v2297_v4  ;;  %v2329_v53 = vmul.f32 %v6002_v15, %v2292_v59  ;;  %4501 = vmatprep.mubr.bf16.mxu0 %v2877_v50  ;;  %v6086_v56 = vld [vmem:[%s6389_s16 + $0x10] ss:$8 sps:$4 sm:$0xff]  }
 0x985   :  { %4502 = vmatmul.mubr.bf16.gmra.mxu0 %v2878_v14 }
 0x986   :  { %v2337_v0 = vpack.c.bf16 %v2330_v18, %v2329_v53  ;;  %4533 = vmatprep.mubr.msk.bf16.mxu0 %vm118_vm0, %v5064_v8 }
 0x987   :  { %v2307_v30 = vpop.permute.xlu1 %2306  ;;  %v2302_v33 = vpop.permute.xlu0 %2301 }
 0x988   :  { %v2332_v21 = vmul.f32 %v6017_v41, %v2307_v30  ;;  %v2331_v3 = vmul.f32 %v6008_v7, %v2302_v33  ;;  %4521 = vmatprep.mubr.bf16.mxu1 %v2337_v0  ;;  %v4930_v7 = vld [vmem:[%s6386_s13 + $0x8] sm:$0xff]  }
 0x98a   :  { %v2338_v51 = vpack.c.bf16 %v2332_v21, %v2331_v3 }
 0x98b   :  { %v2317_v15 = vpop.permute.xlu1 %2316  ;;  %v2312_v37 = vpop.permute.xlu0 %2311 }
 0x98c   :  { %v2334_v8 = vmul.f32 %v6023_v9, %v2317_v15  ;;  %v2333_v41 = vmul.f32 %v6014_v11, %v2312_v37  ;;  %4522 = vmatmul.mubr.bf16.vlgmr.msra.gmra.mxu1 %v2338_v51  ;;  %v6106_v9 = vld [vmem:[%s6389_s16] ss:$8 sps:$4 sm:$0xff]  }
 0x98d   :  { %4534 = vmatmul.mubr.msk.bf16.vlgmr.msra.gmra.mxu0 %vm118_vm0, %v5075_v12  ;;  %4542 = vmatpush3.bf16.msra.mxu1 %v4930_v7  ;;  %v4931_v12 = vld [vmem:[%s6386_s13] sm:$0xff]  }
 0x98e   :  { %v2339_v47 = vpack.c.bf16 %v2334_v8, %v2333_v41  ;;  %4537 = vmatprep.mubr.msk.bf16.mxu0 %vm118_vm0, %v5079_v13  ;;  %3357 = vmatpush1.bf16.msra.mxu0 %v6086_v56  ;;  %v3302_v8 = vlaneseq }
 0x98f   :  { %v2327_v11 = vpop.permute.xlu1 %2326  ;;  %v2322_v48 = vpop.permute.xlu0 %2321  ;;  %3358 = vmatprep.subr.bf16.mxu0 %v6091_v19  ;;  %4543 = vmatprep.subr.bf16.mxu1 %v4931_v12 }
 0x990   :  { %v2336_v49 = vmul.f32 %v6026_v55, %v2327_v11  ;;  %v2335_v13 = vmul.f32 %v6020_v60, %v2322_v48  ;;  %4525 = vmatprep.mubr.bf16.mxu1 %v2339_v47  ;;  %v3293_v60 = vpack.c.bf16 %v5803_v2, %v5786_v27  ;;  %v3294_v55 = vpack.c.bf16 %v5836_v62, %v5825_v46 }
 0x991   :  { %4544 = vmatpush3.bf16.msra.mxu1 %v4931_v12 }
 0x992   :  { %v2340_v26 = vpack.c.bf16 %v2336_v49, %v2335_v13  ;;  %3359 = vmatpush1.bf16.msra.mxu0 %v6106_v9  ;;  %3489 = vmatprep.subr.bf16.mxu1 %v4608_v35 }
 0x994   :  { %4526 = vmatmul.mubr.bf16.gmra.mxu1 %v2340_v26 }
 0x995   :  { %4538 = vmatmul.mubr.msk.bf16.gmra.mxu0 %vm118_vm0, %v5109_v20  ;;  %v3295_v20 = vpack.c.bf16 %v5834_v52, %v5817_v25 }
 0x996   :  { %3376 = vmatprep.mubr.bf16.mxu0 %v6413_v28 }
 0x99d   :  { %3960 = vmatmul.mubr.msk.bf16.vlgmr.msra.gmra.mxu0 %vm118_vm0, %v3292_v24 }
 0x99e   :  { %3386 = vmatprep.mubr.bf16.mxu0 %v6413_v28 }
 0x9a5   :  { %3961 = vmatmul.mubr.msk.bf16.gmra.mxu0 %vm118_vm0, %v3293_v60 }
 0x9a6   :  { %3396 = vmatprep.mubr.bf16.mxu0 %v6413_v28 }
 0x9ad   :  { %3962 = vmatmul.mubr.msk.bf16.gmra.mxu0 %vm118_vm0, %v3294_v55 }
 0x9ae   :  { %3406 = vmatprep.mubr.bf16.mxu0 %v6413_v28 }
 0x9b5   :  { %3963 = vmatmul.mubr.msk.bf16.gmra.mxu0 %vm118_vm0, %v3295_v20 }
 0xa3d   :  { %v4499_v1 = vpop.f32.mrf.mxu0 }
 0xa3f   :  { %v2921_v43 = vpop.f32.mrf.mxu0 }
 0xa41   :  { %v4500_v23 = vpop.f32.mrf.mxu0 }
 0xa43   :  { %v2924_v5 = vpop.f32.mrf.mxu0 }
 0xa45   :  { %v4503_v42 = vpop.f32.mrf.mxu0 }
 0xa47   :  { %v2937_v44 = vpop.f32.mrf.mxu0 }
 0xa49   :  { %v4504_v31 = vpop.f32.mrf.mxu0 }
 0xa4b   :  { %v2940_v45 = vpop.f32.mrf.mxu0 }
 0xa4c   :  { %v4523_v57 = vpop.f32.mrf.mxu1 }
 0xa4d   :  { %v4535_v39 = vpop.f32.mrf.mxu0  ;;  %v2995_v38 = vadd.f32 %v4523_v57, %v4499_v1  ;;  %v6148_v1 = vshrl.u32 %v3302_v8, 7 }
 0xa4e   :  { %v2986_v61 = vpop.f32.mrf.mxu1  ;;  %v3085_v30 = vadd.f32 %v4535_v39, %v3937_v40 }
 0xa4f   :  { %v2987_v36 = vadd.f32 %v2986_v61, %v2921_v43  ;;  %v3076_v16 = vpop.f32.mrf.mxu0  ;;  %v3109_v0 = vmul.f32 0.5, %v2995_v38 }
 0xa50   :  { %v4524_v22 = vpop.f32.mrf.mxu1  ;;  %v3077_v4 = vadd.f32 %v3937_v40, %v3076_v16 }
 0xa51   :  { %v2998_v35 = vadd.f32 %v4524_v22, %v4500_v23  ;;  %v4536_v17 = vpop.f32.mrf.mxu0  ;;  %v3107_v14 = vmul.f32 0.5, %v2987_v36  ;;  %v6142_v11 = vadd.f32 %v3109_v0, %v3085_v30 }
 0xa52   :  { %v3088_v63 = vadd.f32 %v4536_v17, %v3937_v40  ;;  %v2989_v50 = vpop.f32.mrf.mxu1 }
 0xa53   :  { %v3110_v59 = vmul.f32 0.5, %v2998_v35  ;;  %v2990_v18 = vadd.f32 %v2989_v50, %v2924_v5  ;;  %v3079_v53 = vpop.f32.mrf.mxu0  ;;  %v6138_v41 = vadd.f32 %v3107_v14, %v3077_v4 }
 0xa54   :  { %v3080_v33 = vadd.f32 %v3937_v40, %v3079_v53  ;;  %v4527_v21 = vpop.f32.mrf.mxu1 }
 0xa55   :  { %v3108_v3 = vmul.f32 0.5, %v2990_v18  ;;  %v4539_v51 = vpop.f32.mrf.mxu0  ;;  %v6136_v15 = vadd.f32 %v3110_v59, %v3088_v63  ;;  %v3011_v48 = vadd.f32 %v4527_v21, %v4503_v42  ;;  %v3308_v63 = vsub.s32 1, %v6148_v1 }
 0xa56   :  { %v3002_v37 = vpop.f32.mrf.mxu1 }
 0xa57   :  { %v6140_v7 = vadd.f32 %v3108_v3, %v3080_v33  ;;  %v3092_v47 = vpop.f32.mrf.mxu0  ;;  %v3003_v12 = vadd.f32 %v3002_v37, %v2937_v44  ;;  %v3124_v60 = vpack.c.bf16 %v6136_v15, %v6142_v11  ;;  %v3113_v42 = vmul.f32 0.5, %v3011_v48 }
 0xa58   :  { %v4528_v49 = vpop.f32.mrf.mxu1  ;;  %v3093_v23 = vadd.f32 %v3937_v40, %v3092_v47  ;;  %v3101_v44 = vadd.f32 %v4539_v51, %v3937_v40 }
 0xa59   :  { %v3123_v13 = vpack.c.bf16 %v6140_v7, %v6138_v41  ;;  %v3014_v26 = vadd.f32 %v4528_v49, %v4504_v31  ;;  %v4540_v24 = vpop.f32.mrf.mxu0  ;;  %v3111_v43 = vmul.f32 0.5, %v3003_v12 }
 0xa5a   :  { %v3104_v55 = vadd.f32 %v4540_v24, %v3937_v40  ;;  %v3005_v20 = vpop.f32.mrf.mxu1  ;;  %v6161_v17 = vadd.f32 %v3113_v42, %v3101_v44 }
 0xa5b   :  { %v3114_v5 = vmul.f32 0.5, %v3014_v26  ;;  %v3006_v57 = vadd.f32 %v3005_v20, %v2940_v45  ;;  %v3095_v39 = vpop.f32.mrf.mxu0  ;;  %4545 = vmatprep.mubr.msk.bf16.mxu1 %vm118_vm0, %v3123_v13  ;;  %v6156_v38 = vadd.f32 %v3111_v43, %v3093_v23  ;;  %v3304_v45 = vsub.s32 0, %v6148_v1  ;;  %v3433_v23 = vld [vmem:[%s6391_s18] sm:$0x3] }
 0xa5c   :  { %v3096_v61 = vadd.f32 %v3937_v40, %v3095_v39  ;;  %4546 = vmatmul.mubr.msk.bf16.vlgmr.msra.gmra.mxu1 %vm118_vm0, %v3124_v60  ;;  %v3300_v40 = vld [vmem:[%s6390_s17] sm:$0x3] }
 0xa5d   :  { %v3112_v31 = vmul.f32 0.5, %v3006_v57  ;;  %v3378_v36 = vpop.f32.mrf.mxu0  ;;  %3490 = vmatpush1.bf16.msra.mxu1 %v6086_v56  ;;  %v6153_v16 = vadd.f32 %v3114_v5, %v3104_v55  ;;  %v6172_v14 = vrot.slane %v3300_v40, %v3304_v45  ;;  %v6178_v59 = vrot.slane %v3300_v40, %v3308_v63 }
 0xa5e   :  { %3491 = vmatprep.subr.bf16.mxu1 %v6091_v19 }
 0xa5f   :  { %v6158_v22 = vadd.f32 %v3112_v31, %v3096_v61  ;;  %v3380_v35 = vpop.f32.mrf.mxu0  ;;  %v3126_v19 = vpack.c.bf16 %v6153_v16, %v6161_v17  ;;  %v3379_v53 = vadd.f32 %v3378_v36, %v6172_v14  ;;  %v6198_v31 = vrot.slane %v3433_v23, %v3304_v45 }
 0xa60   :  { %v3381_v30 = vadd.f32 %v3380_v35, %v6178_v59 }
 0xa61   :  { %v3125_v56 = vpack.c.bf16 %v6158_v22, %v6156_v38  ;;  %v3382_v50 = vpop.f32.mrf.mxu0  ;;  %3492 = vmatpush1.bf16.msra.mxu1 %v6106_v9  ;;  %4788 = vtanh.f32 %v3379_v53 }
 0xa62   :  { %v3383_v0 = vadd.f32 %v3382_v50, %v6172_v14 }
 0xa63   :  { %4549 = vmatprep.mubr.msk.bf16.mxu1 %vm118_vm0, %v3125_v56  ;;  %v3384_v4 = vpop.f32.mrf.mxu0 }
 0xa64   :  { %4550 = vmatmul.mubr.msk.bf16.gmra.mxu1 %vm118_vm0, %v3126_v19  ;;  %v3385_v3 = vadd.f32 %v3384_v4, %v6178_v59  ;;  %4790 = vtanh.f32 %v3383_v0 }
 0xa65   :  { %v3388_v18 = vpop.f32.mrf.mxu0  ;;  %3509 = vmatprep.mubr.bf16.mxu1 %v6413_v28  ;;  %4792 = vtanh.f32 %v3381_v30 }
 0xa66   :  { %v3389_v21 = vadd.f32 %v3388_v18, %v6172_v14 }
 0xa67   :  { %v3390_v9 = vpop.f32.mrf.mxu0 }
 0xa68   :  { %v3391_v8 = vadd.f32 %v3390_v9, %v6178_v59  ;;  %4794 = vtanh.f32 %v3389_v21  ;;  %v6206_v9 = vrot.slane %v3433_v23, %v3308_v63 }
 0xa69   :  { %v3392_v33 = vpop.f32.mrf.mxu0  ;;  %4796 = vtanh.f32 %v3385_v3 }
 0xa6a   :  { %v3393_v37 = vadd.f32 %v3392_v33, %v6172_v14 }
 0xa6b   :  { %v3394_v51 = vpop.f32.mrf.mxu0 }
 0xa6c   :  { %v3395_v12 = vadd.f32 %v3394_v51, %v6178_v59  ;;  %4798 = vtanh.f32 %v3393_v37 }
 0xa6d   :  { %v3398_v47 = vpop.f32.mrf.mxu0  ;;  %4800 = vtanh.f32 %v3391_v8 }
 0xa6e   :  { %v3399_v48 = vadd.f32 %v3398_v47, %v6172_v14  ;;  %v4789_v57 = vpop.eup %4788 }
 0xa6f   :  { %v3400_v49 = vpop.f32.mrf.mxu0  ;;  %v3445_v53 = vmul.f32 %v4789_v57, %v6198_v31 }
 0xa70   :  { %4802 = vtanh.f32 %v3399_v48  ;;  %v3401_v26 = vadd.f32 %v3400_v49, %v6178_v59 }
 0xa71   :  { %v3402_v13 = vpop.f32.mrf.mxu0  ;;  %4804 = vtanh.f32 %v3395_v12  ;;  %v4791_v42 = vpop.eup %4790 }
 0xa72   :  { %v3403_v24 = vadd.f32 %v3402_v13, %v6172_v14  ;;  %v4793_v61 = vpop.eup %4792  ;;  %v3447_v50 = vmul.f32 %v4791_v42, %v6198_v31 }
 0xa73   :  { %v3404_v60 = vpop.f32.mrf.mxu0  ;;  %v3446_v37 = vmul.f32 %v4793_v61, %v6206_v9 }
 0xa74   :  { %4806 = vtanh.f32 %v3403_v24  ;;  %v3405_v55 = vadd.f32 %v3404_v60, %v6178_v59  ;;  %v3582_v3 = vadd.f32 %v3447_v50, %v3445_v53 }
 0xa75   :  { %v3408_v20 = vpop.f32.mrf.mxu0  ;;  %4808 = vtanh.f32 %v3401_v26  ;;  %v4795_v35 = vpop.eup %4794 }
 0xa76   :  { %v3409_v43 = vadd.f32 %v3408_v20, %v6172_v14  ;;  %4810 = vtanh.f32 %v3405_v55  ;;  %v4797_v56 = vpop.eup %4796  ;;  %v3449_v45 = vmul.f32 %v4795_v35, %v6198_v31 }
 0xa77   :  { %v3410_v5 = vpop.f32.mrf.mxu0  ;;  %v3448_v33 = vmul.f32 %v4797_v56, %v6206_v9 }
 0xa78   :  { %4812 = vtanh.f32 %v3409_v43  ;;  %v3411_v39 = vadd.f32 %v3410_v5, %v6178_v59  ;;  %v3583_v1 = vadd.f32 %v3582_v3, %v3449_v45 }
 0xa79   :  { %v3412_v44 = vpop.f32.mrf.mxu0  ;;  %v4799_v4 = vpop.eup %4798  ;;  %v3632_v26 = vadd.f32 %v3448_v33, %v3446_v37 }
 0xa7a   :  { %4814 = vtanh.f32 %v3411_v39  ;;  %v3413_v36 = vadd.f32 %v3412_v44, %v6172_v14  ;;  %v4801_v18 = vpop.eup %4800  ;;  %v3451_v21 = vmul.f32 %v4799_v4, %v6198_v31 }
 0xa7b   :  { %v3414_v40 = vpop.f32.mrf.mxu0  ;;  %v3450_v8 = vmul.f32 %v4801_v18, %v6206_v9 }
 0xa7c   :  { %4816 = vtanh.f32 %v3413_v36  ;;  %v3415_v19 = vadd.f32 %v3414_v40, %v6178_v59  ;;  %v3584_v49 = vadd.f32 %v3583_v1, %v3451_v21 }
 0xa7d   :  { %v4803_v0 = vpop.eup %4802  ;;  %v3633_v43 = vadd.f32 %v3632_v26, %v3450_v8 }
 0xa7e   :  { %4818 = vtanh.f32 %v3415_v19  ;;  %v4805_v30 = vpop.eup %4804  ;;  %v3453_v47 = vmul.f32 %v4803_v0, %v6198_v31 }
 0xa7f   :  { %v3452_v13 = vmul.f32 %v4805_v30, %v6206_v9 }
 0xa80   :  { %v3585_v55 = vadd.f32 %v3584_v49, %v3453_v47 }
 0xa81   :  { %v4807_v51 = vpop.eup %4806  ;;  %v3634_v39 = vadd.f32 %v3633_v43, %v3452_v13  ;;  %v6414_v43 = vld [vmem:[#allocation3_spill] sm:$0xff] }
 0xa82   :  { %v4809_v63 = vpop.eup %4808  ;;  %v3455_v12 = vmul.f32 %v4807_v51, %v6198_v31 }
 0xa83   :  { %v4811_v48 = vpop.eup %4810  ;;  %v3454_v20 = vmul.f32 %v4809_v63, %v6206_v9 }
 0xa84   :  { %v3586_v5 = vadd.f32 %v3585_v55, %v3455_v12  ;;  %v3456_v57 = vmul.f32 %v4811_v48, %v6206_v9 }
 0xa85   :  { %v4813_v24 = vpop.eup %4812  ;;  %v3635_v35 = vadd.f32 %v3634_v39, %v3454_v20  ;;  %v6416_v39 = vld [vmem:[#allocation2_spill] sm:$0xff] }
 0xa86   :  { %v3457_v60 = vmul.f32 %v4813_v24, %v6198_v31 }
 0xa87   :  { %v4815_v23 = vpop.eup %4814  ;;  %v3636_v19 = vadd.f32 %v3635_v35, %v3456_v57 }
 0xa88   :  { %v3587_v61 = vadd.f32 %v3586_v5, %v3457_v60  ;;  %v3458_v36 = vmul.f32 %v4815_v23, %v6206_v9  ;;  %v6415_v5 = vld [vmem:[#allocation4_spill] sm:$0xff] }
 0xa89   :  { %v4817_v42 = vpop.eup %4816 }
 0xa8a   :  { %v3459_v44 = vmul.f32 %v4817_v42, %v6198_v31  ;;  %v3637_v4 = vadd.f32 %v3636_v19, %v3458_v36 }
 0xa8b   :  { %v4819_v40 = vpop.eup %4818 }
 0xa8c   :  { %v3588_v56 = vadd.f32 %v3587_v61, %v3459_v44  ;;  %v3460_v50 = vmul.f32 %v4819_v40, %v6206_v9 }
 0xa8e   :  { %3589 = vadd.xlane.f32.xlu0 %v3588_v56  ;;  %v3638_v18 = vadd.f32 %v3637_v4, %v3460_v50 }
 0xa92   :  { %3639 = vadd.xlane.f32.xlu0 %v3638_v18 }
 0xb17   :  { %v3590_v53 = vpop.xlane.xlu0 %3589 }
 0xb18   :  { %v3591_v45 = vrot.slane %v3590_v53, 4 }
 0xb1a   :  { %v3592_v0 = vadd.f32 %v3591_v45, %v3590_v53 }
 0xb1c   :  { %v3593_v30 = vrot.slane %v3592_v0, 2  ;;  %v4547_v33 = vpop.f32.mrf.mxu1 }
 0xb1d   :  { %v3182_v21 = vadd.f32 %v4547_v33, %v5701_v29 }
 0xb1e   :  { %v3173_v3 = vpop.f32.mrf.mxu1  ;;  %v3594_v51 = vadd.f32 %v3593_v30, %v3592_v0 }
 0xb1f   :  { %v3174_v37 = vadd.f32 %v3173_v3, %v5704_v34  ;;  %v3950_v8 = vmul.f32 -1.442695, %v3182_v21 }
 0xb20   :  { %v4548_v47 = vpop.f32.mrf.mxu1  ;;  %v3595_v1 = vrot.slane %v3594_v51, 1 }
 0xb21   :  { %v3948_v63 = vmul.f32 -1.442695, %v3174_v37  ;;  %v3185_v48 = vadd.f32 %v4548_v47, %v5708_v54 }
 0xb22   :  { %v3176_v12 = vpop.f32.mrf.mxu1  ;;  %v3596_v49 = vadd.f32 %v3595_v1, %v3594_v51 }
 0xb23   :  { %4820 = vpow2.f32 %v3948_v63  ;;  %v3951_v13 = vmul.f32 -1.442695, %v3185_v48  ;;  %v3177_v26 = vadd.f32 %v3176_v12, %v5712_v6 }
 0xb24   :  { %4822 = vpow2.f32 %v3950_v8  ;;  %v4551_v24 = vpop.f32.mrf.mxu1  ;;  %4553 = vpush %v3596_v49  ;;  %v4933_v49 = vld [vmem:[%s6408_s27 + $0x8] sm:$0xff] }
 0xb25   :  { %4824 = vpow2.f32 %v3951_v13  ;;  %v3949_v29 = vmul.f32 -1.442695, %v3177_v26  ;;  %v3198_v42 = vadd.f32 %v4551_v24, %v6416_v39 }
 0xb26   :  { %v3189_v60 = vpop.f32.mrf.mxu1 }
 0xb27   :  { %4826 = vpow2.f32 %v3949_v29  ;;  %v3190_v34 = vadd.f32 %v3189_v60, %v5720_v58  ;;  %v3954_v40 = vmul.f32 -1.442695, %v3198_v42 }
 0xb28   :  { %v4552_v55 = vpop.f32.mrf.mxu1 }
 0xb29   :  { %v3952_v20 = vmul.f32 -1.442695, %v3190_v34  ;;  %v3201_v23 = vadd.f32 %v4552_v55, %v6414_v43  ;;  %v4934_v55 = vld [vmem:[%s6408_s27 + $0x18] sm:$0xff] }
 0xb2a   :  { %v3192_v54 = vpop.f32.mrf.mxu1 }
 0xb2b   :  { %v3193_v57 = vadd.f32 %v3192_v54, %v6415_v5  ;;  %4828 = vpow2.f32 %v3952_v20  ;;  %v3955_v44 = vmul.f32 -1.442695, %v3201_v23  ;;  %v4935_v54 = vld [vmem:[%s6408_s27 + $0x10] sm:$0xff] }
 0xb2d   :  { %v3953_v6 = vmul.f32 -1.442695, %v3193_v57 }
 0xb2f   :  { %4830 = vpow2.f32 %v3953_v6 }
 0xb30   :  { %v4821_v61 = vpop.eup %4820  ;;  %4832 = vpow2.f32 %v3955_v44 }
 0xb31   :  { %v4823_v36 = vpop.eup %4822  ;;  %v3228_v35 = vadd.f32 1.0, %v4821_v61 }
 0xb32   :  { %v4825_v56 = vpop.eup %4824  ;;  %v3230_v19 = vadd.f32 1.0, %v4823_v36 }
 0xb33   :  { %4834 = vrcp.f32 %v3228_v35  ;;  %v3231_v58 = vadd.f32 1.0, %v4825_v56  ;;  %v4936_v56 = vld [vmem:[%s6408_s27 + $0x28] sm:$0xff] }
 0xb34   :  { %v4827_v50 = vpop.eup %4826  ;;  %4836 = vtanh.f32 %v6138_v41 }
 0xb35   :  { %v3229_v4 = vadd.f32 1.0, %v4827_v50  ;;  %4838 = vpow2.f32 %v3954_v40 }
 0xb36   :  { %4840 = vrcp.f32 %v3231_v58 }
 0xb37   :  { %4842 = vrcp.f32 %v3229_v4 }
 0xb38   :  { %4844 = vtanh.f32 %v6140_v7  ;;  %v4829_v18 = vpop.eup %4828 }
 0xb39   :  { %4846 = vrcp.f32 %v3230_v19  ;;  %v3232_v45 = vadd.f32 1.0, %v4829_v18 }
 0xb3a   :  { %4848 = vtanh.f32 %v6136_v15  ;;  %v4932_v15 = vld [vmem:[%s6408_s27] sm:$0xff] }
 0xb3c   :  { %v4831_v53 = vpop.eup %4830 }
 0xb3d   :  { %v3233_v0 = vadd.f32 1.0, %v4831_v53  ;;  %v4833_v30 = vpop.eup %4832 }
 0xb3e   :  { %v3235_v51 = vadd.f32 1.0, %v4833_v30 }
 0xb3f   :  { %4850 = vrcp.f32 %v3233_v0 }
 0xb40   :  { %v4835_v33 = vpop.eup %4834  ;;  %4852 = vtanh.f32 %v6142_v11 }
 0xb41   :  { %v4837_v41 = vpop.eup %4836  ;;  %v3268_v21 = vsub.f32 1.0, %v4835_v33  ;;  %4854 = vrcp.f32 %v3232_v45 }
 0xb42   :  { %v4839_v3 = vpop.eup %4838  ;;  %4856 = vtanh.f32 %v6158_v22  ;;  %v3260_v11 = vmul.f32 %v4837_v41, %v4835_v33  ;;  %v4938_v41 = vld [vmem:[%s6408_s27 + $0x38] sm:$0xff] }
 0xb43   :  { %v4841_v37 = vpop.eup %4840  ;;  %v3234_v1 = vadd.f32 1.0, %v4839_v3  ;;  %v3276_v63 = vmul.f32 %v4932_v15, %v3268_v21  ;;  %4858 = vrcp.f32 %v3235_v51 }
 0xb44   :  { %v4843_v8 = vpop.eup %4842  ;;  %v3271_v26 = vsub.f32 1.0, %v4841_v37  ;;  %4860 = vtanh.f32 %v6156_v38 }
 0xb45   :  { %v4845_v7 = vpop.eup %4844  ;;  %v3269_v47 = vsub.f32 1.0, %v4843_v8  ;;  %4862 = vrcp.f32 %v3234_v1  ;;  %v6242_v22 = vadd.f32 %v3276_v63, %v3260_v11 }
 0xb46   :  { %v4847_v48 = vpop.eup %4846  ;;  %v3261_v12 = vmul.f32 %v4845_v7, %v4843_v8  ;;  %v3279_v20 = vmul.f32 %v4934_v55, %v3271_v26  ;;  %4864 = vtanh.f32 %v6153_v16 }
 0xb47   :  { %v3277_v13 = vmul.f32 %v4933_v49, %v3269_v47  ;;  %v3270_v29 = vsub.f32 1.0, %v4847_v48  ;;  %v4849_v60 = vpop.eup %4848  ;;  %4866 = vtanh.f32 %v6161_v17  ;;  %v4937_v17 = vld [vmem:[%s6408_s27 + $0x20] sm:$0xff] }
 0xb48   :  { %v3263_v38 = vmul.f32 %v4849_v60, %v4841_v37  ;;  %v4939_v37 = vld [vmem:[%s6408_s27 + $0x30] sm:$0xff] }
 0xb49   :  { %v6244_v24 = vadd.f32 %v3277_v13, %v3261_v12  ;;  %v3278_v5 = vmul.f32 %v4935_v54, %v3270_v29 }
 0xb4a   :  { %v6257_v42 = vadd.f32 %v3279_v20, %v3263_v38 }
 0xb4b   :  { %v3461_v34 = vpack.c.bf16 %v6244_v24, %v6242_v22 }
 0xb4c   :  { %v4851_v43 = vpop.eup %4850 }
 0xb4d   :  { %v4853_v23 = vpop.eup %4852  ;;  %3964 = vmatmul.mubr.msk.bf16.vlgmr.msra.gmra.mxu1 %vm118_vm0, %v3461_v34  ;;  %v3273_v6 = vsub.f32 1.0, %v4851_v43 }
 0xb4e   :  { %v4855_v57 = vpop.eup %4854  ;;  %3519 = vmatprep.mubr.bf16.mxu1 %v6413_v28  ;;  %v3262_v39 = vmul.f32 %v4853_v23, %v4847_v48 }
 0xb4f   :  { %v3272_v61 = vsub.f32 1.0, %v4855_v57  ;;  %v4857_v36 = vpop.eup %4856  ;;  %v3281_v58 = vmul.f32 %v4936_v56, %v3273_v6 }
 0xb50   :  { %v6260_v44 = vadd.f32 %v3278_v5, %v3262_v39  ;;  %v4859_v35 = vpop.eup %4858  ;;  %v3265_v50 = vmul.f32 %v4857_v36, %v4851_v43 }
 0xb51   :  { %v4861_v16 = vpop.eup %4860  ;;  %v3280_v19 = vmul.f32 %v4937_v17, %v3272_v61  ;;  %v3275_v45 = vsub.f32 1.0, %v4859_v35 }
 0xb52   :  { %v3462_v40 = vpack.c.bf16 %v6257_v42, %v6260_v44  ;;  %v4863_v4 = vpop.eup %4862  ;;  %v3264_v18 = vmul.f32 %v4861_v16, %v4855_v57  ;;  %v6272_v53 = vadd.f32 %v3281_v58, %v3265_v50 }
 0xb53   :  { %v3274_v30 = vsub.f32 1.0, %v4863_v4  ;;  %v3283_v21 = vmul.f32 %v4938_v41, %v3275_v45  ;;  %v4865_v3 = vpop.eup %4864 }
 0xb54   :  { %v6274_v0 = vadd.f32 %v3280_v19, %v3264_v18  ;;  %v3267_v51 = vmul.f32 %v4865_v3, %v4859_v35  ;;  %v4867_v7 = vpop.eup %4866 }
 0xb55   :  { %3965 = vmatmul.mubr.msk.bf16.gmra.mxu1 %vm118_vm0, %v3462_v40  ;;  %v3282_v8 = vmul.f32 %v4939_v37, %v3274_v30  ;;  %v3266_v47 = vmul.f32 %v4867_v7, %v4863_v4  ;;  %s4554_s27 = spop %4553 }
 0xb56   :  { %3529 = vmatprep.mubr.bf16.mxu1 %v6413_v28  ;;  %v3463_v33 = vpack.c.bf16 %v6272_v53, %v6274_v0  ;;  %v6286_v1 = vadd.f32 %v3283_v21, %v3267_v51 }
 0xb57   :  { %v6288_v15 = vadd.f32 %v3282_v8, %v3266_v47 }
 0xb59   :  { %v3464_v63 = vpack.c.bf16 %v6286_v1, %v6288_v15 }
 0xb5d   :  { %3966 = vmatmul.mubr.msk.bf16.gmra.mxu1 %vm118_vm0, %v3463_v33 }
 0xb5e   :  { %3539 = vmatprep.mubr.bf16.mxu1 %v6413_v28 }
 0xb65   :  { %3967 = vmatmul.mubr.msk.bf16.gmra.mxu1 %vm118_vm0, %v3464_v63 }
 0xc0d   :  { %v3511_v48 = vpop.f32.mrf.mxu1 }
 0xc0e   :  { %v3512_v26 = vadd.f32 %v3511_v48, %v6172_v14 }
 0xc0f   :  { %v3513_v11 = vpop.f32.mrf.mxu1 }
 0xc10   :  { %v3514_v29 = vadd.f32 %v3513_v11, %v6178_v59  ;;  %4868 = vtanh.f32 %v3512_v26 }
 0xc11   :  { %v3515_v12 = vpop.f32.mrf.mxu1 }
 0xc12   :  { %v3516_v60 = vadd.f32 %v3515_v12, %v6172_v14  ;;  %4870 = vtanh.f32 %v3514_v29 }
 0xc13   :  { %v3517_v49 = vpop.f32.mrf.mxu1 }
 0xc14   :  { %v3518_v34 = vadd.f32 %v3517_v49, %v6178_v59  ;;  %4872 = vtanh.f32 %v3516_v60 }
 0xc15   :  { %v3521_v13 = vpop.f32.mrf.mxu1 }
 0xc16   :  { %v3522_v20 = vadd.f32 %v3521_v13, %v6172_v14  ;;  %4874 = vtanh.f32 %v3518_v34 }
 0xc17   :  { %v3523_v28 = vpop.f32.mrf.mxu1 }
 0xc18   :  { %v3524_v43 = vadd.f32 %v3523_v28, %v6178_v59  ;;  %4876 = vtanh.f32 %v3522_v20 }
 0xc19   :  { %v3525_v55 = vpop.f32.mrf.mxu1 }
 0xc1a   :  { %v3526_v38 = vadd.f32 %v3525_v55, %v6172_v14  ;;  %4878 = vtanh.f32 %v3524_v43 }
 0xc1b   :  { %v3527_v23 = vpop.f32.mrf.mxu1 }
 0xc1c   :  { %v3528_v54 = vadd.f32 %v3527_v23, %v6178_v59  ;;  %4880 = vtanh.f32 %v3526_v38 }
 0xc1d   :  { %v3531_v5 = vpop.f32.mrf.mxu1  ;;  %v4869_v16 = vpop.eup %4868 }
 0xc1e   :  { %v3532_v57 = vadd.f32 %v3531_v5, %v6172_v14  ;;  %4882 = vtanh.f32 %v3528_v54  ;;  %v3566_v7 = vmul.f32 %v4869_v16, %v6198_v31 }
 0xc1f   :  { %v3533_v39 = vpop.f32.mrf.mxu1  ;;  %v4871_v17 = vpop.eup %4870 }
 0xc20   :  { %v3534_v6 = vadd.f32 %v3533_v39, %v6178_v59  ;;  %4884 = vtanh.f32 %v3532_v57 }
 0xc21   :  { %v3535_v61 = vpop.f32.mrf.mxu1  ;;  %v4873_v4 = vpop.eup %4872 }
 0xc22   :  { %v3536_v36 = vadd.f32 %v3535_v61, %v6172_v14  ;;  %4886 = vtanh.f32 %v3534_v6  ;;  %v3568_v3 = vmul.f32 %v4873_v4, %v6198_v31 }
 0xc23   :  { %v3537_v35 = vpop.f32.mrf.mxu1  ;;  %v4875_v45 = vpop.eup %4874 }
 0xc24   :  { %4888 = vtanh.f32 %v3536_v36  ;;  %v3538_v40 = vadd.f32 %v3537_v35, %v6178_v59  ;;  %v3569_v47 = vmul.f32 %v4875_v45, %v6206_v9  ;;  %v3600_v13 = vadd.f32 %v3568_v3, %v3566_v7  ;;  %v3640_v45 = vpop.xlane.xlu0 %3639 }
 0xc25   :  { %v3541_v56 = vpop.f32.mrf.mxu1  ;;  %v4877_v33 = vpop.eup %4876 }
 0xc26   :  { %4890 = vtanh.f32 %v3538_v40  ;;  %v3542_v58 = vadd.f32 %v3541_v56, %v6172_v14  ;;  %v3570_v63 = vmul.f32 %v4877_v33, %v6198_v31 }
 0xc27   :  { %v3543_v50 = vpop.f32.mrf.mxu1  ;;  %v4879_v21 = vpop.eup %4878 }
 0xc28   :  { %4892 = vtanh.f32 %v3542_v58  ;;  %v3544_v19 = vadd.f32 %v3543_v50, %v6178_v59  ;;  %v3571_v12 = vmul.f32 %v4879_v21, %v6206_v9  ;;  %v3601_v29 = vadd.f32 %v3600_v13, %v3570_v63 }
 0xc29   :  { %v3545_v18 = vpop.f32.mrf.mxu1  ;;  %v4881_v37 = vpop.eup %4880 }
 0xc2a   :  { %4894 = vtanh.f32 %v3544_v19  ;;  %v3546_v30 = vadd.f32 %v3545_v18, %v6172_v14  ;;  %v3567_v14 = vmul.f32 %v4871_v17, %v6206_v9  ;;  %v3572_v49 = vmul.f32 %v4881_v37, %v6198_v31 }
 0xc2b   :  { %v3547_v41 = vpop.f32.mrf.mxu1  ;;  %v4883_v8 = vpop.eup %4882 }
 0xc2c   :  { %4896 = vtanh.f32 %v3546_v30  ;;  %v3548_v51 = vadd.f32 %v3547_v41, %v6178_v59  ;;  %v3573_v28 = vmul.f32 %v4883_v8, %v6206_v9  ;;  %v3650_v60 = vadd.f32 %v3569_v47, %v3567_v14 }
 0xc2d   :  { %v4885_v48 = vpop.eup %4884  ;;  %v3602_v20 = vadd.f32 %v3601_v29, %v3572_v49  ;;  %v3641_v30 = vrot.slane %v3640_v45, 4 }
 0xc2e   :  { %4898 = vtanh.f32 %v3548_v51  ;;  %v3574_v59 = vmul.f32 %v4885_v48, %v6198_v31  ;;  %v3651_v23 = vadd.f32 %v3650_v60, %v3571_v12 }
 0xc2f   :  { %v4887_v11 = vpop.eup %4886  ;;  %v3642_v33 = vadd.f32 %v3641_v30, %v3640_v45 }
 0xc30   :  { %v3575_v43 = vmul.f32 %v4887_v11, %v6206_v9  ;;  %v3603_v5 = vadd.f32 %v3602_v20, %v3574_v59  ;;  %v3652_v39 = vadd.f32 %v3651_v23, %v3573_v28  ;;  %v3598_v59 = vstv %s4554_s27 }
 0xc31   :  { %v4889_v26 = vpop.eup %4888  ;;  %v3643_v41 = vrot.slane %v3642_v33, 2  ;;  %v3599_v28 = vmul.f32 0.015625, %v3598_v59 }
 0xc32   :  { %v3576_v55 = vmul.f32 %v4889_v26, %v6198_v31  ;;  %v3653_v35 = vadd.f32 %v3652_v39, %v3575_v43 }
 0xc33   :  { %v4891_v34 = vpop.eup %4890 }
 0xc34   :  { %v3577_v57 = vmul.f32 %v4891_v34, %v6206_v9  ;;  %v3604_v61 = vadd.f32 %v3603_v5, %v3576_v55 }
 0xc35   :  { %v4893_v38 = vpop.eup %4892 }
 0xc36   :  { %v3578_v54 = vmul.f32 %v4893_v38, %v6198_v31  ;;  %v3654_v16 = vadd.f32 %v3653_v35, %v3577_v57 }
 0xc37   :  { %v4895_v6 = vpop.eup %4894 }
 0xc38   :  { %v3579_v36 = vmul.f32 %v4895_v6, %v6206_v9  ;;  %v3605_v58 = vadd.f32 %v3604_v61, %v3578_v54 }
 0xc39   :  { %v4897_v40 = vpop.eup %4896 }
 0xc3a   :  { %v3580_v56 = vmul.f32 %v4897_v40, %v6198_v31  ;;  %v3655_v4 = vadd.f32 %v3654_v16, %v3579_v36  ;;  %v3644_v31 = vadd.f32 %v3643_v41, %v3642_v33 }
 0xc3b   :  { %v4899_v50 = vpop.eup %4898 }
 0xc3c   :  { %v3606_v17 = vadd.f32 %v3605_v58, %v3580_v56  ;;  %v3581_v19 = vmul.f32 %v4899_v50, %v6206_v9  ;;  %v3645_v11 = vrot.slane %v3644_v31, 1 }
 0xc3e   :  { %3607 = vadd.xlane.f32.xlu1 %v3606_v17  ;;  %v3656_v18 = vadd.f32 %v3655_v4, %v3581_v19  ;;  %v3646_v13 = vadd.f32 %v3645_v11, %v3644_v31 }
 0xc40   :  { %3657 = vadd.xlane.f32.xlu0 %v3656_v18 }
 0xcc7   :  { %v3608_v21 = vpop.xlane.xlu1 %3607 }
 0xcc8   :  { %v3609_v3 = vrot.slane %v3608_v21, 4 }
 0xcc9   :  { %v3658_v51 = vpop.xlane.xlu0 %3657 }
 0xcca   :  { %v3610_v37 = vadd.f32 %v3609_v3, %v3608_v21  ;;  %v3659_v8 = vrot.slane %v3658_v51, 4 }
 0xccc   :  { %v3611_v7 = vrot.slane %v3610_v37, 2  ;;  %v3660_v47 = vadd.f32 %v3659_v8, %v3658_v51 }
 0xcce   :  { %v3612_v63 = vadd.f32 %v3611_v7, %v3610_v37  ;;  %v3661_v48 = vrot.slane %v3660_v47, 2 }
 0xcd0   :  { %v3662_v9 = vadd.f32 %v3661_v48, %v3660_v47  ;;  %v3613_v14 = vrot.slane %v3612_v63, 1 }
 0xcd2   :  { %v3614_v12 = vadd.f32 %v3613_v14, %v3612_v63  ;;  %v3663_v49 = vrot.slane %v3662_v9, 1 }
 0xcd4   :  { %4555 = vpush %v3614_v12  ;;  %v3664_v26 = vadd.f32 %v3663_v49, %v3662_v9 }
 0xcd5   :  { %4557 = vpush %v3646_v13 }
 0xcd6   :  { %4559 = vpush %v3664_v26 }
 0xd05   :  { %s4556_s7 = spop %4555 }
 0xd06   :  { %v3616_v29 = vstv %s4556_s7  ;;  %s4558_s15 = spop %4557 }
 0xd07   :  { %v3617_v60 = vmul.f32 0.015625, %v3616_v29  ;;  %v3648_v34 = vstv %s4558_s15  ;;  %s4560_s20 = spop %4559 }
 0xd08   :  { %v3666_v55 = vstv %s4560_s20  ;;  %v3649_v43 = vmul.f32 0.015625, %v3648_v34 }
 0xd09   :  { %v3618_v20 = vmax.f32 %v3599_v28, %v3617_v60  ;;  %v3667_v23 = vmul.f32 0.015625, %v3666_v55 }
 0xd0b   :  { %v3619_v38 = vsub.f32 %v3599_v28, %v3618_v20  ;;  %v3622_v54 = vsub.f32 %v3617_v60, %v3618_v20  ;;  %v3668_v5 = vmax.f32 %v3649_v43, %v3667_v23 }
 0xd0d   :  { %v3620_v57 = vmul.f32 1.442695, %v3619_v38  ;;  %v3623_v39 = vmul.f32 1.442695, %v3622_v54  ;;  %v3669_v6 = vsub.f32 %v3649_v43, %v3668_v5  ;;  %v3672_v61 = vsub.f32 %v3667_v23, %v3668_v5 }
 0xd0f   :  { %4900 = vpow2.f32 %v3620_v57  ;;  %v3670_v36 = vmul.f32 1.442695, %v3669_v6  ;;  %v3673_v35 = vmul.f32 1.442695, %v3672_v61 }
 0xd10   :  { %4902 = vpow2.f32 %v3623_v39 }
 0xd11   :  { %4904 = vpow2.f32 %v3670_v36 }
 0xd12   :  { %4906 = vpow2.f32 %v3673_v35 }
 0xd1c   :  { %v4901_v40 = vpop.eup %4900 }
 0xd1d   :  { %v4903_v56 = vpop.eup %4902 }
 0xd1e   :  { %v4905_v58 = vpop.eup %4904  ;;  %v3625_v16 = vadd.f32 %v4903_v56, %v4901_v40 }
 0xd1f   :  { %v4907_v50 = vpop.eup %4906 }
 0xd20   :  { %4908 = vrcp.f32 %v3625_v16  ;;  %v3675_v17 = vadd.f32 %v4907_v50, %v4905_v58 }
 0xd22   :  { %4910 = vrcp.f32 %v3675_v17 }
 0xd2d   :  { %v4909_v19 = vpop.eup %4908 }
 0xd2e   :  { %v3628_v18 = vmul.f32 %v4909_v19, %v4901_v40  ;;  %v3630_v45 = vmul.f32 %v4909_v19, %v4903_v56 }
 0xd2f   :  { %v4911_v4 = vpop.eup %4910 }
 0xd30   :  { %v3678_v30 = vmul.f32 %v4911_v4, %v4905_v58  ;;  %v3680_v33 = vmul.f32 %v4911_v4, %v4907_v50 }
 0xd32   :  { %v3679_v41 = vadd.f32 %v3678_v30, %v3628_v18  ;;  %v3681_v21 = vadd.f32 %v3680_v33, %v3630_v45 }
 0xd34   :  { %v3682_v3 = vmul.f32 0.5, %v3679_v41  ;;  %v3691_v51 = vmul.f32 0.5, %v3681_v21 }
 0xd36   :  { %v3683_v37 = vmul.f32 %v3682_v3, %v5788_v32  ;;  %v3684_v8 = vmul.f32 %v3682_v3, %v5805_v10  ;;  %v3685_v31 = vmul.f32 %v3682_v3, %v5786_v27  ;;  %v3686_v7 = vmul.f32 %v3682_v3, %v5803_v2 }
 0xd37   :  { %v3687_v47 = vmul.f32 %v3682_v3, %v5825_v46  ;;  %v3688_v63 = vmul.f32 %v3682_v3, %v5836_v62  ;;  %v3689_v48 = vmul.f32 %v3682_v3, %v5817_v25  ;;  %v3690_v11 = vmul.f32 %v3682_v3, %v5834_v52 }
 0xd38   :  { %v3692_v9 = vmul.f32 %v3691_v51, %v6242_v22  ;;  %v3693_v14 = vmul.f32 %v3691_v51, %v6244_v24  ;;  %v3694_v32 = vmul.f32 %v3691_v51, %v6260_v44  ;;  %v3695_v10 = vmul.f32 %v3691_v51, %v6257_v42 }
 0xd39   :  { %v3696_v27 = vmul.f32 %v3691_v51, %v6274_v0  ;;  %v3697_v2 = vmul.f32 %v3691_v51, %v6272_v53  ;;  %v3698_v46 = vmul.f32 %v3691_v51, %v6288_v15  ;;  %v3699_v62 = vmul.f32 %v3691_v51, %v6286_v1 }
 0xd3a   :  { %v3700_v12 = vadd.f32 %v3692_v9, %v3683_v37  ;;  %v3701_v25 = vadd.f32 %v3693_v14, %v3684_v8  ;;  %v3702_v49 = vadd.f32 %v3694_v32, %v3685_v31  ;;  %v3703_v52 = vadd.f32 %v3695_v10, %v3686_v7 }
 0xd3b   :  { %v3704_v13 = vadd.f32 %v3696_v27, %v3687_v47  ;;  %v3705_v22 = vadd.f32 %v3697_v2, %v3688_v63  ;;  %v3706_v26 = vadd.f32 %v3698_v46, %v3689_v48  ;;  %v3707_v24 = vadd.f32 %v3699_v62, %v3690_v11 }
 0xd3c   :  { %3708 = vst.msk [vmem:[%s6392_s19] sm:$0xff] %vm118_vm0, %v3700_v12  ;;  %3709 = vst.msk [vmem:[%s6392_s19 + $0x8] sm:$0xff] %vm118_vm0, %v3701_v25 }
 0xd3d   :  { %3710 = vst.msk [vmem:[%s6392_s19 + $0x10] sm:$0xff] %vm118_vm0, %v3702_v49  ;;  %3711 = vst.msk [vmem:[%s6392_s19 + $0x18] sm:$0xff] %vm118_vm0, %v3703_v52 }
 0xd3e   :  { %3712 = vst.msk [vmem:[%s6392_s19 + $0x20] sm:$0xff] %vm118_vm0, %v3704_v13  ;;  %3713 = vst.msk [vmem:[%s6392_s19 + $0x28] sm:$0xff] %vm118_vm0, %v3705_v22 }
 0xd3f   :  { %3714 = vst.msk [vmem:[%s6392_s19 + $0x30] sm:$0xff] %vm118_vm0, %v3706_v26  ;;  %3715 = vst.msk [vmem:[%s6392_s19 + $0x38] sm:$0xff] %vm118_vm0, %v3707_v24 }

</bundles_post_ra>
